<compile_context>
chip_gen: v7x
topology: tpu7x:2x2x1
jax: 0.10.0
libtpu: 0.0.40
codegen_flags: <defaults>
</compile_context>

<pallas_src>
import numpy as np
import jax
import jax.numpy as jnp
from jax.experimental import pallas as pl
from jax.experimental.pallas import tpu as pltpu

H = 32    # hidden_size
V = 50    # input_size (vocab)
L = 8     # obs sequence length
B = 1     # batch size (module's persistent state_hidden assumes batch 1)
C = 6     # number of commands (nb_cmds)
LC = 5    # command token length


# --------------------------------------------------------------- fused kernel
def fused_forward_kernel(
        obs_ref, cmds_ref,                       # SMEM scalar prefetch: (L,B), (LC,C) int32
        emb_ref,                                 # (V, 1, H)  embedding table (VMEM)
        ewi, ewh, eb3, ebhn,                     # encoder GRU: (H,3H),(H,3H),(1,3H),(1,H)
        cwi, cwh, cb3, cbhn,                     # cmd-encoder GRU
        swi, swh, sb3, sbhn,                     # state GRU
        h0_ref,                                  # (B, H) previous persistent state_hidden
        w1s, w1c, b1, aw, ab, cw, cb,            # scorer: linear_1 split, actor, critic
        act_ref, idx_ref, val_ref, hn_ref):      # outputs

    Lq, Bq = obs_ref.shape
    LCq, Cq = cmds_ref.shape
    Hq = emb_ref.shape[2]

    def embed_rows(toks):
        rows = [emb_ref[tok] for tok in toks]            # each (1, H), dynamic leading index
        return rows[0] if len(rows) == 1 else jnp.concatenate(rows, axis=0)

    def gru_cell(x, h, wi, wh, b3, bhn):
        # fused 3-gate matmuls; b3 = [bir+bhr | biz+bhz | bin], bhn kept separate
        gi = jnp.dot(x, wi, preferred_element_type=jnp.float32) + b3   # (rows, 3H)
        gh = jnp.dot(h, wh, preferred_element_type=jnp.float32)        # (rows, 3H)
        r = jax.nn.sigmoid(gi[:, :Hq] + gh[:, :Hq])
        z = jax.nn.sigmoid(gi[:, Hq:2 * Hq] + gh[:, Hq:2 * Hq])
        n = jnp.tanh(gi[:, 2 * Hq:] + r * (gh[:, 2 * Hq:] + bhn))
        return (1.0 - z) * n + z * h

    # ---------------- encoder GRU over obs (unrolled, h carried in vregs) ----
    ewi_v, ewh_v, eb3_v, ebhn_v = ewi[...], ewh[...], eb3[...], ebhn[...]
    h_enc = jnp.zeros((Bq, Hq), jnp.float32)
    for t in range(Lq):
        x_t = embed_rows([obs_ref[t, b] for b in range(Bq)])           # (B, H)
        h_enc = gru_cell(x_t, h_enc, ewi_v, ewh_v, eb3_v, ebhn_v)

    # ---------------- cmd-encoder GRU over commands ---------------------------
    cwi_v, cwh_v, cb3_v, cbhn_v = cwi[...], cwh[...], cb3[...], cbhn[...]
    h_cmd = jnp.zeros((Cq, Hq), jnp.float32)
    for t in range(LCq):
        x_t = embed_rows([cmds_ref[t, c] for c in range(Cq)])          # (C, H)
        h_cmd = gru_cell(x_t, h_cmd, cwi_v, cwh_v, cb3_v, cbhn_v)

    # ---------------- state GRU: single step on the persistent hidden --------
    h_state = gru_cell(h_enc, h0_ref[...], swi[...], swh[...], sb3[...], sbhn[...])
    hn_ref[...] = h_state                                              # written once

    # ---------------- scorer: linear_1 + ReLU + actor + ReLU ------------------
    a_part = jnp.dot(h_state, w1s[...], preferred_element_type=jnp.float32)   # (B, 2H)
    c_part = jnp.dot(h_cmd, w1c[...], preferred_element_type=jnp.float32)     # (C, 2H)
    x = jnp.maximum(a_part[:, None, :] + c_part[None, :, :]
                    + b1[...][None, :, :], 0.0)                        # (B, C, 2H)
    scores = jnp.maximum(jnp.sum(x * aw[...][None, :, :], axis=-1)
                         + ab[...], 0.0)                               # (B, C)
    act_ref[...] = scores

    # arg-max of softmax(scores) == arg-max of scores (first occurrence),
    # clamped to a valid index for robustness.
    m = jnp.max(scores, axis=1, keepdims=True)
    ids = jax.lax.broadcasted_iota(jnp.int32, scores.shape, 1)
    picked = jnp.where(scores >= m, ids, Cq)
    idx_ref[...] = jnp.minimum(jnp.min(picked, axis=1, keepdims=True), Cq - 1)

    # critic on state_output (== h_state for a length-1 sequence)
    val_ref[...] = (jnp.dot(h_state, cw[...], preferred_element_type=jnp.float32)
                    + cb[...])


def _fullspec(shape):
    nd = len(shape)

    def idx(i, *prefetch, _nd=nd):
        return (0,) * _nd

    return pl.BlockSpec(shape, idx)


# ------------------------------------------------------------- forward wrapper
def actorz_critic_forward(packed, obs, commands, state_hidden):
    """obs: (L, B) int32, commands: (LC, C) int32, state_hidden: (B, H) f32.
    mode='train'/'test' with method='arg-max'.
    Returns (action_state (1,B,C), action_index (B,1,1), state_value (1,B,1),
    new_state_hidden (B,H))."""
    _, Bx = obs.shape
    _, Cx = commands.shape
    Hx = state_hidden.shape[-1]

    ewi, ewh, eb3, ebhn = packed["enc"]
    cwi, cwh, cb3, cbhn = packed["cmd"]
    swi, swh, sb3, sbhn = packed["state"]

    in_arrays = [packed["emb"],
                 ewi, ewh, eb3, ebhn,
                 cwi, cwh, cb3, cbhn,
                 swi, swh, sb3, sbhn,
                 state_hidden,
                 packed["w1s"], packed["w1c"], packed["b1"],
                 packed["aw"], packed["ab"], packed["cw"], packed["cb"]]

    out_shape = [jax.ShapeDtypeStruct((Bx, Cx), jnp.float32),
                 jax.ShapeDtypeStruct((Bx, 1), jnp.int32),
                 jax.ShapeDtypeStruct((Bx, 1), jnp.float32),
                 jax.ShapeDtypeStruct((Bx, Hx), jnp.float32)]

    act, idx, val, hn = pl.pallas_call(
        fused_forward_kernel,
        grid_spec=pltpu.PrefetchScalarGridSpec(
            num_scalar_prefetch=2,
            grid=(1,),
            in_specs=[_fullspec(a.shape) for a in in_arrays],
            out_specs=[_fullspec((Bx, Cx)), _fullspec((Bx, 1)),
                       _fullspec((Bx, 1)), _fullspec((Bx, Hx))]),
        out_shape=out_shape,
        compiler_params=pltpu.CompilerParams(
            dimension_semantics=("arbitrary",)),
    )(obs.astype(jnp.int32), commands.astype(jnp.int32), *in_arrays)

    action_state = act[None, :, :]     # (1, B, C)
    action_index = idx[:, :, None]     # (B, 1, 1)   'arg-max'
    state_value = val[None, :, :]      # (1, B, 1)
    return action_state, action_index, state_value, hn


# ------------------------------------------------------------ parameter setup
def _uniform(key, shape, bound):
    return jax.random.uniform(key, shape, jnp.float32, -bound, bound)


def init_params(key):
    """PyTorch-layout parameters."""
    ks = jax.random.split(key, 10)
    bound_h = 1.0 / np.sqrt(H)
    bound_2h = 1.0 / np.sqrt(2 * H)

    def gru(k):
        kk = jax.random.split(k, 4)
        return {"w_ih": _uniform(kk[0], (3 * H, H), bound_h),
                "w_hh": _uniform(kk[1], (3 * H, H), bound_h),
                "b_ih": _uniform(kk[2], (3 * H,), bound_h),
                "b_hh": _uniform(kk[3], (3 * H,), bound_h)}

    p = {"emb": jax.random.normal(ks[0], (V, H), jnp.float32),
         "enc": gru(ks[1]), "cmd": gru(ks[2]), "state": gru(ks[3]),
         "lin1_w": _uniform(ks[4], (2 * H, 2 * H), bound_2h),
         "lin1_b": _uniform(ks[5], (2 * H,), bound_2h),
         "critic_w": _uniform(ks[6], (1, H), bound_h),
         "critic_b": _uniform(ks[7], (1,), bound_h),
         "actor_w": _uniform(ks[8], (1, 2 * H), bound_2h),
         "actor_b": _uniform(ks[9], (1,), bound_2h)}
    return p


def pack_params(p):
    """Repack PyTorch-layout params into the kernel layout (done once)."""
    def pack_gru(g):
        h = g["w_hh"].shape[1]
        wi = g["w_ih"].T                              # (H, 3H)
        wh = g["w_hh"].T                              # (H, 3H)
        b3 = jnp.concatenate([g["b_ih"][:2 * h] + g["b_hh"][:2 * h],
                              g["b_ih"][2 * h:]])[None, :]          # (1, 3H)
        bhn = g["b_hh"][2 * h:][None, :]                            # (1, H)
        return wi, wh, b3, bhn

    packed = {
        "emb": p["emb"][:, None, :],                  # (V, 1, H) for dynamic row gather
        "enc": pack_gru(p["enc"]),
        "cmd": pack_gru(p["cmd"]),
        "state": pack_gru(p["state"]),
        "w1s": p["lin1_w"][:, :H].T,                  # (H, 2H) acts on state part
        "w1c": p["lin1_w"][:, H:].T,                  # (H, 2H) acts on cmd part
        "b1": p["lin1_b"][None, :],                   # (1, 2H)
        "aw": p["actor_w"],                           # (1, 2H)
        "ab": p["actor_b"][None, :],                  # (1, 1)
        "cw": p["critic_w"].T,                        # (H, 1)
        "cb": p["critic_b"][None, :],                 # (1, 1)
    }
    return jax.tree_util.tree_map(lambda a: jnp.asarray(a, jnp.float32), packed)


# -------------------------------------------------------- pure-JAX reference
def _gru_ref(x, h0, g):
    def step(h, xt):
        gi = xt @ g["w_ih"].T + g["b_ih"]
        gh = h @ g["w_hh"].T + g["b_hh"]
        r = jax.nn.sigmoid(gi[:, :H] + gh[:, :H])
        z = jax.nn.sigmoid(gi[:, H:2 * H] + gh[:, H:2 * H])
        n = jnp.tanh(gi[:, 2 * H:] + r * gh[:, 2 * H:])
        hn = (1.0 - z) * n + z * h
        return hn, hn
    h_last, outs = jax.lax.scan(step, h0, x)
    return outs, h_last


def _forward_ref(params, obs, commands, state_hidden):
    Bx, Cx = obs.shape[1], commands.shape[1]
    emb = params["emb"]
    embedded = jnp.take(emb, obs, axis=0)
    cmds_emb = jnp.take(emb, commands, axis=0)
    _, enc_h = _gru_ref(embedded, jnp.zeros((Bx, H)), params["enc"])
    _, cmd_h = _gru_ref(cmds_emb, jnp.zeros((Cx, H)), params["cmd"])
    _, state_h = _gru_ref(enc_h[None], state_hidden, params["state"])
    inp = jnp.concatenate([jnp.broadcast_to(state_h[:, None, :], (Bx, Cx, H)),
                           jnp.broadcast_to(cmd_h[None, :, :], (Bx, Cx, H))], axis=-1)
    x = jax.nn.relu(inp @ params["lin1_w"].T + params["lin1_b"])
    act = jax.nn.relu(x @ params["actor_w"].T + params["actor_b"])[..., 0]   # (B, C)
    idx = jnp.argmax(jax.nn.softmax(act, axis=-1), axis=-1)
    val = state_h @ params["critic_w"].T + params["critic_b"]
    return act[None], idx[:, None, None].astype(jnp.int32), val[None], state_h


if __name__ == "__main__":
    key = jax.random.PRNGKey(0)
    k_obs1, k_obs2, k_cmd, k_par = jax.random.split(key, 4)
    obs1 = jax.random.randint(k_obs1, (L, B), 0, V, dtype=jnp.int32)
    obs2 = jax.random.randint(k_obs2, (L, B), 0, V, dtype=jnp.int32)
    commands = jax.random.randint(k_cmd, (LC, C), 0, V, dtype=jnp.int32)
    params = init_params(k_par)
    packed = pack_params(params)

    fwd = jax.jit(actorz_critic_forward)

    h0 = jnp.zeros((B, H), jnp.float32)                     # == reset_hidden(1)
    a1, i1, v1, h1 = fwd(packed, obs1, commands, h0)
    a2, i2, v2, h2 = fwd(packed, obs2, commands, h1)        # persistent hidden threaded
    jax.block_until_ready((a1, i1, v1, h1, a2, i2, v2, h2))

    ra1, ri1, rv1, rh1 = _forward_ref(params, obs1, commands, h0)
    ra2, ri2, rv2, rh2 = _forward_ref(params, obs2, commands, rh1)

    for got, ref in [(a1, ra1), (v1, rv1), (h1, rh1),
                     (a2, ra2), (v2, rv2), (h2, rh2)]:
        np.testing.assert_allclose(np.asarray(got), np.asarray(ref),
                                   rtol=1e-5, atol=1e-5)
    np.testing.assert_array_equal(np.asarray(i1), np.asarray(ri1))
    np.testing.assert_array_equal(np.asarray(i2), np.asarray(ri2))

    print("KERNEL_OK")
</pallas_src>

<mosaic_0001>
module attributes {stable_mosaic.version = 11 : i64} {
  func.func @fused_forward_kernel(%arg0: i32, %arg1: memref<8x1xi32, #tpu.memory_space<smem>>, %arg2: memref<5x6xi32, #tpu.memory_space<smem>>, %arg3: memref<50x1x32xf32, #tpu.memory_space<vmem>>, %arg4: memref<32x96xf32, #tpu.memory_space<vmem>>, %arg5: memref<32x96xf32, #tpu.memory_space<vmem>>, %arg6: memref<1x96xf32, #tpu.memory_space<vmem>>, %arg7: memref<1x32xf32, #tpu.memory_space<vmem>>, %arg8: memref<32x96xf32, #tpu.memory_space<vmem>>, %arg9: memref<32x96xf32, #tpu.memory_space<vmem>>, %arg10: memref<1x96xf32, #tpu.memory_space<vmem>>, %arg11: memref<1x32xf32, #tpu.memory_space<vmem>>, %arg12: memref<32x96xf32, #tpu.memory_space<vmem>>, %arg13: memref<32x96xf32, #tpu.memory_space<vmem>>, %arg14: memref<1x96xf32, #tpu.memory_space<vmem>>, %arg15: memref<1x32xf32, #tpu.memory_space<vmem>>, %arg16: memref<1x32xf32, #tpu.memory_space<vmem>>, %arg17: memref<32x64xf32, #tpu.memory_space<vmem>>, %arg18: memref<32x64xf32, #tpu.memory_space<vmem>>, %arg19: memref<1x64xf32, #tpu.memory_space<vmem>>, %arg20: memref<1x64xf32, #tpu.memory_space<vmem>>, %arg21: memref<1x1xf32, #tpu.memory_space<vmem>>, %arg22: memref<32x1xf32, #tpu.memory_space<vmem>>, %arg23: memref<1x1xf32, #tpu.memory_space<vmem>>, %arg24: memref<1x6xf32, #tpu.memory_space<vmem>>, %arg25: memref<1x1xi32, #tpu.memory_space<vmem>>, %arg26: memref<1x1xf32, #tpu.memory_space<vmem>>, %arg27: memref<1x32xf32, #tpu.memory_space<vmem>>) attributes {dimension_semantics = [#tpu.dimension_semantics<arbitrary>], iteration_bounds = array<i64: 1>, scalar_prefetch = 2 : i64, scratch_operands = 0 : i64, tpu.core_type = #tpu.core_type<tc>, window_params = [{pipeline_mode = #tpu.pipeline_mode<synchronous>, transform_indices = @transform_0, window_bounds = array<i64: 50, 1, 32>}, {pipeline_mode = #tpu.pipeline_mode<synchronous>, transform_indices = @transform_1, window_bounds = array<i64: 32, 96>}, {pipeline_mode = #tpu.pipeline_mode<synchronous>, transform_indices = @transform_2, window_bounds = array<i64: 32, 96>}, {pipeline_mode = #tpu.pipeline_mode<synchronous>, transform_indices = @transform_3, window_bounds = array<i64: 1, 96>}, {pipeline_mode = #tpu.pipeline_mode<synchronous>, transform_indices = @transform_4, window_bounds = array<i64: 1, 32>}, {pipeline_mode = #tpu.pipeline_mode<synchronous>, transform_indices = @transform_5, window_bounds = array<i64: 32, 96>}, {pipeline_mode = #tpu.pipeline_mode<synchronous>, transform_indices = @transform_6, window_bounds = array<i64: 32, 96>}, {pipeline_mode = #tpu.pipeline_mode<synchronous>, transform_indices = @transform_7, window_bounds = array<i64: 1, 96>}, {pipeline_mode = #tpu.pipeline_mode<synchronous>, transform_indices = @transform_8, window_bounds = array<i64: 1, 32>}, {pipeline_mode = #tpu.pipeline_mode<synchronous>, transform_indices = @transform_9, window_bounds = array<i64: 32, 96>}, {pipeline_mode = #tpu.pipeline_mode<synchronous>, transform_indices = @transform_10, window_bounds = array<i64: 32, 96>}, {pipeline_mode = #tpu.pipeline_mode<synchronous>, transform_indices = @transform_11, window_bounds = array<i64: 1, 96>}, {pipeline_mode = #tpu.pipeline_mode<synchronous>, transform_indices = @transform_12, window_bounds = array<i64: 1, 32>}, {pipeline_mode = #tpu.pipeline_mode<synchronous>, transform_indices = @transform_13, window_bounds = array<i64: 1, 32>}, {pipeline_mode = #tpu.pipeline_mode<synchronous>, transform_indices = @transform_14, window_bounds = array<i64: 32, 64>}, {pipeline_mode = #tpu.pipeline_mode<synchronous>, transform_indices = @transform_15, window_bounds = array<i64: 32, 64>}, {pipeline_mode = #tpu.pipeline_mode<synchronous>, transform_indices = @transform_16, window_bounds = array<i64: 1, 64>}, {pipeline_mode = #tpu.pipeline_mode<synchronous>, transform_indices = @transform_17, window_bounds = array<i64: 1, 64>}, {pipeline_mode = #tpu.pipeline_mode<synchronous>, transform_indices = @transform_18, window_bounds = array<i64: 1, 1>}, {pipeline_mode = #tpu.pipeline_mode<synchronous>, transform_indices = @transform_19, window_bounds = array<i64: 32, 1>}, {pipeline_mode = #tpu.pipeline_mode<synchronous>, transform_indices = @transform_20, window_bounds = array<i64: 1, 1>}, {pipeline_mode = #tpu.pipeline_mode<synchronous>, transform_indices = @transform_21, window_bounds = array<i64: 1, 6>}, {pipeline_mode = #tpu.pipeline_mode<synchronous>, transform_indices = @transform_22, window_bounds = array<i64: 1, 1>}, {pipeline_mode = #tpu.pipeline_mode<synchronous>, transform_indices = @transform_23, window_bounds = array<i64: 1, 1>}, {pipeline_mode = #tpu.pipeline_mode<synchronous>, transform_indices = @transform_24, window_bounds = array<i64: 1, 32>}]} {
    %c0 = arith.constant 0 : index
    %c0_0 = arith.constant 0 : index
    %0 = vector.load %arg4[%c0, %c0_0] : memref<32x96xf32, #tpu.memory_space<vmem>>, vector<32x96xf32>
    %c0_1 = arith.constant 0 : index
    %c0_2 = arith.constant 0 : index
    %1 = vector.load %arg5[%c0_1, %c0_2] : memref<32x96xf32, #tpu.memory_space<vmem>>, vector<32x96xf32>
    %c0_3 = arith.constant 0 : index
    %c0_4 = arith.constant 0 : index
    %2 = vector.load %arg6[%c0_3, %c0_4] : memref<1x96xf32, #tpu.memory_space<vmem>>, vector<1x96xf32>
    %c0_5 = arith.constant 0 : index
    %c0_6 = arith.constant 0 : index
    %3 = vector.load %arg7[%c0_5, %c0_6] : memref<1x32xf32, #tpu.memory_space<vmem>>, vector<1x32xf32>
    %cst = arith.constant 0.000000e+00 : f32
    %4 = vector.broadcast %cst : f32 to vector<1x32xf32>
    %c0_7 = arith.constant 0 : index
    %c0_8 = arith.constant 0 : index
    %5 = memref.load %arg1[%c0_7, %c0_8] : memref<8x1xi32, #tpu.memory_space<smem>>
    %6 = arith.index_cast %5 : i32 to index
    %c0_9 = arith.constant 0 : index
    %c0_10 = arith.constant 0 : index
    %7 = vector.load %arg3[%6, %c0_9, %c0_10] : memref<50x1x32xf32, #tpu.memory_space<vmem>>, vector<1x1x32xf32>
    %8 = vector.shape_cast %7 : vector<1x1x32xf32> to vector<1x32xf32>
    %cst_11 = arith.constant dense<0.000000e+00> : vector<1x96xf32>
    %9 = tpu.matmul %8, %0, %cst_11 {dimension_numbers = #tpu.dot_dimension_numbers<[1], [0], [0], [1], [0, 0, 1, 1], [], []>} : vector<1x32xf32>, vector<32x96xf32>, vector<1x96xf32> -> vector<1x96xf32>
    %10 = arith.addf %9, %2 : vector<1x96xf32>
    %cst_12 = arith.constant dense<0.000000e+00> : vector<1x96xf32>
    %11 = tpu.matmul %4, %1, %cst_12 {dimension_numbers = #tpu.dot_dimension_numbers<[1], [0], [0], [1], [0, 0, 1, 1], [], []>} : vector<1x32xf32>, vector<32x96xf32>, vector<1x96xf32> -> vector<1x96xf32>
    %12 = vector.extract_strided_slice %10 {offsets = [0, 0], sizes = [1, 32], strides = [1, 1]} : vector<1x96xf32> to vector<1x32xf32>
    %13 = vector.extract_strided_slice %11 {offsets = [0, 0], sizes = [1, 32], strides = [1, 1]} : vector<1x96xf32> to vector<1x32xf32>
    %14 = arith.addf %12, %13 : vector<1x32xf32>
    %15 = arith.negf %14 : vector<1x32xf32>
    %16 = math.exp %15 : vector<1x32xf32>
    %cst_13 = arith.constant 1.000000e+00 : f32
    %17 = vector.broadcast %cst_13 : f32 to vector<1x32xf32>
    %18 = arith.addf %17, %16 : vector<1x32xf32>
    %19 = arith.divf %17, %18 : vector<1x32xf32>
    %20 = vector.extract_strided_slice %10 {offsets = [0, 32], sizes = [1, 32], strides = [1, 1]} : vector<1x96xf32> to vector<1x32xf32>
    %21 = vector.extract_strided_slice %11 {offsets = [0, 32], sizes = [1, 32], strides = [1, 1]} : vector<1x96xf32> to vector<1x32xf32>
    %22 = arith.addf %20, %21 : vector<1x32xf32>
    %23 = arith.negf %22 : vector<1x32xf32>
    %24 = math.exp %23 : vector<1x32xf32>
    %cst_14 = arith.constant 1.000000e+00 : f32
    %25 = vector.broadcast %cst_14 : f32 to vector<1x32xf32>
    %26 = arith.addf %25, %24 : vector<1x32xf32>
    %27 = arith.divf %25, %26 : vector<1x32xf32>
    %28 = vector.extract_strided_slice %10 {offsets = [0, 64], sizes = [1, 32], strides = [1, 1]} : vector<1x96xf32> to vector<1x32xf32>
    %29 = vector.extract_strided_slice %11 {offsets = [0, 64], sizes = [1, 32], strides = [1, 1]} : vector<1x96xf32> to vector<1x32xf32>
    %30 = arith.addf %29, %3 : vector<1x32xf32>
    %31 = arith.mulf %19, %30 : vector<1x32xf32>
    %32 = arith.addf %28, %31 : vector<1x32xf32>
    %33 = math.tanh %32 : vector<1x32xf32>
    %cst_15 = arith.constant 1.000000e+00 : f32
    %34 = vector.broadcast %cst_15 : f32 to vector<1x32xf32>
    %35 = arith.subf %34, %27 : vector<1x32xf32>
    %36 = arith.mulf %35, %33 : vector<1x32xf32>
    %37 = arith.mulf %27, %4 : vector<1x32xf32>
    %38 = arith.addf %36, %37 : vector<1x32xf32>
    %c1 = arith.constant 1 : index
    %c0_16 = arith.constant 0 : index
    %39 = memref.load %arg1[%c1, %c0_16] : memref<8x1xi32, #tpu.memory_space<smem>>
    %40 = arith.index_cast %39 : i32 to index
    %c0_17 = arith.constant 0 : index
    %c0_18 = arith.constant 0 : index
    %41 = vector.load %arg3[%40, %c0_17, %c0_18] : memref<50x1x32xf32, #tpu.memory_space<vmem>>, vector<1x1x32xf32>
    %42 = vector.shape_cast %41 : vector<1x1x32xf32> to vector<1x32xf32>
    %cst_19 = arith.constant dense<0.000000e+00> : vector<1x96xf32>
    %43 = tpu.matmul %42, %0, %cst_19 {dimension_numbers = #tpu.dot_dimension_numbers<[1], [0], [0], [1], [0, 0, 1, 1], [], []>} : vector<1x32xf32>, vector<32x96xf32>, vector<1x96xf32> -> vector<1x96xf32>
    %44 = arith.addf %43, %2 : vector<1x96xf32>
    %cst_20 = arith.constant dense<0.000000e+00> : vector<1x96xf32>
    %45 = tpu.matmul %38, %1, %cst_20 {dimension_numbers = #tpu.dot_dimension_numbers<[1], [0], [0], [1], [0, 0, 1, 1], [], []>} : vector<1x32xf32>, vector<32x96xf32>, vector<1x96xf32> -> vector<1x96xf32>
    %46 = vector.extract_strided_slice %44 {offsets = [0, 0], sizes = [1, 32], strides = [1, 1]} : vector<1x96xf32> to vector<1x32xf32>
    %47 = vector.extract_strided_slice %45 {offsets = [0, 0], sizes = [1, 32], strides = [1, 1]} : vector<1x96xf32> to vector<1x32xf32>
    %48 = arith.addf %46, %47 : vector<1x32xf32>
    %49 = arith.negf %48 : vector<1x32xf32>
    %50 = math.exp %49 : vector<1x32xf32>
    %cst_21 = arith.constant 1.000000e+00 : f32
    %51 = vector.broadcast %cst_21 : f32 to vector<1x32xf32>
    %52 = arith.addf %51, %50 : vector<1x32xf32>
    %53 = arith.divf %51, %52 : vector<1x32xf32>
    %54 = vector.extract_strided_slice %44 {offsets = [0, 32], sizes = [1, 32], strides = [1, 1]} : vector<1x96xf32> to vector<1x32xf32>
    %55 = vector.extract_strided_slice %45 {offsets = [0, 32], sizes = [1, 32], strides = [1, 1]} : vector<1x96xf32> to vector<1x32xf32>
    %56 = arith.addf %54, %55 : vector<1x32xf32>
    %57 = arith.negf %56 : vector<1x32xf32>
    %58 = math.exp %57 : vector<1x32xf32>
    %cst_22 = arith.constant 1.000000e+00 : f32
    %59 = vector.broadcast %cst_22 : f32 to vector<1x32xf32>
    %60 = arith.addf %59, %58 : vector<1x32xf32>
    %61 = arith.divf %59, %60 : vector<1x32xf32>
    %62 = vector.extract_strided_slice %44 {offsets = [0, 64], sizes = [1, 32], strides = [1, 1]} : vector<1x96xf32> to vector<1x32xf32>
    %63 = vector.extract_strided_slice %45 {offsets = [0, 64], sizes = [1, 32], strides = [1, 1]} : vector<1x96xf32> to vector<1x32xf32>
    %64 = arith.addf %63, %3 : vector<1x32xf32>
    %65 = arith.mulf %53, %64 : vector<1x32xf32>
    %66 = arith.addf %62, %65 : vector<1x32xf32>
    %67 = math.tanh %66 : vector<1x32xf32>
    %cst_23 = arith.constant 1.000000e+00 : f32
    %68 = vector.broadcast %cst_23 : f32 to vector<1x32xf32>
    %69 = arith.subf %68, %61 : vector<1x32xf32>
    %70 = arith.mulf %69, %67 : vector<1x32xf32>
    %71 = arith.mulf %61, %38 : vector<1x32xf32>
    %72 = arith.addf %70, %71 : vector<1x32xf32>
    %c2 = arith.constant 2 : index
    %c0_24 = arith.constant 0 : index
    %73 = memref.load %arg1[%c2, %c0_24] : memref<8x1xi32, #tpu.memory_space<smem>>
    %74 = arith.index_cast %73 : i32 to index
    %c0_25 = arith.constant 0 : index
    %c0_26 = arith.constant 0 : index
    %75 = vector.load %arg3[%74, %c0_25, %c0_26] : memref<50x1x32xf32, #tpu.memory_space<vmem>>, vector<1x1x32xf32>
    %76 = vector.shape_cast %75 : vector<1x1x32xf32> to vector<1x32xf32>
    %cst_27 = arith.constant dense<0.000000e+00> : vector<1x96xf32>
    %77 = tpu.matmul %76, %0, %cst_27 {dimension_numbers = #tpu.dot_dimension_numbers<[1], [0], [0], [1], [0, 0, 1, 1], [], []>} : vector<1x32xf32>, vector<32x96xf32>, vector<1x96xf32> -> vector<1x96xf32>
    %78 = arith.addf %77, %2 : vector<1x96xf32>
    %cst_28 = arith.constant dense<0.000000e+00> : vector<1x96xf32>
    %79 = tpu.matmul %72, %1, %cst_28 {dimension_numbers = #tpu.dot_dimension_numbers<[1], [0], [0], [1], [0, 0, 1, 1], [], []>} : vector<1x32xf32>, vector<32x96xf32>, vector<1x96xf32> -> vector<1x96xf32>
    %80 = vector.extract_strided_slice %78 {offsets = [0, 0], sizes = [1, 32], strides = [1, 1]} : vector<1x96xf32> to vector<1x32xf32>
    %81 = vector.extract_strided_slice %79 {offsets = [0, 0], sizes = [1, 32], strides = [1, 1]} : vector<1x96xf32> to vector<1x32xf32>
    %82 = arith.addf %80, %81 : vector<1x32xf32>
    %83 = arith.negf %82 : vector<1x32xf32>
    %84 = math.exp %83 : vector<1x32xf32>
    %cst_29 = arith.constant 1.000000e+00 : f32
    %85 = vector.broadcast %cst_29 : f32 to vector<1x32xf32>
    %86 = arith.addf %85, %84 : vector<1x32xf32>
    %87 = arith.divf %85, %86 : vector<1x32xf32>
    %88 = vector.extract_strided_slice %78 {offsets = [0, 32], sizes = [1, 32], strides = [1, 1]} : vector<1x96xf32> to vector<1x32xf32>
    %89 = vector.extract_strided_slice %79 {offsets = [0, 32], sizes = [1, 32], strides = [1, 1]} : vector<1x96xf32> to vector<1x32xf32>
    %90 = arith.addf %88, %89 : vector<1x32xf32>
    %91 = arith.negf %90 : vector<1x32xf32>
    %92 = math.exp %91 : vector<1x32xf32>
    %cst_30 = arith.constant 1.000000e+00 : f32
    %93 = vector.broadcast %cst_30 : f32 to vector<1x32xf32>
    %94 = arith.addf %93, %92 : vector<1x32xf32>
    %95 = arith.divf %93, %94 : vector<1x32xf32>
    %96 = vector.extract_strided_slice %78 {offsets = [0, 64], sizes = [1, 32], strides = [1, 1]} : vector<1x96xf32> to vector<1x32xf32>
    %97 = vector.extract_strided_slice %79 {offsets = [0, 64], sizes = [1, 32], strides = [1, 1]} : vector<1x96xf32> to vector<1x32xf32>
    %98 = arith.addf %97, %3 : vector<1x32xf32>
    %99 = arith.mulf %87, %98 : vector<1x32xf32>
    %100 = arith.addf %96, %99 : vector<1x32xf32>
    %101 = math.tanh %100 : vector<1x32xf32>
    %cst_31 = arith.constant 1.000000e+00 : f32
    %102 = vector.broadcast %cst_31 : f32 to vector<1x32xf32>
    %103 = arith.subf %102, %95 : vector<1x32xf32>
    %104 = arith.mulf %103, %101 : vector<1x32xf32>
    %105 = arith.mulf %95, %72 : vector<1x32xf32>
    %106 = arith.addf %104, %105 : vector<1x32xf32>
    %c3 = arith.constant 3 : index
    %c0_32 = arith.constant 0 : index
    %107 = memref.load %arg1[%c3, %c0_32] : memref<8x1xi32, #tpu.memory_space<smem>>
    %108 = arith.index_cast %107 : i32 to index
    %c0_33 = arith.constant 0 : index
    %c0_34 = arith.constant 0 : index
    %109 = vector.load %arg3[%108, %c0_33, %c0_34] : memref<50x1x32xf32, #tpu.memory_space<vmem>>, vector<1x1x32xf32>
    %110 = vector.shape_cast %109 : vector<1x1x32xf32> to vector<1x32xf32>
    %cst_35 = arith.constant dense<0.000000e+00> : vector<1x96xf32>
    %111 = tpu.matmul %110, %0, %cst_35 {dimension_numbers = #tpu.dot_dimension_numbers<[1], [0], [0], [1], [0, 0, 1, 1], [], []>} : vector<1x32xf32>, vector<32x96xf32>, vector<1x96xf32> -> vector<1x96xf32>
    %112 = arith.addf %111, %2 : vector<1x96xf32>
    %cst_36 = arith.constant dense<0.000000e+00> : vector<1x96xf32>
    %113 = tpu.matmul %106, %1, %cst_36 {dimension_numbers = #tpu.dot_dimension_numbers<[1], [0], [0], [1], [0, 0, 1, 1], [], []>} : vector<1x32xf32>, vector<32x96xf32>, vector<1x96xf32> -> vector<1x96xf32>
    %114 = vector.extract_strided_slice %112 {offsets = [0, 0], sizes = [1, 32], strides = [1, 1]} : vector<1x96xf32> to vector<1x32xf32>
    %115 = vector.extract_strided_slice %113 {offsets = [0, 0], sizes = [1, 32], strides = [1, 1]} : vector<1x96xf32> to vector<1x32xf32>
    %116 = arith.addf %114, %115 : vector<1x32xf32>
    %117 = arith.negf %116 : vector<1x32xf32>
    %118 = math.exp %117 : vector<1x32xf32>
    %cst_37 = arith.constant 1.000000e+00 : f32
    %119 = vector.broadcast %cst_37 : f32 to vector<1x32xf32>
    %120 = arith.addf %119, %118 : vector<1x32xf32>
    %121 = arith.divf %119, %120 : vector<1x32xf32>
    %122 = vector.extract_strided_slice %112 {offsets = [0, 32], sizes = [1, 32], strides = [1, 1]} : vector<1x96xf32> to vector<1x32xf32>
    %123 = vector.extract_strided_slice %113 {offsets = [0, 32], sizes = [1, 32], strides = [1, 1]} : vector<1x96xf32> to vector<1x32xf32>
    %124 = arith.addf %122, %123 : vector<1x32xf32>
    %125 = arith.negf %124 : vector<1x32xf32>
    %126 = math.exp %125 : vector<1x32xf32>
    %cst_38 = arith.constant 1.000000e+00 : f32
    %127 = vector.broadcast %cst_38 : f32 to vector<1x32xf32>
    %128 = arith.addf %127, %126 : vector<1x32xf32>
    %129 = arith.divf %127, %128 : vector<1x32xf32>
    %130 = vector.extract_strided_slice %112 {offsets = [0, 64], sizes = [1, 32], strides = [1, 1]} : vector<1x96xf32> to vector<1x32xf32>
    %131 = vector.extract_strided_slice %113 {offsets = [0, 64], sizes = [1, 32], strides = [1, 1]} : vector<1x96xf32> to vector<1x32xf32>
    %132 = arith.addf %131, %3 : vector<1x32xf32>
    %133 = arith.mulf %121, %132 : vector<1x32xf32>
    %134 = arith.addf %130, %133 : vector<1x32xf32>
    %135 = math.tanh %134 : vector<1x32xf32>
    %cst_39 = arith.constant 1.000000e+00 : f32
    %136 = vector.broadcast %cst_39 : f32 to vector<1x32xf32>
    %137 = arith.subf %136, %129 : vector<1x32xf32>
    %138 = arith.mulf %137, %135 : vector<1x32xf32>
    %139 = arith.mulf %129, %106 : vector<1x32xf32>
    %140 = arith.addf %138, %139 : vector<1x32xf32>
    %c4 = arith.constant 4 : index
    %c0_40 = arith.constant 0 : index
    %141 = memref.load %arg1[%c4, %c0_40] : memref<8x1xi32, #tpu.memory_space<smem>>
    %142 = arith.index_cast %141 : i32 to index
    %c0_41 = arith.constant 0 : index
    %c0_42 = arith.constant 0 : index
    %143 = vector.load %arg3[%142, %c0_41, %c0_42] : memref<50x1x32xf32, #tpu.memory_space<vmem>>, vector<1x1x32xf32>
    %144 = vector.shape_cast %143 : vector<1x1x32xf32> to vector<1x32xf32>
    %cst_43 = arith.constant dense<0.000000e+00> : vector<1x96xf32>
    %145 = tpu.matmul %144, %0, %cst_43 {dimension_numbers = #tpu.dot_dimension_numbers<[1], [0], [0], [1], [0, 0, 1, 1], [], []>} : vector<1x32xf32>, vector<32x96xf32>, vector<1x96xf32> -> vector<1x96xf32>
    %146 = arith.addf %145, %2 : vector<1x96xf32>
    %cst_44 = arith.constant dense<0.000000e+00> : vector<1x96xf32>
    %147 = tpu.matmul %140, %1, %cst_44 {dimension_numbers = #tpu.dot_dimension_numbers<[1], [0], [0], [1], [0, 0, 1, 1], [], []>} : vector<1x32xf32>, vector<32x96xf32>, vector<1x96xf32> -> vector<1x96xf32>
    %148 = vector.extract_strided_slice %146 {offsets = [0, 0], sizes = [1, 32], strides = [1, 1]} : vector<1x96xf32> to vector<1x32xf32>
    %149 = vector.extract_strided_slice %147 {offsets = [0, 0], sizes = [1, 32], strides = [1, 1]} : vector<1x96xf32> to vector<1x32xf32>
    %150 = arith.addf %148, %149 : vector<1x32xf32>
    %151 = arith.negf %150 : vector<1x32xf32>
    %152 = math.exp %151 : vector<1x32xf32>
    %cst_45 = arith.constant 1.000000e+00 : f32
    %153 = vector.broadcast %cst_45 : f32 to vector<1x32xf32>
    %154 = arith.addf %153, %152 : vector<1x32xf32>
    %155 = arith.divf %153, %154 : vector<1x32xf32>
    %156 = vector.extract_strided_slice %146 {offsets = [0, 32], sizes = [1, 32], strides = [1, 1]} : vector<1x96xf32> to vector<1x32xf32>
    %157 = vector.extract_strided_slice %147 {offsets = [0, 32], sizes = [1, 32], strides = [1, 1]} : vector<1x96xf32> to vector<1x32xf32>
    %158 = arith.addf %156, %157 : vector<1x32xf32>
    %159 = arith.negf %158 : vector<1x32xf32>
    %160 = math.exp %159 : vector<1x32xf32>
    %cst_46 = arith.constant 1.000000e+00 : f32
    %161 = vector.broadcast %cst_46 : f32 to vector<1x32xf32>
    %162 = arith.addf %161, %160 : vector<1x32xf32>
    %163 = arith.divf %161, %162 : vector<1x32xf32>
    %164 = vector.extract_strided_slice %146 {offsets = [0, 64], sizes = [1, 32], strides = [1, 1]} : vector<1x96xf32> to vector<1x32xf32>
    %165 = vector.extract_strided_slice %147 {offsets = [0, 64], sizes = [1, 32], strides = [1, 1]} : vector<1x96xf32> to vector<1x32xf32>
    %166 = arith.addf %165, %3 : vector<1x32xf32>
    %167 = arith.mulf %155, %166 : vector<1x32xf32>
    %168 = arith.addf %164, %167 : vector<1x32xf32>
    %169 = math.tanh %168 : vector<1x32xf32>
    %cst_47 = arith.constant 1.000000e+00 : f32
    %170 = vector.broadcast %cst_47 : f32 to vector<1x32xf32>
    %171 = arith.subf %170, %163 : vector<1x32xf32>
    %172 = arith.mulf %171, %169 : vector<1x32xf32>
    %173 = arith.mulf %163, %140 : vector<1x32xf32>
    %174 = arith.addf %172, %173 : vector<1x32xf32>
    %c5 = arith.constant 5 : index
    %c0_48 = arith.constant 0 : index
    %175 = memref.load %arg1[%c5, %c0_48] : memref<8x1xi32, #tpu.memory_space<smem>>
    %176 = arith.index_cast %175 : i32 to index
    %c0_49 = arith.constant 0 : index
    %c0_50 = arith.constant 0 : index
    %177 = vector.load %arg3[%176, %c0_49, %c0_50] : memref<50x1x32xf32, #tpu.memory_space<vmem>>, vector<1x1x32xf32>
    %178 = vector.shape_cast %177 : vector<1x1x32xf32> to vector<1x32xf32>
    %cst_51 = arith.constant dense<0.000000e+00> : vector<1x96xf32>
    %179 = tpu.matmul %178, %0, %cst_51 {dimension_numbers = #tpu.dot_dimension_numbers<[1], [0], [0], [1], [0, 0, 1, 1], [], []>} : vector<1x32xf32>, vector<32x96xf32>, vector<1x96xf32> -> vector<1x96xf32>
    %180 = arith.addf %179, %2 : vector<1x96xf32>
    %cst_52 = arith.constant dense<0.000000e+00> : vector<1x96xf32>
    %181 = tpu.matmul %174, %1, %cst_52 {dimension_numbers = #tpu.dot_dimension_numbers<[1], [0], [0], [1], [0, 0, 1, 1], [], []>} : vector<1x32xf32>, vector<32x96xf32>, vector<1x96xf32> -> vector<1x96xf32>
    %182 = vector.extract_strided_slice %180 {offsets = [0, 0], sizes = [1, 32], strides = [1, 1]} : vector<1x96xf32> to vector<1x32xf32>
    %183 = vector.extract_strided_slice %181 {offsets = [0, 0], sizes = [1, 32], strides = [1, 1]} : vector<1x96xf32> to vector<1x32xf32>
    %184 = arith.addf %182, %183 : vector<1x32xf32>
    %185 = arith.negf %184 : vector<1x32xf32>
    %186 = math.exp %185 : vector<1x32xf32>
    %cst_53 = arith.constant 1.000000e+00 : f32
    %187 = vector.broadcast %cst_53 : f32 to vector<1x32xf32>
    %188 = arith.addf %187, %186 : vector<1x32xf32>
    %189 = arith.divf %187, %188 : vector<1x32xf32>
    %190 = vector.extract_strided_slice %180 {offsets = [0, 32], sizes = [1, 32], strides = [1, 1]} : vector<1x96xf32> to vector<1x32xf32>
    %191 = vector.extract_strided_slice %181 {offsets = [0, 32], sizes = [1, 32], strides = [1, 1]} : vector<1x96xf32> to vector<1x32xf32>
    %192 = arith.addf %190, %191 : vector<1x32xf32>
    %193 = arith.negf %192 : vector<1x32xf32>
    %194 = math.exp %193 : vector<1x32xf32>
    %cst_54 = arith.constant 1.000000e+00 : f32
    %195 = vector.broadcast %cst_54 : f32 to vector<1x32xf32>
    %196 = arith.addf %195, %194 : vector<1x32xf32>
    %197 = arith.divf %195, %196 : vector<1x32xf32>
    %198 = vector.extract_strided_slice %180 {offsets = [0, 64], sizes = [1, 32], strides = [1, 1]} : vector<1x96xf32> to vector<1x32xf32>
    %199 = vector.extract_strided_slice %181 {offsets = [0, 64], sizes = [1, 32], strides = [1, 1]} : vector<1x96xf32> to vector<1x32xf32>
    %200 = arith.addf %199, %3 : vector<1x32xf32>
    %201 = arith.mulf %189, %200 : vector<1x32xf32>
    %202 = arith.addf %198, %201 : vector<1x32xf32>
    %203 = math.tanh %202 : vector<1x32xf32>
    %cst_55 = arith.constant 1.000000e+00 : f32
    %204 = vector.broadcast %cst_55 : f32 to vector<1x32xf32>
    %205 = arith.subf %204, %197 : vector<1x32xf32>
    %206 = arith.mulf %205, %203 : vector<1x32xf32>
    %207 = arith.mulf %197, %174 : vector<1x32xf32>
    %208 = arith.addf %206, %207 : vector<1x32xf32>
    %c6 = arith.constant 6 : index
    %c0_56 = arith.constant 0 : index
    %209 = memref.load %arg1[%c6, %c0_56] : memref<8x1xi32, #tpu.memory_space<smem>>
    %210 = arith.index_cast %209 : i32 to index
    %c0_57 = arith.constant 0 : index
    %c0_58 = arith.constant 0 : index
    %211 = vector.load %arg3[%210, %c0_57, %c0_58] : memref<50x1x32xf32, #tpu.memory_space<vmem>>, vector<1x1x32xf32>
    %212 = vector.shape_cast %211 : vector<1x1x32xf32> to vector<1x32xf32>
    %cst_59 = arith.constant dense<0.000000e+00> : vector<1x96xf32>
    %213 = tpu.matmul %212, %0, %cst_59 {dimension_numbers = #tpu.dot_dimension_numbers<[1], [0], [0], [1], [0, 0, 1, 1], [], []>} : vector<1x32xf32>, vector<32x96xf32>, vector<1x96xf32> -> vector<1x96xf32>
    %214 = arith.addf %213, %2 : vector<1x96xf32>
    %cst_60 = arith.constant dense<0.000000e+00> : vector<1x96xf32>
    %215 = tpu.matmul %208, %1, %cst_60 {dimension_numbers = #tpu.dot_dimension_numbers<[1], [0], [0], [1], [0, 0, 1, 1], [], []>} : vector<1x32xf32>, vector<32x96xf32>, vector<1x96xf32> -> vector<1x96xf32>
    %216 = vector.extract_strided_slice %214 {offsets = [0, 0], sizes = [1, 32], strides = [1, 1]} : vector<1x96xf32> to vector<1x32xf32>
    %217 = vector.extract_strided_slice %215 {offsets = [0, 0], sizes = [1, 32], strides = [1, 1]} : vector<1x96xf32> to vector<1x32xf32>
    %218 = arith.addf %216, %217 : vector<1x32xf32>
    %219 = arith.negf %218 : vector<1x32xf32>
    %220 = math.exp %219 : vector<1x32xf32>
    %cst_61 = arith.constant 1.000000e+00 : f32
    %221 = vector.broadcast %cst_61 : f32 to vector<1x32xf32>
    %222 = arith.addf %221, %220 : vector<1x32xf32>
    %223 = arith.divf %221, %222 : vector<1x32xf32>
    %224 = vector.extract_strided_slice %214 {offsets = [0, 32], sizes = [1, 32], strides = [1, 1]} : vector<1x96xf32> to vector<1x32xf32>
    %225 = vector.extract_strided_slice %215 {offsets = [0, 32], sizes = [1, 32], strides = [1, 1]} : vector<1x96xf32> to vector<1x32xf32>
    %226 = arith.addf %224, %225 : vector<1x32xf32>
    %227 = arith.negf %226 : vector<1x32xf32>
    %228 = math.exp %227 : vector<1x32xf32>
    %cst_62 = arith.constant 1.000000e+00 : f32
    %229 = vector.broadcast %cst_62 : f32 to vector<1x32xf32>
    %230 = arith.addf %229, %228 : vector<1x32xf32>
    %231 = arith.divf %229, %230 : vector<1x32xf32>
    %232 = vector.extract_strided_slice %214 {offsets = [0, 64], sizes = [1, 32], strides = [1, 1]} : vector<1x96xf32> to vector<1x32xf32>
    %233 = vector.extract_strided_slice %215 {offsets = [0, 64], sizes = [1, 32], strides = [1, 1]} : vector<1x96xf32> to vector<1x32xf32>
    %234 = arith.addf %233, %3 : vector<1x32xf32>
    %235 = arith.mulf %223, %234 : vector<1x32xf32>
    %236 = arith.addf %232, %235 : vector<1x32xf32>
    %237 = math.tanh %236 : vector<1x32xf32>
    %cst_63 = arith.constant 1.000000e+00 : f32
    %238 = vector.broadcast %cst_63 : f32 to vector<1x32xf32>
    %239 = arith.subf %238, %231 : vector<1x32xf32>
    %240 = arith.mulf %239, %237 : vector<1x32xf32>
    %241 = arith.mulf %231, %208 : vector<1x32xf32>
    %242 = arith.addf %240, %241 : vector<1x32xf32>
    %c7 = arith.constant 7 : index
    %c0_64 = arith.constant 0 : index
    %243 = memref.load %arg1[%c7, %c0_64] : memref<8x1xi32, #tpu.memory_space<smem>>
    %244 = arith.index_cast %243 : i32 to index
    %c0_65 = arith.constant 0 : index
    %c0_66 = arith.constant 0 : index
    %245 = vector.load %arg3[%244, %c0_65, %c0_66] : memref<50x1x32xf32, #tpu.memory_space<vmem>>, vector<1x1x32xf32>
    %246 = vector.shape_cast %245 : vector<1x1x32xf32> to vector<1x32xf32>
    %cst_67 = arith.constant dense<0.000000e+00> : vector<1x96xf32>
    %247 = tpu.matmul %246, %0, %cst_67 {dimension_numbers = #tpu.dot_dimension_numbers<[1], [0], [0], [1], [0, 0, 1, 1], [], []>} : vector<1x32xf32>, vector<32x96xf32>, vector<1x96xf32> -> vector<1x96xf32>
    %248 = arith.addf %247, %2 : vector<1x96xf32>
    %cst_68 = arith.constant dense<0.000000e+00> : vector<1x96xf32>
    %249 = tpu.matmul %242, %1, %cst_68 {dimension_numbers = #tpu.dot_dimension_numbers<[1], [0], [0], [1], [0, 0, 1, 1], [], []>} : vector<1x32xf32>, vector<32x96xf32>, vector<1x96xf32> -> vector<1x96xf32>
    %250 = vector.extract_strided_slice %248 {offsets = [0, 0], sizes = [1, 32], strides = [1, 1]} : vector<1x96xf32> to vector<1x32xf32>
    %251 = vector.extract_strided_slice %249 {offsets = [0, 0], sizes = [1, 32], strides = [1, 1]} : vector<1x96xf32> to vector<1x32xf32>
    %252 = arith.addf %250, %251 : vector<1x32xf32>
    %253 = arith.negf %252 : vector<1x32xf32>
    %254 = math.exp %253 : vector<1x32xf32>
    %cst_69 = arith.constant 1.000000e+00 : f32
    %255 = vector.broadcast %cst_69 : f32 to vector<1x32xf32>
    %256 = arith.addf %255, %254 : vector<1x32xf32>
    %257 = arith.divf %255, %256 : vector<1x32xf32>
    %258 = vector.extract_strided_slice %248 {offsets = [0, 32], sizes = [1, 32], strides = [1, 1]} : vector<1x96xf32> to vector<1x32xf32>
    %259 = vector.extract_strided_slice %249 {offsets = [0, 32], sizes = [1, 32], strides = [1, 1]} : vector<1x96xf32> to vector<1x32xf32>
    %260 = arith.addf %258, %259 : vector<1x32xf32>
    %261 = arith.negf %260 : vector<1x32xf32>
    %262 = math.exp %261 : vector<1x32xf32>
    %cst_70 = arith.constant 1.000000e+00 : f32
    %263 = vector.broadcast %cst_70 : f32 to vector<1x32xf32>
    %264 = arith.addf %263, %262 : vector<1x32xf32>
    %265 = arith.divf %263, %264 : vector<1x32xf32>
    %266 = vector.extract_strided_slice %248 {offsets = [0, 64], sizes = [1, 32], strides = [1, 1]} : vector<1x96xf32> to vector<1x32xf32>
    %267 = vector.extract_strided_slice %249 {offsets = [0, 64], sizes = [1, 32], strides = [1, 1]} : vector<1x96xf32> to vector<1x32xf32>
    %268 = arith.addf %267, %3 : vector<1x32xf32>
    %269 = arith.mulf %257, %268 : vector<1x32xf32>
    %270 = arith.addf %266, %269 : vector<1x32xf32>
    %271 = math.tanh %270 : vector<1x32xf32>
    %cst_71 = arith.constant 1.000000e+00 : f32
    %272 = vector.broadcast %cst_71 : f32 to vector<1x32xf32>
    %273 = arith.subf %272, %265 : vector<1x32xf32>
    %274 = arith.mulf %273, %271 : vector<1x32xf32>
    %275 = arith.mulf %265, %242 : vector<1x32xf32>
    %276 = arith.addf %274, %275 : vector<1x32xf32>
    %c0_72 = arith.constant 0 : index
    %c0_73 = arith.constant 0 : index
    %277 = vector.load %arg8[%c0_72, %c0_73] : memref<32x96xf32, #tpu.memory_space<vmem>>, vector<32x96xf32>
    %c0_74 = arith.constant 0 : index
    %c0_75 = arith.constant 0 : index
    %278 = vector.load %arg9[%c0_74, %c0_75] : memref<32x96xf32, #tpu.memory_space<vmem>>, vector<32x96xf32>
    %c0_76 = arith.constant 0 : index
    %c0_77 = arith.constant 0 : index
    %279 = vector.load %arg10[%c0_76, %c0_77] : memref<1x96xf32, #tpu.memory_space<vmem>>, vector<1x96xf32>
    %c0_78 = arith.constant 0 : index
    %c0_79 = arith.constant 0 : index
    %280 = vector.load %arg11[%c0_78, %c0_79] : memref<1x32xf32, #tpu.memory_space<vmem>>, vector<1x32xf32>
    %cst_80 = arith.constant 0.000000e+00 : f32
    %281 = vector.broadcast %cst_80 : f32 to vector<6x32xf32>
    %c0_81 = arith.constant 0 : index
    %c0_82 = arith.constant 0 : index
    %282 = memref.load %arg2[%c0_81, %c0_82] : memref<5x6xi32, #tpu.memory_space<smem>>
    %c0_83 = arith.constant 0 : index
    %c1_84 = arith.constant 1 : index
    %283 = memref.load %arg2[%c0_83, %c1_84] : memref<5x6xi32, #tpu.memory_space<smem>>
    %c0_85 = arith.constant 0 : index
    %c2_86 = arith.constant 2 : index
    %284 = memref.load %arg2[%c0_85, %c2_86] : memref<5x6xi32, #tpu.memory_space<smem>>
    %c0_87 = arith.constant 0 : index
    %c3_88 = arith.constant 3 : index
    %285 = memref.load %arg2[%c0_87, %c3_88] : memref<5x6xi32, #tpu.memory_space<smem>>
    %c0_89 = arith.constant 0 : index
    %c4_90 = arith.constant 4 : index
    %286 = memref.load %arg2[%c0_89, %c4_90] : memref<5x6xi32, #tpu.memory_space<smem>>
    %c0_91 = arith.constant 0 : index
    %c5_92 = arith.constant 5 : index
    %287 = memref.load %arg2[%c0_91, %c5_92] : memref<5x6xi32, #tpu.memory_space<smem>>
    %288 = arith.index_cast %282 : i32 to index
    %c0_93 = arith.constant 0 : index
    %c0_94 = arith.constant 0 : index
    %289 = vector.load %arg3[%288, %c0_93, %c0_94] : memref<50x1x32xf32, #tpu.memory_space<vmem>>, vector<1x1x32xf32>
    %290 = vector.shape_cast %289 : vector<1x1x32xf32> to vector<1x32xf32>
    %291 = arith.index_cast %283 : i32 to index
    %c0_95 = arith.constant 0 : index
    %c0_96 = arith.constant 0 : index
    %292 = vector.load %arg3[%291, %c0_95, %c0_96] : memref<50x1x32xf32, #tpu.memory_space<vmem>>, vector<1x1x32xf32>
    %293 = vector.shape_cast %292 : vector<1x1x32xf32> to vector<1x32xf32>
    %294 = arith.index_cast %284 : i32 to index
    %c0_97 = arith.constant 0 : index
    %c0_98 = arith.constant 0 : index
    %295 = vector.load %arg3[%294, %c0_97, %c0_98] : memref<50x1x32xf32, #tpu.memory_space<vmem>>, vector<1x1x32xf32>
    %296 = vector.shape_cast %295 : vector<1x1x32xf32> to vector<1x32xf32>
    %297 = arith.index_cast %285 : i32 to index
    %c0_99 = arith.constant 0 : index
    %c0_100 = arith.constant 0 : index
    %298 = vector.load %arg3[%297, %c0_99, %c0_100] : memref<50x1x32xf32, #tpu.memory_space<vmem>>, vector<1x1x32xf32>
    %299 = vector.shape_cast %298 : vector<1x1x32xf32> to vector<1x32xf32>
    %300 = arith.index_cast %286 : i32 to index
    %c0_101 = arith.constant 0 : index
    %c0_102 = arith.constant 0 : index
    %301 = vector.load %arg3[%300, %c0_101, %c0_102] : memref<50x1x32xf32, #tpu.memory_space<vmem>>, vector<1x1x32xf32>
    %302 = vector.shape_cast %301 : vector<1x1x32xf32> to vector<1x32xf32>
    %303 = arith.index_cast %287 : i32 to index
    %c0_103 = arith.constant 0 : index
    %c0_104 = arith.constant 0 : index
    %304 = vector.load %arg3[%303, %c0_103, %c0_104] : memref<50x1x32xf32, #tpu.memory_space<vmem>>, vector<1x1x32xf32>
    %305 = vector.shape_cast %304 : vector<1x1x32xf32> to vector<1x32xf32>
    %306 = tpu.concatenate %290, %293, %296, %299, %302, %305 in 0 : vector<1x32xf32>, vector<1x32xf32>, vector<1x32xf32>, vector<1x32xf32>, vector<1x32xf32>, vector<1x32xf32> -> vector<6x32xf32>
    %cst_105 = arith.constant dense<0.000000e+00> : vector<6x96xf32>
    %307 = tpu.matmul %306, %277, %cst_105 {dimension_numbers = #tpu.dot_dimension_numbers<[1], [0], [0], [1], [0, 0, 1, 1], [], []>} : vector<6x32xf32>, vector<32x96xf32>, vector<6x96xf32> -> vector<6x96xf32>
    %308 = vector.broadcast %279 : vector<1x96xf32> to vector<6x96xf32>
    %309 = arith.addf %307, %308 : vector<6x96xf32>
    %cst_106 = arith.constant dense<0.000000e+00> : vector<6x96xf32>
    %310 = tpu.matmul %281, %278, %cst_106 {dimension_numbers = #tpu.dot_dimension_numbers<[1], [0], [0], [1], [0, 0, 1, 1], [], []>} : vector<6x32xf32>, vector<32x96xf32>, vector<6x96xf32> -> vector<6x96xf32>
    %311 = vector.extract_strided_slice %309 {offsets = [0, 0], sizes = [6, 32], strides = [1, 1]} : vector<6x96xf32> to vector<6x32xf32>
    %312 = vector.extract_strided_slice %310 {offsets = [0, 0], sizes = [6, 32], strides = [1, 1]} : vector<6x96xf32> to vector<6x32xf32>
    %313 = arith.addf %311, %312 : vector<6x32xf32>
    %314 = arith.negf %313 : vector<6x32xf32>
    %315 = math.exp %314 : vector<6x32xf32>
    %cst_107 = arith.constant 1.000000e+00 : f32
    %316 = vector.broadcast %cst_107 : f32 to vector<6x32xf32>
    %317 = arith.addf %316, %315 : vector<6x32xf32>
    %318 = arith.divf %316, %317 : vector<6x32xf32>
    %319 = vector.extract_strided_slice %309 {offsets = [0, 32], sizes = [6, 32], strides = [1, 1]} : vector<6x96xf32> to vector<6x32xf32>
    %320 = vector.extract_strided_slice %310 {offsets = [0, 32], sizes = [6, 32], strides = [1, 1]} : vector<6x96xf32> to vector<6x32xf32>
    %321 = arith.addf %319, %320 : vector<6x32xf32>
    %322 = arith.negf %321 : vector<6x32xf32>
    %323 = math.exp %322 : vector<6x32xf32>
    %cst_108 = arith.constant 1.000000e+00 : f32
    %324 = vector.broadcast %cst_108 : f32 to vector<6x32xf32>
    %325 = arith.addf %324, %323 : vector<6x32xf32>
    %326 = arith.divf %324, %325 : vector<6x32xf32>
    %327 = vector.extract_strided_slice %309 {offsets = [0, 64], sizes = [6, 32], strides = [1, 1]} : vector<6x96xf32> to vector<6x32xf32>
    %328 = vector.extract_strided_slice %310 {offsets = [0, 64], sizes = [6, 32], strides = [1, 1]} : vector<6x96xf32> to vector<6x32xf32>
    %329 = vector.broadcast %280 : vector<1x32xf32> to vector<6x32xf32>
    %330 = arith.addf %328, %329 : vector<6x32xf32>
    %331 = arith.mulf %318, %330 : vector<6x32xf32>
    %332 = arith.addf %327, %331 : vector<6x32xf32>
    %333 = math.tanh %332 : vector<6x32xf32>
    %cst_109 = arith.constant 1.000000e+00 : f32
    %334 = vector.broadcast %cst_109 : f32 to vector<6x32xf32>
    %335 = arith.subf %334, %326 : vector<6x32xf32>
    %336 = arith.mulf %335, %333 : vector<6x32xf32>
    %337 = arith.mulf %326, %281 : vector<6x32xf32>
    %338 = arith.addf %336, %337 : vector<6x32xf32>
    %c1_110 = arith.constant 1 : index
    %c0_111 = arith.constant 0 : index
    %339 = memref.load %arg2[%c1_110, %c0_111] : memref<5x6xi32, #tpu.memory_space<smem>>
    %c1_112 = arith.constant 1 : index
    %c1_113 = arith.constant 1 : index
    %340 = memref.load %arg2[%c1_112, %c1_113] : memref<5x6xi32, #tpu.memory_space<smem>>
    %c1_114 = arith.constant 1 : index
    %c2_115 = arith.constant 2 : index
    %341 = memref.load %arg2[%c1_114, %c2_115] : memref<5x6xi32, #tpu.memory_space<smem>>
    %c1_116 = arith.constant 1 : index
    %c3_117 = arith.constant 3 : index
    %342 = memref.load %arg2[%c1_116, %c3_117] : memref<5x6xi32, #tpu.memory_space<smem>>
    %c1_118 = arith.constant 1 : index
    %c4_119 = arith.constant 4 : index
    %343 = memref.load %arg2[%c1_118, %c4_119] : memref<5x6xi32, #tpu.memory_space<smem>>
    %c1_120 = arith.constant 1 : index
    %c5_121 = arith.constant 5 : index
    %344 = memref.load %arg2[%c1_120, %c5_121] : memref<5x6xi32, #tpu.memory_space<smem>>
    %345 = arith.index_cast %339 : i32 to index
    %c0_122 = arith.constant 0 : index
    %c0_123 = arith.constant 0 : index
    %346 = vector.load %arg3[%345, %c0_122, %c0_123] : memref<50x1x32xf32, #tpu.memory_space<vmem>>, vector<1x1x32xf32>
    %347 = vector.shape_cast %346 : vector<1x1x32xf32> to vector<1x32xf32>
    %348 = arith.index_cast %340 : i32 to index
    %c0_124 = arith.constant 0 : index
    %c0_125 = arith.constant 0 : index
    %349 = vector.load %arg3[%348, %c0_124, %c0_125] : memref<50x1x32xf32, #tpu.memory_space<vmem>>, vector<1x1x32xf32>
    %350 = vector.shape_cast %349 : vector<1x1x32xf32> to vector<1x32xf32>
    %351 = arith.index_cast %341 : i32 to index
    %c0_126 = arith.constant 0 : index
    %c0_127 = arith.constant 0 : index
    %352 = vector.load %arg3[%351, %c0_126, %c0_127] : memref<50x1x32xf32, #tpu.memory_space<vmem>>, vector<1x1x32xf32>
    %353 = vector.shape_cast %352 : vector<1x1x32xf32> to vector<1x32xf32>
    %354 = arith.index_cast %342 : i32 to index
    %c0_128 = arith.constant 0 : index
    %c0_129 = arith.constant 0 : index
    %355 = vector.load %arg3[%354, %c0_128, %c0_129] : memref<50x1x32xf32, #tpu.memory_space<vmem>>, vector<1x1x32xf32>
    %356 = vector.shape_cast %355 : vector<1x1x32xf32> to vector<1x32xf32>
    %357 = arith.index_cast %343 : i32 to index
    %c0_130 = arith.constant 0 : index
    %c0_131 = arith.constant 0 : index
    %358 = vector.load %arg3[%357, %c0_130, %c0_131] : memref<50x1x32xf32, #tpu.memory_space<vmem>>, vector<1x1x32xf32>
    %359 = vector.shape_cast %358 : vector<1x1x32xf32> to vector<1x32xf32>
    %360 = arith.index_cast %344 : i32 to index
    %c0_132 = arith.constant 0 : index
    %c0_133 = arith.constant 0 : index
    %361 = vector.load %arg3[%360, %c0_132, %c0_133] : memref<50x1x32xf32, #tpu.memory_space<vmem>>, vector<1x1x32xf32>
    %362 = vector.shape_cast %361 : vector<1x1x32xf32> to vector<1x32xf32>
    %363 = tpu.concatenate %347, %350, %353, %356, %359, %362 in 0 : vector<1x32xf32>, vector<1x32xf32>, vector<1x32xf32>, vector<1x32xf32>, vector<1x32xf32>, vector<1x32xf32> -> vector<6x32xf32>
    %cst_134 = arith.constant dense<0.000000e+00> : vector<6x96xf32>
    %364 = tpu.matmul %363, %277, %cst_134 {dimension_numbers = #tpu.dot_dimension_numbers<[1], [0], [0], [1], [0, 0, 1, 1], [], []>} : vector<6x32xf32>, vector<32x96xf32>, vector<6x96xf32> -> vector<6x96xf32>
    %365 = vector.broadcast %279 : vector<1x96xf32> to vector<6x96xf32>
    %366 = arith.addf %364, %365 : vector<6x96xf32>
    %cst_135 = arith.constant dense<0.000000e+00> : vector<6x96xf32>
    %367 = tpu.matmul %338, %278, %cst_135 {dimension_numbers = #tpu.dot_dimension_numbers<[1], [0], [0], [1], [0, 0, 1, 1], [], []>} : vector<6x32xf32>, vector<32x96xf32>, vector<6x96xf32> -> vector<6x96xf32>
    %368 = vector.extract_strided_slice %366 {offsets = [0, 0], sizes = [6, 32], strides = [1, 1]} : vector<6x96xf32> to vector<6x32xf32>
    %369 = vector.extract_strided_slice %367 {offsets = [0, 0], sizes = [6, 32], strides = [1, 1]} : vector<6x96xf32> to vector<6x32xf32>
    %370 = arith.addf %368, %369 : vector<6x32xf32>
    %371 = arith.negf %370 : vector<6x32xf32>
    %372 = math.exp %371 : vector<6x32xf32>
    %cst_136 = arith.constant 1.000000e+00 : f32
    %373 = vector.broadcast %cst_136 : f32 to vector<6x32xf32>
    %374 = arith.addf %373, %372 : vector<6x32xf32>
    %375 = arith.divf %373, %374 : vector<6x32xf32>
    %376 = vector.extract_strided_slice %366 {offsets = [0, 32], sizes = [6, 32], strides = [1, 1]} : vector<6x96xf32> to vector<6x32xf32>
    %377 = vector.extract_strided_slice %367 {offsets = [0, 32], sizes = [6, 32], strides = [1, 1]} : vector<6x96xf32> to vector<6x32xf32>
    %378 = arith.addf %376, %377 : vector<6x32xf32>
    %379 = arith.negf %378 : vector<6x32xf32>
    %380 = math.exp %379 : vector<6x32xf32>
    %cst_137 = arith.constant 1.000000e+00 : f32
    %381 = vector.broadcast %cst_137 : f32 to vector<6x32xf32>
    %382 = arith.addf %381, %380 : vector<6x32xf32>
    %383 = arith.divf %381, %382 : vector<6x32xf32>
    %384 = vector.extract_strided_slice %366 {offsets = [0, 64], sizes = [6, 32], strides = [1, 1]} : vector<6x96xf32> to vector<6x32xf32>
    %385 = vector.extract_strided_slice %367 {offsets = [0, 64], sizes = [6, 32], strides = [1, 1]} : vector<6x96xf32> to vector<6x32xf32>
    %386 = vector.broadcast %280 : vector<1x32xf32> to vector<6x32xf32>
    %387 = arith.addf %385, %386 : vector<6x32xf32>
    %388 = arith.mulf %375, %387 : vector<6x32xf32>
    %389 = arith.addf %384, %388 : vector<6x32xf32>
    %390 = math.tanh %389 : vector<6x32xf32>
    %cst_138 = arith.constant 1.000000e+00 : f32
    %391 = vector.broadcast %cst_138 : f32 to vector<6x32xf32>
    %392 = arith.subf %391, %383 : vector<6x32xf32>
    %393 = arith.mulf %392, %390 : vector<6x32xf32>
    %394 = arith.mulf %383, %338 : vector<6x32xf32>
    %395 = arith.addf %393, %394 : vector<6x32xf32>
    %c2_139 = arith.constant 2 : index
    %c0_140 = arith.constant 0 : index
    %396 = memref.load %arg2[%c2_139, %c0_140] : memref<5x6xi32, #tpu.memory_space<smem>>
    %c2_141 = arith.constant 2 : index
    %c1_142 = arith.constant 1 : index
    %397 = memref.load %arg2[%c2_141, %c1_142] : memref<5x6xi32, #tpu.memory_space<smem>>
    %c2_143 = arith.constant 2 : index
    %c2_144 = arith.constant 2 : index
    %398 = memref.load %arg2[%c2_143, %c2_144] : memref<5x6xi32, #tpu.memory_space<smem>>
    %c2_145 = arith.constant 2 : index
    %c3_146 = arith.constant 3 : index
    %399 = memref.load %arg2[%c2_145, %c3_146] : memref<5x6xi32, #tpu.memory_space<smem>>
    %c2_147 = arith.constant 2 : index
    %c4_148 = arith.constant 4 : index
    %400 = memref.load %arg2[%c2_147, %c4_148] : memref<5x6xi32, #tpu.memory_space<smem>>
    %c2_149 = arith.constant 2 : index
    %c5_150 = arith.constant 5 : index
    %401 = memref.load %arg2[%c2_149, %c5_150] : memref<5x6xi32, #tpu.memory_space<smem>>
    %402 = arith.index_cast %396 : i32 to index
    %c0_151 = arith.constant 0 : index
    %c0_152 = arith.constant 0 : index
    %403 = vector.load %arg3[%402, %c0_151, %c0_152] : memref<50x1x32xf32, #tpu.memory_space<vmem>>, vector<1x1x32xf32>
    %404 = vector.shape_cast %403 : vector<1x1x32xf32> to vector<1x32xf32>
    %405 = arith.index_cast %397 : i32 to index
    %c0_153 = arith.constant 0 : index
    %c0_154 = arith.constant 0 : index
    %406 = vector.load %arg3[%405, %c0_153, %c0_154] : memref<50x1x32xf32, #tpu.memory_space<vmem>>, vector<1x1x32xf32>
    %407 = vector.shape_cast %406 : vector<1x1x32xf32> to vector<1x32xf32>
    %408 = arith.index_cast %398 : i32 to index
    %c0_155 = arith.constant 0 : index
    %c0_156 = arith.constant 0 : index
    %409 = vector.load %arg3[%408, %c0_155, %c0_156] : memref<50x1x32xf32, #tpu.memory_space<vmem>>, vector<1x1x32xf32>
    %410 = vector.shape_cast %409 : vector<1x1x32xf32> to vector<1x32xf32>
    %411 = arith.index_cast %399 : i32 to index
    %c0_157 = arith.constant 0 : index
    %c0_158 = arith.constant 0 : index
    %412 = vector.load %arg3[%411, %c0_157, %c0_158] : memref<50x1x32xf32, #tpu.memory_space<vmem>>, vector<1x1x32xf32>
    %413 = vector.shape_cast %412 : vector<1x1x32xf32> to vector<1x32xf32>
    %414 = arith.index_cast %400 : i32 to index
    %c0_159 = arith.constant 0 : index
    %c0_160 = arith.constant 0 : index
    %415 = vector.load %arg3[%414, %c0_159, %c0_160] : memref<50x1x32xf32, #tpu.memory_space<vmem>>, vector<1x1x32xf32>
    %416 = vector.shape_cast %415 : vector<1x1x32xf32> to vector<1x32xf32>
    %417 = arith.index_cast %401 : i32 to index
    %c0_161 = arith.constant 0 : index
    %c0_162 = arith.constant 0 : index
    %418 = vector.load %arg3[%417, %c0_161, %c0_162] : memref<50x1x32xf32, #tpu.memory_space<vmem>>, vector<1x1x32xf32>
    %419 = vector.shape_cast %418 : vector<1x1x32xf32> to vector<1x32xf32>
    %420 = tpu.concatenate %404, %407, %410, %413, %416, %419 in 0 : vector<1x32xf32>, vector<1x32xf32>, vector<1x32xf32>, vector<1x32xf32>, vector<1x32xf32>, vector<1x32xf32> -> vector<6x32xf32>
    %cst_163 = arith.constant dense<0.000000e+00> : vector<6x96xf32>
    %421 = tpu.matmul %420, %277, %cst_163 {dimension_numbers = #tpu.dot_dimension_numbers<[1], [0], [0], [1], [0, 0, 1, 1], [], []>} : vector<6x32xf32>, vector<32x96xf32>, vector<6x96xf32> -> vector<6x96xf32>
    %422 = vector.broadcast %279 : vector<1x96xf32> to vector<6x96xf32>
    %423 = arith.addf %421, %422 : vector<6x96xf32>
    %cst_164 = arith.constant dense<0.000000e+00> : vector<6x96xf32>
    %424 = tpu.matmul %395, %278, %cst_164 {dimension_numbers = #tpu.dot_dimension_numbers<[1], [0], [0], [1], [0, 0, 1, 1], [], []>} : vector<6x32xf32>, vector<32x96xf32>, vector<6x96xf32> -> vector<6x96xf32>
    %425 = vector.extract_strided_slice %423 {offsets = [0, 0], sizes = [6, 32], strides = [1, 1]} : vector<6x96xf32> to vector<6x32xf32>
    %426 = vector.extract_strided_slice %424 {offsets = [0, 0], sizes = [6, 32], strides = [1, 1]} : vector<6x96xf32> to vector<6x32xf32>
    %427 = arith.addf %425, %426 : vector<6x32xf32>
    %428 = arith.negf %427 : vector<6x32xf32>
    %429 = math.exp %428 : vector<6x32xf32>
    %cst_165 = arith.constant 1.000000e+00 : f32
    %430 = vector.broadcast %cst_165 : f32 to vector<6x32xf32>
    %431 = arith.addf %430, %429 : vector<6x32xf32>
    %432 = arith.divf %430, %431 : vector<6x32xf32>
    %433 = vector.extract_strided_slice %423 {offsets = [0, 32], sizes = [6, 32], strides = [1, 1]} : vector<6x96xf32> to vector<6x32xf32>
    %434 = vector.extract_strided_slice %424 {offsets = [0, 32], sizes = [6, 32], strides = [1, 1]} : vector<6x96xf32> to vector<6x32xf32>
    %435 = arith.addf %433, %434 : vector<6x32xf32>
    %436 = arith.negf %435 : vector<6x32xf32>
    %437 = math.exp %436 : vector<6x32xf32>
    %cst_166 = arith.constant 1.000000e+00 : f32
    %438 = vector.broadcast %cst_166 : f32 to vector<6x32xf32>
    %439 = arith.addf %438, %437 : vector<6x32xf32>
    %440 = arith.divf %438, %439 : vector<6x32xf32>
    %441 = vector.extract_strided_slice %423 {offsets = [0, 64], sizes = [6, 32], strides = [1, 1]} : vector<6x96xf32> to vector<6x32xf32>
    %442 = vector.extract_strided_slice %424 {offsets = [0, 64], sizes = [6, 32], strides = [1, 1]} : vector<6x96xf32> to vector<6x32xf32>
    %443 = vector.broadcast %280 : vector<1x32xf32> to vector<6x32xf32>
    %444 = arith.addf %442, %443 : vector<6x32xf32>
    %445 = arith.mulf %432, %444 : vector<6x32xf32>
    %446 = arith.addf %441, %445 : vector<6x32xf32>
    %447 = math.tanh %446 : vector<6x32xf32>
    %cst_167 = arith.constant 1.000000e+00 : f32
    %448 = vector.broadcast %cst_167 : f32 to vector<6x32xf32>
    %449 = arith.subf %448, %440 : vector<6x32xf32>
    %450 = arith.mulf %449, %447 : vector<6x32xf32>
    %451 = arith.mulf %440, %395 : vector<6x32xf32>
    %452 = arith.addf %450, %451 : vector<6x32xf32>
    %c3_168 = arith.constant 3 : index
    %c0_169 = arith.constant 0 : index
    %453 = memref.load %arg2[%c3_168, %c0_169] : memref<5x6xi32, #tpu.memory_space<smem>>
    %c3_170 = arith.constant 3 : index
    %c1_171 = arith.constant 1 : index
    %454 = memref.load %arg2[%c3_170, %c1_171] : memref<5x6xi32, #tpu.memory_space<smem>>
    %c3_172 = arith.constant 3 : index
    %c2_173 = arith.constant 2 : index
    %455 = memref.load %arg2[%c3_172, %c2_173] : memref<5x6xi32, #tpu.memory_space<smem>>
    %c3_174 = arith.constant 3 : index
    %c3_175 = arith.constant 3 : index
    %456 = memref.load %arg2[%c3_174, %c3_175] : memref<5x6xi32, #tpu.memory_space<smem>>
    %c3_176 = arith.constant 3 : index
    %c4_177 = arith.constant 4 : index
    %457 = memref.load %arg2[%c3_176, %c4_177] : memref<5x6xi32, #tpu.memory_space<smem>>
    %c3_178 = arith.constant 3 : index
    %c5_179 = arith.constant 5 : index
    %458 = memref.load %arg2[%c3_178, %c5_179] : memref<5x6xi32, #tpu.memory_space<smem>>
    %459 = arith.index_cast %453 : i32 to index
    %c0_180 = arith.constant 0 : index
    %c0_181 = arith.constant 0 : index
    %460 = vector.load %arg3[%459, %c0_180, %c0_181] : memref<50x1x32xf32, #tpu.memory_space<vmem>>, vector<1x1x32xf32>
    %461 = vector.shape_cast %460 : vector<1x1x32xf32> to vector<1x32xf32>
    %462 = arith.index_cast %454 : i32 to index
    %c0_182 = arith.constant 0 : index
    %c0_183 = arith.constant 0 : index
    %463 = vector.load %arg3[%462, %c0_182, %c0_183] : memref<50x1x32xf32, #tpu.memory_space<vmem>>, vector<1x1x32xf32>
    %464 = vector.shape_cast %463 : vector<1x1x32xf32> to vector<1x32xf32>
    %465 = arith.index_cast %455 : i32 to index
    %c0_184 = arith.constant 0 : index
    %c0_185 = arith.constant 0 : index
    %466 = vector.load %arg3[%465, %c0_184, %c0_185] : memref<50x1x32xf32, #tpu.memory_space<vmem>>, vector<1x1x32xf32>
    %467 = vector.shape_cast %466 : vector<1x1x32xf32> to vector<1x32xf32>
    %468 = arith.index_cast %456 : i32 to index
    %c0_186 = arith.constant 0 : index
    %c0_187 = arith.constant 0 : index
    %469 = vector.load %arg3[%468, %c0_186, %c0_187] : memref<50x1x32xf32, #tpu.memory_space<vmem>>, vector<1x1x32xf32>
    %470 = vector.shape_cast %469 : vector<1x1x32xf32> to vector<1x32xf32>
    %471 = arith.index_cast %457 : i32 to index
    %c0_188 = arith.constant 0 : index
    %c0_189 = arith.constant 0 : index
    %472 = vector.load %arg3[%471, %c0_188, %c0_189] : memref<50x1x32xf32, #tpu.memory_space<vmem>>, vector<1x1x32xf32>
    %473 = vector.shape_cast %472 : vector<1x1x32xf32> to vector<1x32xf32>
    %474 = arith.index_cast %458 : i32 to index
    %c0_190 = arith.constant 0 : index
    %c0_191 = arith.constant 0 : index
    %475 = vector.load %arg3[%474, %c0_190, %c0_191] : memref<50x1x32xf32, #tpu.memory_space<vmem>>, vector<1x1x32xf32>
    %476 = vector.shape_cast %475 : vector<1x1x32xf32> to vector<1x32xf32>
    %477 = tpu.concatenate %461, %464, %467, %470, %473, %476 in 0 : vector<1x32xf32>, vector<1x32xf32>, vector<1x32xf32>, vector<1x32xf32>, vector<1x32xf32>, vector<1x32xf32> -> vector<6x32xf32>
    %cst_192 = arith.constant dense<0.000000e+00> : vector<6x96xf32>
    %478 = tpu.matmul %477, %277, %cst_192 {dimension_numbers = #tpu.dot_dimension_numbers<[1], [0], [0], [1], [0, 0, 1, 1], [], []>} : vector<6x32xf32>, vector<32x96xf32>, vector<6x96xf32> -> vector<6x96xf32>
    %479 = vector.broadcast %279 : vector<1x96xf32> to vector<6x96xf32>
    %480 = arith.addf %478, %479 : vector<6x96xf32>
    %cst_193 = arith.constant dense<0.000000e+00> : vector<6x96xf32>
    %481 = tpu.matmul %452, %278, %cst_193 {dimension_numbers = #tpu.dot_dimension_numbers<[1], [0], [0], [1], [0, 0, 1, 1], [], []>} : vector<6x32xf32>, vector<32x96xf32>, vector<6x96xf32> -> vector<6x96xf32>
    %482 = vector.extract_strided_slice %480 {offsets = [0, 0], sizes = [6, 32], strides = [1, 1]} : vector<6x96xf32> to vector<6x32xf32>
    %483 = vector.extract_strided_slice %481 {offsets = [0, 0], sizes = [6, 32], strides = [1, 1]} : vector<6x96xf32> to vector<6x32xf32>
    %484 = arith.addf %482, %483 : vector<6x32xf32>
    %485 = arith.negf %484 : vector<6x32xf32>
    %486 = math.exp %485 : vector<6x32xf32>
    %cst_194 = arith.constant 1.000000e+00 : f32
    %487 = vector.broadcast %cst_194 : f32 to vector<6x32xf32>
    %488 = arith.addf %487, %486 : vector<6x32xf32>
    %489 = arith.divf %487, %488 : vector<6x32xf32>
    %490 = vector.extract_strided_slice %480 {offsets = [0, 32], sizes = [6, 32], strides = [1, 1]} : vector<6x96xf32> to vector<6x32xf32>
    %491 = vector.extract_strided_slice %481 {offsets = [0, 32], sizes = [6, 32], strides = [1, 1]} : vector<6x96xf32> to vector<6x32xf32>
    %492 = arith.addf %490, %491 : vector<6x32xf32>
    %493 = arith.negf %492 : vector<6x32xf32>
    %494 = math.exp %493 : vector<6x32xf32>
    %cst_195 = arith.constant 1.000000e+00 : f32
    %495 = vector.broadcast %cst_195 : f32 to vector<6x32xf32>
    %496 = arith.addf %495, %494 : vector<6x32xf32>
    %497 = arith.divf %495, %496 : vector<6x32xf32>
    %498 = vector.extract_strided_slice %480 {offsets = [0, 64], sizes = [6, 32], strides = [1, 1]} : vector<6x96xf32> to vector<6x32xf32>
    %499 = vector.extract_strided_slice %481 {offsets = [0, 64], sizes = [6, 32], strides = [1, 1]} : vector<6x96xf32> to vector<6x32xf32>
    %500 = vector.broadcast %280 : vector<1x32xf32> to vector<6x32xf32>
    %501 = arith.addf %499, %500 : vector<6x32xf32>
    %502 = arith.mulf %489, %501 : vector<6x32xf32>
    %503 = arith.addf %498, %502 : vector<6x32xf32>
    %504 = math.tanh %503 : vector<6x32xf32>
    %cst_196 = arith.constant 1.000000e+00 : f32
    %505 = vector.broadcast %cst_196 : f32 to vector<6x32xf32>
    %506 = arith.subf %505, %497 : vector<6x32xf32>
    %507 = arith.mulf %506, %504 : vector<6x32xf32>
    %508 = arith.mulf %497, %452 : vector<6x32xf32>
    %509 = arith.addf %507, %508 : vector<6x32xf32>
    %c4_197 = arith.constant 4 : index
    %c0_198 = arith.constant 0 : index
    %510 = memref.load %arg2[%c4_197, %c0_198] : memref<5x6xi32, #tpu.memory_space<smem>>
    %c4_199 = arith.constant 4 : index
    %c1_200 = arith.constant 1 : index
    %511 = memref.load %arg2[%c4_199, %c1_200] : memref<5x6xi32, #tpu.memory_space<smem>>
    %c4_201 = arith.constant 4 : index
    %c2_202 = arith.constant 2 : index
    %512 = memref.load %arg2[%c4_201, %c2_202] : memref<5x6xi32, #tpu.memory_space<smem>>
    %c4_203 = arith.constant 4 : index
    %c3_204 = arith.constant 3 : index
    %513 = memref.load %arg2[%c4_203, %c3_204] : memref<5x6xi32, #tpu.memory_space<smem>>
    %c4_205 = arith.constant 4 : index
    %c4_206 = arith.constant 4 : index
    %514 = memref.load %arg2[%c4_205, %c4_206] : memref<5x6xi32, #tpu.memory_space<smem>>
    %c4_207 = arith.constant 4 : index
    %c5_208 = arith.constant 5 : index
    %515 = memref.load %arg2[%c4_207, %c5_208] : memref<5x6xi32, #tpu.memory_space<smem>>
    %516 = arith.index_cast %510 : i32 to index
    %c0_209 = arith.constant 0 : index
    %c0_210 = arith.constant 0 : index
    %517 = vector.load %arg3[%516, %c0_209, %c0_210] : memref<50x1x32xf32, #tpu.memory_space<vmem>>, vector<1x1x32xf32>
    %518 = vector.shape_cast %517 : vector<1x1x32xf32> to vector<1x32xf32>
    %519 = arith.index_cast %511 : i32 to index
    %c0_211 = arith.constant 0 : index
    %c0_212 = arith.constant 0 : index
    %520 = vector.load %arg3[%519, %c0_211, %c0_212] : memref<50x1x32xf32, #tpu.memory_space<vmem>>, vector<1x1x32xf32>
    %521 = vector.shape_cast %520 : vector<1x1x32xf32> to vector<1x32xf32>
    %522 = arith.index_cast %512 : i32 to index
    %c0_213 = arith.constant 0 : index
    %c0_214 = arith.constant 0 : index
    %523 = vector.load %arg3[%522, %c0_213, %c0_214] : memref<50x1x32xf32, #tpu.memory_space<vmem>>, vector<1x1x32xf32>
    %524 = vector.shape_cast %523 : vector<1x1x32xf32> to vector<1x32xf32>
    %525 = arith.index_cast %513 : i32 to index
    %c0_215 = arith.constant 0 : index
    %c0_216 = arith.constant 0 : index
    %526 = vector.load %arg3[%525, %c0_215, %c0_216] : memref<50x1x32xf32, #tpu.memory_space<vmem>>, vector<1x1x32xf32>
    %527 = vector.shape_cast %526 : vector<1x1x32xf32> to vector<1x32xf32>
    %528 = arith.index_cast %514 : i32 to index
    %c0_217 = arith.constant 0 : index
    %c0_218 = arith.constant 0 : index
    %529 = vector.load %arg3[%528, %c0_217, %c0_218] : memref<50x1x32xf32, #tpu.memory_space<vmem>>, vector<1x1x32xf32>
    %530 = vector.shape_cast %529 : vector<1x1x32xf32> to vector<1x32xf32>
    %531 = arith.index_cast %515 : i32 to index
    %c0_219 = arith.constant 0 : index
    %c0_220 = arith.constant 0 : index
    %532 = vector.load %arg3[%531, %c0_219, %c0_220] : memref<50x1x32xf32, #tpu.memory_space<vmem>>, vector<1x1x32xf32>
    %533 = vector.shape_cast %532 : vector<1x1x32xf32> to vector<1x32xf32>
    %534 = tpu.concatenate %518, %521, %524, %527, %530, %533 in 0 : vector<1x32xf32>, vector<1x32xf32>, vector<1x32xf32>, vector<1x32xf32>, vector<1x32xf32>, vector<1x32xf32> -> vector<6x32xf32>
    %cst_221 = arith.constant dense<0.000000e+00> : vector<6x96xf32>
    %535 = tpu.matmul %534, %277, %cst_221 {dimension_numbers = #tpu.dot_dimension_numbers<[1], [0], [0], [1], [0, 0, 1, 1], [], []>} : vector<6x32xf32>, vector<32x96xf32>, vector<6x96xf32> -> vector<6x96xf32>
    %536 = vector.broadcast %279 : vector<1x96xf32> to vector<6x96xf32>
    %537 = arith.addf %535, %536 : vector<6x96xf32>
    %cst_222 = arith.constant dense<0.000000e+00> : vector<6x96xf32>
    %538 = tpu.matmul %509, %278, %cst_222 {dimension_numbers = #tpu.dot_dimension_numbers<[1], [0], [0], [1], [0, 0, 1, 1], [], []>} : vector<6x32xf32>, vector<32x96xf32>, vector<6x96xf32> -> vector<6x96xf32>
    %539 = vector.extract_strided_slice %537 {offsets = [0, 0], sizes = [6, 32], strides = [1, 1]} : vector<6x96xf32> to vector<6x32xf32>
    %540 = vector.extract_strided_slice %538 {offsets = [0, 0], sizes = [6, 32], strides = [1, 1]} : vector<6x96xf32> to vector<6x32xf32>
    %541 = arith.addf %539, %540 : vector<6x32xf32>
    %542 = arith.negf %541 : vector<6x32xf32>
    %543 = math.exp %542 : vector<6x32xf32>
    %cst_223 = arith.constant 1.000000e+00 : f32
    %544 = vector.broadcast %cst_223 : f32 to vector<6x32xf32>
    %545 = arith.addf %544, %543 : vector<6x32xf32>
    %546 = arith.divf %544, %545 : vector<6x32xf32>
    %547 = vector.extract_strided_slice %537 {offsets = [0, 32], sizes = [6, 32], strides = [1, 1]} : vector<6x96xf32> to vector<6x32xf32>
    %548 = vector.extract_strided_slice %538 {offsets = [0, 32], sizes = [6, 32], strides = [1, 1]} : vector<6x96xf32> to vector<6x32xf32>
    %549 = arith.addf %547, %548 : vector<6x32xf32>
    %550 = arith.negf %549 : vector<6x32xf32>
    %551 = math.exp %550 : vector<6x32xf32>
    %cst_224 = arith.constant 1.000000e+00 : f32
    %552 = vector.broadcast %cst_224 : f32 to vector<6x32xf32>
    %553 = arith.addf %552, %551 : vector<6x32xf32>
    %554 = arith.divf %552, %553 : vector<6x32xf32>
    %555 = vector.extract_strided_slice %537 {offsets = [0, 64], sizes = [6, 32], strides = [1, 1]} : vector<6x96xf32> to vector<6x32xf32>
    %556 = vector.extract_strided_slice %538 {offsets = [0, 64], sizes = [6, 32], strides = [1, 1]} : vector<6x96xf32> to vector<6x32xf32>
    %557 = vector.broadcast %280 : vector<1x32xf32> to vector<6x32xf32>
    %558 = arith.addf %556, %557 : vector<6x32xf32>
    %559 = arith.mulf %546, %558 : vector<6x32xf32>
    %560 = arith.addf %555, %559 : vector<6x32xf32>
    %561 = math.tanh %560 : vector<6x32xf32>
    %cst_225 = arith.constant 1.000000e+00 : f32
    %562 = vector.broadcast %cst_225 : f32 to vector<6x32xf32>
    %563 = arith.subf %562, %554 : vector<6x32xf32>
    %564 = arith.mulf %563, %561 : vector<6x32xf32>
    %565 = arith.mulf %554, %509 : vector<6x32xf32>
    %566 = arith.addf %564, %565 : vector<6x32xf32>
    %c0_226 = arith.constant 0 : index
    %c0_227 = arith.constant 0 : index
    %567 = vector.load %arg16[%c0_226, %c0_227] : memref<1x32xf32, #tpu.memory_space<vmem>>, vector<1x32xf32>
    %c0_228 = arith.constant 0 : index
    %c0_229 = arith.constant 0 : index
    %568 = vector.load %arg12[%c0_228, %c0_229] : memref<32x96xf32, #tpu.memory_space<vmem>>, vector<32x96xf32>
    %c0_230 = arith.constant 0 : index
    %c0_231 = arith.constant 0 : index
    %569 = vector.load %arg13[%c0_230, %c0_231] : memref<32x96xf32, #tpu.memory_space<vmem>>, vector<32x96xf32>
    %c0_232 = arith.constant 0 : index
    %c0_233 = arith.constant 0 : index
    %570 = vector.load %arg14[%c0_232, %c0_233] : memref<1x96xf32, #tpu.memory_space<vmem>>, vector<1x96xf32>
    %c0_234 = arith.constant 0 : index
    %c0_235 = arith.constant 0 : index
    %571 = vector.load %arg15[%c0_234, %c0_235] : memref<1x32xf32, #tpu.memory_space<vmem>>, vector<1x32xf32>
    %cst_236 = arith.constant dense<0.000000e+00> : vector<1x96xf32>
    %572 = tpu.matmul %276, %568, %cst_236 {dimension_numbers = #tpu.dot_dimension_numbers<[1], [0], [0], [1], [0, 0, 1, 1], [], []>} : vector<1x32xf32>, vector<32x96xf32>, vector<1x96xf32> -> vector<1x96xf32>
    %573 = arith.addf %572, %570 : vector<1x96xf32>
    %cst_237 = arith.constant dense<0.000000e+00> : vector<1x96xf32>
    %574 = tpu.matmul %567, %569, %cst_237 {dimension_numbers = #tpu.dot_dimension_numbers<[1], [0], [0], [1], [0, 0, 1, 1], [], []>} : vector<1x32xf32>, vector<32x96xf32>, vector<1x96xf32> -> vector<1x96xf32>
    %575 = vector.extract_strided_slice %573 {offsets = [0, 0], sizes = [1, 32], strides = [1, 1]} : vector<1x96xf32> to vector<1x32xf32>
    %576 = vector.extract_strided_slice %574 {offsets = [0, 0], sizes = [1, 32], strides = [1, 1]} : vector<1x96xf32> to vector<1x32xf32>
    %577 = arith.addf %575, %576 : vector<1x32xf32>
    %578 = arith.negf %577 : vector<1x32xf32>
    %579 = math.exp %578 : vector<1x32xf32>
    %cst_238 = arith.constant 1.000000e+00 : f32
    %580 = vector.broadcast %cst_238 : f32 to vector<1x32xf32>
    %581 = arith.addf %580, %579 : vector<1x32xf32>
    %582 = arith.divf %580, %581 : vector<1x32xf32>
    %583 = vector.extract_strided_slice %573 {offsets = [0, 32], sizes = [1, 32], strides = [1, 1]} : vector<1x96xf32> to vector<1x32xf32>
    %584 = vector.extract_strided_slice %574 {offsets = [0, 32], sizes = [1, 32], strides = [1, 1]} : vector<1x96xf32> to vector<1x32xf32>
    %585 = arith.addf %583, %584 : vector<1x32xf32>
    %586 = arith.negf %585 : vector<1x32xf32>
    %587 = math.exp %586 : vector<1x32xf32>
    %cst_239 = arith.constant 1.000000e+00 : f32
    %588 = vector.broadcast %cst_239 : f32 to vector<1x32xf32>
    %589 = arith.addf %588, %587 : vector<1x32xf32>
    %590 = arith.divf %588, %589 : vector<1x32xf32>
    %591 = vector.extract_strided_slice %573 {offsets = [0, 64], sizes = [1, 32], strides = [1, 1]} : vector<1x96xf32> to vector<1x32xf32>
    %592 = vector.extract_strided_slice %574 {offsets = [0, 64], sizes = [1, 32], strides = [1, 1]} : vector<1x96xf32> to vector<1x32xf32>
    %593 = arith.addf %592, %571 : vector<1x32xf32>
    %594 = arith.mulf %582, %593 : vector<1x32xf32>
    %595 = arith.addf %591, %594 : vector<1x32xf32>
    %596 = math.tanh %595 : vector<1x32xf32>
    %cst_240 = arith.constant 1.000000e+00 : f32
    %597 = vector.broadcast %cst_240 : f32 to vector<1x32xf32>
    %598 = arith.subf %597, %590 : vector<1x32xf32>
    %599 = arith.mulf %598, %596 : vector<1x32xf32>
    %600 = arith.mulf %590, %567 : vector<1x32xf32>
    %601 = arith.addf %599, %600 : vector<1x32xf32>
    %c0_241 = arith.constant 0 : index
    %c0_242 = arith.constant 0 : index
    %602 = vector.load %arg27[%c0_241, %c0_242] : memref<1x32xf32, #tpu.memory_space<vmem>>, vector<1x32xf32>
    tpu.vector_store %arg27[%c0_241, %c0_242], %601 {strides = array<i32>} : memref<1x32xf32, #tpu.memory_space<vmem>>, vector<1x32xf32>,
    %c0_243 = arith.constant 0 : index
    %c0_244 = arith.constant 0 : index
    %603 = vector.load %arg17[%c0_243, %c0_244] : memref<32x64xf32, #tpu.memory_space<vmem>>, vector<32x64xf32>
    %cst_245 = arith.constant dense<0.000000e+00> : vector<1x64xf32>
    %604 = tpu.matmul %601, %603, %cst_245 {dimension_numbers = #tpu.dot_dimension_numbers<[1], [0], [0], [1], [0, 0, 1, 1], [], []>} : vector<1x32xf32>, vector<32x64xf32>, vector<1x64xf32> -> vector<1x64xf32>
    %c0_246 = arith.constant 0 : index
    %c0_247 = arith.constant 0 : index
    %605 = vector.load %arg18[%c0_246, %c0_247] : memref<32x64xf32, #tpu.memory_space<vmem>>, vector<32x64xf32>
    %cst_248 = arith.constant dense<0.000000e+00> : vector<6x64xf32>
    %606 = tpu.matmul %566, %605, %cst_248 {dimension_numbers = #tpu.dot_dimension_numbers<[1], [0], [0], [1], [0, 0, 1, 1], [], []>} : vector<6x32xf32>, vector<32x64xf32>, vector<6x64xf32> -> vector<6x64xf32>
    %607 = vector.shape_cast %604 : vector<1x64xf32> to vector<1x1x64xf32>
    %608 = vector.shape_cast %606 : vector<6x64xf32> to vector<1x6x64xf32>
    %609 = vector.broadcast %607 : vector<1x1x64xf32> to vector<1x6x64xf32>
    %610 = arith.addf %609, %608 : vector<1x6x64xf32>
    %c0_249 = arith.constant 0 : index
    %c0_250 = arith.constant 0 : index
    %611 = vector.load %arg19[%c0_249, %c0_250] : memref<1x64xf32, #tpu.memory_space<vmem>>, vector<1x64xf32>
    %612 = vector.shape_cast %611 : vector<1x64xf32> to vector<1x1x64xf32>
    %613 = vector.broadcast %612 : vector<1x1x64xf32> to vector<1x6x64xf32>
    %614 = arith.addf %610, %613 : vector<1x6x64xf32>
    %cst_251 = arith.constant 0.000000e+00 : f32
    %615 = vector.broadcast %cst_251 : f32 to vector<1x6x64xf32>
    %616 = arith.maximumf %614, %615 : vector<1x6x64xf32>
    %c0_252 = arith.constant 0 : index
    %c0_253 = arith.constant 0 : index
    %617 = vector.load %arg20[%c0_252, %c0_253] : memref<1x64xf32, #tpu.memory_space<vmem>>, vector<1x64xf32>
    %618 = vector.shape_cast %617 : vector<1x64xf32> to vector<1x1x64xf32>
    %619 = vector.broadcast %618 : vector<1x1x64xf32> to vector<1x6x64xf32>
    %620 = arith.mulf %616, %619 : vector<1x6x64xf32>
    %cst_254 = arith.constant dense<0.000000e+00> : vector<1x6xf32>
    %621 = vector.multi_reduction <add>, %620, %cst_254 [2] : vector<1x6x64xf32> to vector<1x6xf32>
    %c0_255 = arith.constant 0 : index
    %c0_256 = arith.constant 0 : index
    %622 = vector.load %arg21[%c0_255, %c0_256] : memref<1x1xf32, #tpu.memory_space<vmem>>, vector<1x1xf32>
    %623 = vector.broadcast %622 : vector<1x1xf32> to vector<1x6xf32>
    %624 = arith.addf %621, %623 : vector<1x6xf32>
    %cst_257 = arith.constant 0.000000e+00 : f32
    %625 = vector.broadcast %cst_257 : f32 to vector<1x6xf32>
    %626 = arith.maximumf %624, %625 : vector<1x6xf32>
    %c0_258 = arith.constant 0 : index
    %c0_259 = arith.constant 0 : index
    %627 = vector.load %arg24[%c0_258, %c0_259] : memref<1x6xf32, #tpu.memory_space<vmem>>, vector<1x6xf32>
    tpu.vector_store %arg24[%c0_258, %c0_259], %626 {strides = array<i32>} : memref<1x6xf32, #tpu.memory_space<vmem>>, vector<1x6xf32>,
    %cst_260 = arith.constant dense<0xFF800000> : vector<1xf32>
    %628 = vector.multi_reduction <maximumf>, %626, %cst_260 [1] : vector<1x6xf32> to vector<1xf32>
    %629 = vector.shape_cast %628 : vector<1xf32> to vector<1x1xf32>
    %630 = tpu.iota {dimensions = array<i32: 1>} : vector<1x6xi32>
    %631 = vector.broadcast %629 : vector<1x1xf32> to vector<1x6xf32>
    %632 = arith.cmpf oge, %626, %631 : vector<1x6xf32>
    %c6_i32 = arith.constant 6 : i32
    %633 = vector.broadcast %c6_i32 : i32 to vector<1x6xi32>
    %634 = arith.select %632, %630, %633 : vector<1x6xi1>, vector<1x6xi32>
    %cst_261 = arith.constant dense<2147483647> : vector<1xi32>
    %635 = vector.multi_reduction <minsi>, %634, %cst_261 [1] : vector<1x6xi32> to vector<1xi32>
    %636 = vector.shape_cast %635 : vector<1xi32> to vector<1x1xi32>
    %c5_i32 = arith.constant 5 : i32
    %637 = vector.broadcast %c5_i32 : i32 to vector<1x1xi32>
    %638 = arith.minsi %636, %637 : vector<1x1xi32>
    %c0_262 = arith.constant 0 : index
    %c0_263 = arith.constant 0 : index
    %639 = vector.load %arg25[%c0_262, %c0_263] : memref<1x1xi32, #tpu.memory_space<vmem>>, vector<1x1xi32>
    tpu.vector_store %arg25[%c0_262, %c0_263], %638 {strides = array<i32>} : memref<1x1xi32, #tpu.memory_space<vmem>>, vector<1x1xi32>,
    %c0_264 = arith.constant 0 : index
    %c0_265 = arith.constant 0 : index
    %640 = vector.load %arg22[%c0_264, %c0_265] : memref<32x1xf32, #tpu.memory_space<vmem>>, vector<32x1xf32>
    %cst_266 = arith.constant dense<0.000000e+00> : vector<1x1xf32>
    %641 = tpu.matmul %601, %640, %cst_266 {dimension_numbers = #tpu.dot_dimension_numbers<[1], [0], [0], [1], [0, 0, 1, 1], [], []>} : vector<1x32xf32>, vector<32x1xf32>, vector<1x1xf32> -> vector<1x1xf32>
    %c0_267 = arith.constant 0 : index
    %c0_268 = arith.constant 0 : index
    %642 = vector.load %arg23[%c0_267, %c0_268] : memref<1x1xf32, #tpu.memory_space<vmem>>, vector<1x1xf32>
    %643 = arith.addf %641, %642 : vector<1x1xf32>
    %c0_269 = arith.constant 0 : index
    %c0_270 = arith.constant 0 : index
    %644 = vector.load %arg26[%c0_269, %c0_270] : memref<1x1xf32, #tpu.memory_space<vmem>>, vector<1x1xf32>
    tpu.vector_store %arg26[%c0_269, %c0_270], %643 {strides = array<i32>} : memref<1x1xf32, #tpu.memory_space<vmem>>, vector<1x1xf32>,
    return
  }
  func.func @transform_0(%arg0: i32, %arg1: memref<8x1xi32, #tpu.memory_space<smem>>, %arg2: memref<5x6xi32, #tpu.memory_space<smem>>) -> (i32, i32, i32) {
    %c0_i32 = arith.constant 0 : i32
    %c0_i32_0 = arith.constant 0 : i32
    %c0_i32_1 = arith.constant 0 : i32
    %c0_i32_2 = arith.constant 0 : i32
    return %c0_i32, %c0_i32_0, %c0_i32_1 : i32, i32, i32
  }
  func.func @transform_1(%arg0: i32, %arg1: memref<8x1xi32, #tpu.memory_space<smem>>, %arg2: memref<5x6xi32, #tpu.memory_space<smem>>) -> (i32, i32) {
    %c0_i32 = arith.constant 0 : i32
    %c0_i32_0 = arith.constant 0 : i32
    %c0_i32_1 = arith.constant 0 : i32
    return %c0_i32, %c0_i32_0 : i32, i32
  }
  func.func @transform_2(%arg0: i32, %arg1: memref<8x1xi32, #tpu.memory_space<smem>>, %arg2: memref<5x6xi32, #tpu.memory_space<smem>>) -> (i32, i32) {
    %c0_i32 = arith.constant 0 : i32
    %c0_i32_0 = arith.constant 0 : i32
    %c0_i32_1 = arith.constant 0 : i32
    return %c0_i32, %c0_i32_0 : i32, i32
  }
  func.func @transform_3(%arg0: i32, %arg1: memref<8x1xi32, #tpu.memory_space<smem>>, %arg2: memref<5x6xi32, #tpu.memory_space<smem>>) -> (i32, i32) {
    %c0_i32 = arith.constant 0 : i32
    %c0_i32_0 = arith.constant 0 : i32
    %c0_i32_1 = arith.constant 0 : i32
    return %c0_i32, %c0_i32_0 : i32, i32
  }
  func.func @transform_4(%arg0: i32, %arg1: memref<8x1xi32, #tpu.memory_space<smem>>, %arg2: memref<5x6xi32, #tpu.memory_space<smem>>) -> (i32, i32) {
    %c0_i32 = arith.constant 0 : i32
    %c0_i32_0 = arith.constant 0 : i32
    %c0_i32_1 = arith.constant 0 : i32
    return %c0_i32, %c0_i32_0 : i32, i32
  }
  func.func @transform_5(%arg0: i32, %arg1: memref<8x1xi32, #tpu.memory_space<smem>>, %arg2: memref<5x6xi32, #tpu.memory_space<smem>>) -> (i32, i32) {
    %c0_i32 = arith.constant 0 : i32
    %c0_i32_0 = arith.constant 0 : i32
    %c0_i32_1 = arith.constant 0 : i32
    return %c0_i32, %c0_i32_0 : i32, i32
  }
  func.func @transform_6(%arg0: i32, %arg1: memref<8x1xi32, #tpu.memory_space<smem>>, %arg2: memref<5x6xi32, #tpu.memory_space<smem>>) -> (i32, i32) {
    %c0_i32 = arith.constant 0 : i32
    %c0_i32_0 = arith.constant 0 : i32
    %c0_i32_1 = arith.constant 0 : i32
    return %c0_i32, %c0_i32_0 : i32, i32
  }
  func.func @transform_7(%arg0: i32, %arg1: memref<8x1xi32, #tpu.memory_space<smem>>, %arg2: memref<5x6xi32, #tpu.memory_space<smem>>) -> (i32, i32) {
    %c0_i32 = arith.constant 0 : i32
    %c0_i32_0 = arith.constant 0 : i32
    %c0_i32_1 = arith.constant 0 : i32
    return %c0_i32, %c0_i32_0 : i32, i32
  }
  func.func @transform_8(%arg0: i32, %arg1: memref<8x1xi32, #tpu.memory_space<smem>>, %arg2: memref<5x6xi32, #tpu.memory_space<smem>>) -> (i32, i32) {
    %c0_i32 = arith.constant 0 : i32
    %c0_i32_0 = arith.constant 0 : i32
    %c0_i32_1 = arith.constant 0 : i32
    return %c0_i32, %c0_i32_0 : i32, i32
  }
  func.func @transform_9(%arg0: i32, %arg1: memref<8x1xi32, #tpu.memory_space<smem>>, %arg2: memref<5x6xi32, #tpu.memory_space<smem>>) -> (i32, i32) {
    %c0_i32 = arith.constant 0 : i32
    %c0_i32_0 = arith.constant 0 : i32
    %c0_i32_1 = arith.constant 0 : i32
    return %c0_i32, %c0_i32_0 : i32, i32
  }
  func.func @transform_10(%arg0: i32, %arg1: memref<8x1xi32, #tpu.memory_space<smem>>, %arg2: memref<5x6xi32, #tpu.memory_space<smem>>) -> (i32, i32) {
    %c0_i32 = arith.constant 0 : i32
    %c0_i32_0 = arith.constant 0 : i32
    %c0_i32_1 = arith.constant 0 : i32
    return %c0_i32, %c0_i32_0 : i32, i32
  }
  func.func @transform_11(%arg0: i32, %arg1: memref<8x1xi32, #tpu.memory_space<smem>>, %arg2: memref<5x6xi32, #tpu.memory_space<smem>>) -> (i32, i32) {
    %c0_i32 = arith.constant 0 : i32
    %c0_i32_0 = arith.constant 0 : i32
    %c0_i32_1 = arith.constant 0 : i32
    return %c0_i32, %c0_i32_0 : i32, i32
  }
  func.func @transform_12(%arg0: i32, %arg1: memref<8x1xi32, #tpu.memory_space<smem>>, %arg2: memref<5x6xi32, #tpu.memory_space<smem>>) -> (i32, i32) {
    %c0_i32 = arith.constant 0 : i32
    %c0_i32_0 = arith.constant 0 : i32
    %c0_i32_1 = arith.constant 0 : i32
    return %c0_i32, %c0_i32_0 : i32, i32
  }
  func.func @transform_13(%arg0: i32, %arg1: memref<8x1xi32, #tpu.memory_space<smem>>, %arg2: memref<5x6xi32, #tpu.memory_space<smem>>) -> (i32, i32) {
    %c0_i32 = arith.constant 0 : i32
    %c0_i32_0 = arith.constant 0 : i32
    %c0_i32_1 = arith.constant 0 : i32
    return %c0_i32, %c0_i32_0 : i32, i32
  }
  func.func @transform_14(%arg0: i32, %arg1: memref<8x1xi32, #tpu.memory_space<smem>>, %arg2: memref<5x6xi32, #tpu.memory_space<smem>>) -> (i32, i32) {
    %c0_i32 = arith.constant 0 : i32
    %c0_i32_0 = arith.constant 0 : i32
    %c0_i32_1 = arith.constant 0 : i32
    return %c0_i32, %c0_i32_0 : i32, i32
  }
  func.func @transform_15(%arg0: i32, %arg1: memref<8x1xi32, #tpu.memory_space<smem>>, %arg2: memref<5x6xi32, #tpu.memory_space<smem>>) -> (i32, i32) {
    %c0_i32 = arith.constant 0 : i32
    %c0_i32_0 = arith.constant 0 : i32
    %c0_i32_1 = arith.constant 0 : i32
    return %c0_i32, %c0_i32_0 : i32, i32
  }
  func.func @transform_16(%arg0: i32, %arg1: memref<8x1xi32, #tpu.memory_space<smem>>, %arg2: memref<5x6xi32, #tpu.memory_space<smem>>) -> (i32, i32) {
    %c0_i32 = arith.constant 0 : i32
    %c0_i32_0 = arith.constant 0 : i32
    %c0_i32_1 = arith.constant 0 : i32
    return %c0_i32, %c0_i32_0 : i32, i32
  }
  func.func @transform_17(%arg0: i32, %arg1: memref<8x1xi32, #tpu.memory_space<smem>>, %arg2: memref<5x6xi32, #tpu.memory_space<smem>>) -> (i32, i32) {
    %c0_i32 = arith.constant 0 : i32
    %c0_i32_0 = arith.constant 0 : i32
    %c0_i32_1 = arith.constant 0 : i32
    return %c0_i32, %c0_i32_0 : i32, i32
  }
  func.func @transform_18(%arg0: i32, %arg1: memref<8x1xi32, #tpu.memory_space<smem>>, %arg2: memref<5x6xi32, #tpu.memory_space<smem>>) -> (i32, i32) {
    %c0_i32 = arith.constant 0 : i32
    %c0_i32_0 = arith.constant 0 : i32
    %c0_i32_1 = arith.constant 0 : i32
    return %c0_i32, %c0_i32_0 : i32, i32
  }
  func.func @transform_19(%arg0: i32, %arg1: memref<8x1xi32, #tpu.memory_space<smem>>, %arg2: memref<5x6xi32, #tpu.memory_space<smem>>) -> (i32, i32) {
    %c0_i32 = arith.constant 0 : i32
    %c0_i32_0 = arith.constant 0 : i32
    %c0_i32_1 = arith.constant 0 : i32
    return %c0_i32, %c0_i32_0 : i32, i32
  }
  func.func @transform_20(%arg0: i32, %arg1: memref<8x1xi32, #tpu.memory_space<smem>>, %arg2: memref<5x6xi32, #tpu.memory_space<smem>>) -> (i32, i32) {
    %c0_i32 = arith.constant 0 : i32
    %c0_i32_0 = arith.constant 0 : i32
    %c0_i32_1 = arith.constant 0 : i32
    return %c0_i32, %c0_i32_0 : i32, i32
  }
  func.func @transform_21(%arg0: i32, %arg1: memref<8x1xi32, #tpu.memory_space<smem>>, %arg2: memref<5x6xi32, #tpu.memory_space<smem>>) -> (i32, i32) {
    %c0_i32 = arith.constant 0 : i32
    %c0_i32_0 = arith.constant 0 : i32
    %c0_i32_1 = arith.constant 0 : i32
    return %c0_i32, %c0_i32_0 : i32, i32
  }
  func.func @transform_22(%arg0: i32, %arg1: memref<8x1xi32, #tpu.memory_space<smem>>, %arg2: memref<5x6xi32, #tpu.memory_space<smem>>) -> (i32, i32) {
    %c0_i32 = arith.constant 0 : i32
    %c0_i32_0 = arith.constant 0 : i32
    %c0_i32_1 = arith.constant 0 : i32
    return %c0_i32, %c0_i32_0 : i32, i32
  }
  func.func @transform_23(%arg0: i32, %arg1: memref<8x1xi32, #tpu.memory_space<smem>>, %arg2: memref<5x6xi32, #tpu.memory_space<smem>>) -> (i32, i32) {
    %c0_i32 = arith.constant 0 : i32
    %c0_i32_0 = arith.constant 0 : i32
    %c0_i32_1 = arith.constant 0 : i32
    return %c0_i32, %c0_i32_0 : i32, i32
  }
  func.func @transform_24(%arg0: i32, %arg1: memref<8x1xi32, #tpu.memory_space<smem>>, %arg2: memref<5x6xi32, #tpu.memory_space<smem>>) -> (i32, i32) {
    %c0_i32 = arith.constant 0 : i32
    %c0_i32_0 = arith.constant 0 : i32
    %c0_i32_1 = arith.constant 0 : i32
    return %c0_i32, %c0_i32_0 : i32, i32
  }
}

</mosaic_0001>

<bundles_post_ra>
// kernel: actorz_critic_forward.1
= control target key start
LH: loop header
LB: loop body
LE: loop exit
PB: predicated region body
PF: predicated region fallthrough
CT: control target
= control target key end

     0   :  { %s5616_s0 = inlined_call_operand.vmem [shape: s32[8,1], index: 0, kind: input, shape index: {}]   ;;  %s5617_s2 = inlined_call_operand.vmem [shape: f32[50,1,32], index: 2, kind: input, shape index: {}]   ;;  %s5618_s3 = inlined_call_operand.vmem [shape: f32[32,96], index: 3, kind: input, shape index: {}]   ;;  %s5619_s4 = inlined_call_operand.vmem [shape: f32[32,96], index: 4, kind: input, shape index: {}]   ;;  %s5620_s5 = inlined_call_operand.hbm [shape: f32[1,96], index: 5, kind: input, shape index: {}]   ;;  %s5621_s6 = inlined_call_operand.hbm [shape: f32[1,32], index: 6, kind: input, shape index: {}]   ;;  %s5622_s7 = inlined_call_operand.vmem [shape: f32[32,96], index: 7, kind: input, shape index: {}]   ;;  %s5623_s8 = inlined_call_operand.vmem [shape: f32[32,96], index: 8, kind: input, shape index: {}]   ;;  %s5624_s9 = inlined_call_operand.hbm [shape: f32[1,96], index: 9, kind: input, shape index: {}]   ;;  %s5625_s10 = inlined_call_operand.hbm [shape: f32[1,32], index: 10, kind: input, shape index: {}]   ;;  %s5626_s11 = inlined_call_operand.vmem [shape: f32[32,96], index: 11, kind: input, shape index: {}]   ;;  %s5627_s12 = inlined_call_operand.hbm [shape: f32[32,96], index: 12, kind: input, shape index: {}]   ;;  %s5628_s13 = inlined_call_operand.hbm [shape: f32[1,96], index: 13, kind: input, shape index: {}]   ;;  %s5629_s14 = inlined_call_operand.hbm [shape: f32[1,32], index: 14, kind: input, shape index: {}]   ;;  %s5630_s15 = inlined_call_operand.vmem [shape: f32[1,32], index: 15, kind: input, shape index: {}]   ;;  %s5631_s16 = inlined_call_operand.vmem [shape: f32[32,64], index: 16, kind: input, shape index: {}]   ;;  %s5632_s17 = inlined_call_operand.hbm [shape: f32[32,64], index: 17, kind: input, shape index: {}]   ;;  %s5633_s18 = inlined_call_operand.hbm [shape: f32[1,64], index: 18, kind: input, shape index: {}]   ;;  %s5634_s19 = inlined_call_operand.hbm [shape: f32[1,64], index: 19, kind: input, shape index: {}]   ;;  %s5635_s21 = inlined_call_operand.vmem [shape: f32[32,1], index: 21, kind: input, shape index: {}]   ;;  %s5636_s23 = inlined_call_operand.hbm [shape: f32[1,6], index: 23, kind: output, shape index: {0}]   ;;  %s5637_s24 = inlined_call_operand.hbm [shape: s32[1,1], index: 24, kind: output, shape index: {1}]   ;;  %s5638_s25 = inlined_call_operand.hbm [shape: f32[1,1], index: 25, kind: output, shape index: {2}]   ;;  %s5639_s26 = inlined_call_operand.hbm [shape: f32[1,32], index: 26, kind: output, shape index: {3}]   ;;  %s5640_s1 = inlined_call_operand.vmem [shape: s32[5,6], index: 1, kind: input, shape index: {}]   ;;  %s5641_s20 = inlined_call_operand.<no memory space> [shape: f32[1,1], index: 20, kind: input, shape index: {}]   ;;  %s5642_s22 = inlined_call_operand.<no memory space> [shape: f32[1,1], index: 22, kind: input, shape index: {}]  }
   0x1   :  { %5655 = sst [smem:[#allocation40_spill]] %s5616_s0  ;;  %v40_v0 = vstv %s5641_s20  ;;  %v42_v1 = vstv %s5642_s22 }
   0x2   :  { %5656 = sst [smem:[#allocation41_spill]] %s5617_s2  ;;  %41 = vst [vmem:[#allocation5] sm:$0x1] %v40_v0  ;;  %43 = vst [vmem:[#allocation6] sm:$0x1] %v42_v1 }
   0x3   :  { %5657 = sst [smem:[#allocation42_spill]] %s5618_s3 }
   0x4   :  { %5658 = sst [smem:[#allocation43_spill]] %s5619_s4 }
   0x5   :  { %5659 = sst [smem:[#allocation44_spill]] %s5620_s5  ;;  %s36_s5 = sshll.u32 %s5640_s1, 4  ;;  %s37_s5 = int_to_ptr.vmem [resolvable:$true] %s36_s5 }
   0x6   :  { %5660 = sst [smem:[#allocation45_spill]] %s5621_s6 }
   0x7   :  { %5661 = sst [smem:[#allocation46_spill]] %s5622_s7 }
   0x8   :  { %5662 = sst [smem:[#allocation47_spill]] %s5623_s8  ;;  %s5668_s8 = sld [smem:[#allocation40_spill]] }
   0x9   :  { %5663 = sst [smem:[#allocation48_spill]] %s5624_s9 }
   0xa   :  { %5664 = sst [smem:[#allocation49_spill]] %s5625_s10 }
   0xb   :  { %5665 = sst [smem:[#allocation50_spill]] %s5626_s11 }
   0xc   :  { %5666 = sst [smem:[#allocation51_spill]] %s5636_s23 }
   0xd   :  { %5667 = sst [smem:[#allocation52_spill]] %s5638_s25 }
   0xe   :  { %s32_s23 = sshll.u32 %s5668_s8, 4  ;;  %s33_s23 = int_to_ptr.vmem [resolvable:$true] %s32_s23 }
   0xf   :  { %s4333_s30 = scalar_lea.vmem %s33_s23, 128  ;;  %p4338_p1 = scmp.lt.s32.totalorder %s33_s23, %s33_s23 }
  0x10   :  { %p4334_p0 = scmp.ne.s32.totalorder %s33_s23, %s4333_s30  ;;  %p4339_p2 = scmp.lt.s32.totalorder %s4333_s30, %s4333_s30 }
  0x12   :  { %p4340_p3 = por %p4339_p2, %p4338_p1 }
  0x14   :  { %p4341_p4 = pnand %p4340_p3, %p4334_p0 }
  0x16   :  { %4344 = shalt.err (!%p4341_p4)  }
  0x17   :  { %s4685_s1 = smov [#allocation3]   ;;  %s4345_s3 = scalar_lea.vmem %s37_s5, 128 }
  0x18   :  { %35 = dma.vmem_to_smem %s33_s23, 128, %s4685_s1, [#allocation2] }
  0x19   :  { %p4346_p5 = scmp.ne.s32.totalorder %s37_s5, %s4345_s3  ;;  %p4350_p6 = scmp.lt.s32.totalorder %s37_s5, %s37_s5 }
  0x1a   :  { %p4351_p7 = scmp.lt.s32.totalorder %s4345_s3, %s4345_s3 }
  0x1c   :  { %p4352_p8 = por %p4351_p7, %p4350_p6 }
  0x1e   :  { %p4353_p9 = pnand %p4352_p8, %p4346_p5 }
  0x20   :  { %4356 = shalt.err (!%p4353_p9)  }
  0x21   :  { %s4686_s20 = smov [#allocation4]  }
  0x22   :  { %39 = dma.vmem_to_smem %s37_s5, 128, %s4686_s20, [#allocation2] }
  0x23   :  { %4665 = dma.done.wait [#allocation2], 256 }
  0x24   :  { %4666 = vsyncadd [#allocation2], 4294967040 }
  0x25   :  { %45 = sfence }
  0x26   :  { %46 = vsyncpa [#allocation8], 0 }
  0x27   :  { %47 = vsyncpa [#allocation11], 0 }
  0x28   :  { %48 = vsyncpa [#allocation14], 0 }
  0x29   :  { %49 = vsyncpa [#allocation17], 0 }
  0x2a   :  { %50 = vsyncpa [#allocation20], 0 }
  0x2b   :  { %51 = vsyncpa [#allocation23], 0 }
  0x2c   :  { %52 = vsyncpa [#allocation9], 0 }
  0x2d   :  { %53 = vsyncpa [#allocation26], 0 }
  0x2e   :  { %54 = vsyncpa [#allocation29], 0  ;;  %s4687_s22 = smov [#allocation10]   ;;  %s4688_s25 = smov [#allocation13]  }
  0x2f   :  { %s77_s23 = sshll.u32 %s4687_s22, 4  ;;  %s101_s6 = sshll.u32 %s4688_s25, 4  ;;  %s78_s23 = int_to_ptr.vmem [resolvable:$true] %s77_s23  ;;  %s102_s6 = int_to_ptr.vmem [resolvable:$true] %s101_s6 }
  0x30   :  { %s5669_s2 = sld [smem:[#allocation45_spill]] }
  0x36   :  { %s4357_s27 = scalar_lea.hbm %s5669_s2, 16 }
  0x37   :  { %p4358_p10 = scmp.ne.s32.totalorder %s5669_s2, %s4357_s27  ;;  %p4361_p11 = scmp.lt.u32.totalorder %s4357_s27, %s5669_s2 }
  0x39   :  { %p4363_p12 = pnand %p4361_p11, %p4358_p10 }
  0x3b   :  { %4366 = shalt.err (!%p4363_p12)
}
  0x3c   :  { %s4367_s5 = scalar_lea.vmem %s78_s23, 16  ;;  %s4371_s29 = scalar_lea.vmem %s78_s23, 32 }
  0x3d   :  { %p4368_p13 = scmp.ne.s32.totalorder %s78_s23, %s4367_s5  ;;  %p4372_p0 = scmp.lt.s32.totalorder %s78_s23, %s78_s23 }
  0x3e   :  { %p4373_p1 = scmp.lt.s32.totalorder %s4371_s29, %s4367_s5 }
  0x40   :  { %p4374_p2 = por %p4373_p1, %p4372_p0 }
  0x42   :  { %p4375_p3 = pnand %p4374_p2, %p4368_p13 }
  0x44   :  { %4378 = shalt.err (!%p4375_p3)
}
  0x45   :  { %80 = dma.hbm_to_vmem [thread:$0]  %s5669_s2, 16, %s78_s23, [#allocation11]  }
  0x46   :  { %s5670_s3 = sld [smem:[#allocation49_spill]] }
  0x4c   :  { %s4379_s20 = scalar_lea.hbm %s5670_s3, 16 }
  0x4d   :  { %p4380_p4 = scmp.ne.s32.totalorder %s5670_s3, %s4379_s20  ;;  %p4383_p5 = scmp.lt.u32.totalorder %s4379_s20, %s5670_s3 }
  0x4f   :  { %p4385_p6 = pnand %p4383_p5, %p4380_p4 }
  0x51   :  { %4388 = shalt.err (!%p4385_p6)
}
  0x52   :  { %s4389_s27 = scalar_lea.vmem %s102_s6, 16  ;;  %s4393_s4 = scalar_lea.vmem %s102_s6, 32 }
  0x53   :  { %p4390_p7 = scmp.ne.s32.totalorder %s102_s6, %s4389_s27  ;;  %p4394_p8 = scmp.lt.s32.totalorder %s102_s6, %s102_s6 }
  0x54   :  { %p4395_p9 = scmp.lt.s32.totalorder %s4393_s4, %s4389_s27 }
  0x56   :  { %p4396_p10 = por %p4395_p9, %p4394_p8 }
  0x58   :  { %p4397_p11 = pnand %p4396_p10, %p4390_p7 }
  0x5a   :  { %4400 = shalt.err (!%p4397_p11)
}
  0x5b   :  { %104 = dma.hbm_to_vmem [thread:$0]  %s5670_s3, 16, %s102_s6, [#allocation14]  }
  0x5c   :  { %s4689_s8 = smov [#allocation16]   ;;  %s4401_s29 = scalar_lea.hbm %s5628_s13, 16 }
  0x5d   :  { %s125_s28 = sshll.u32 %s4689_s8, 4  ;;  %p4402_p12 = scmp.ne.s32.totalorder %s5628_s13, %s4401_s29  ;;  %s126_s28 = int_to_ptr.vmem [resolvable:$true] %s125_s28 }
  0x5e   :  { %p4405_p13 = scmp.lt.u32.totalorder %s4401_s29, %s5628_s13 }
  0x60   :  { %p4407_p0 = pnand %p4405_p13, %p4402_p12 }
  0x62   :  { %4410 = shalt.err (!%p4407_p0)
}
  0x63   :  { %s4411_s20 = scalar_lea.vmem %s126_s28, 16  ;;  %s4415_s6 = scalar_lea.vmem %s126_s28, 32 }
  0x64   :  { %p4412_p1 = scmp.ne.s32.totalorder %s126_s28, %s4411_s20  ;;  %p4416_p2 = scmp.lt.s32.totalorder %s126_s28, %s126_s28 }
  0x65   :  { %p4417_p3 = scmp.lt.s32.totalorder %s4415_s6, %s4411_s20 }
  0x67   :  { %p4418_p4 = por %p4417_p3, %p4416_p2 }
  0x69   :  { %p4419_p5 = pnand %p4418_p4, %p4412_p1 }
  0x6b   :  { %4422 = shalt.err (!%p4419_p5)
}
  0x6c   :  { %128 = dma.hbm_to_vmem [thread:$0]  %s5628_s13, 16, %s126_s28, [#allocation17]  }
  0x6d   :  { %s4690_s25 = smov [#allocation19]   ;;  %s4691_s7 = smov [#allocation7]  }
  0x6e   :  { %s148_s11 = sshll.u32 %s4690_s25, 4  ;;  %s67_s27 = sshll.u32 %s4691_s7, 4  ;;  %s149_s11 = int_to_ptr.vmem [resolvable:$true] %s148_s11  ;;  %s68_s27 = int_to_ptr.vmem [resolvable:$true] %s67_s27 }
  0x6f   :  { %s4423_s2 = scalar_lea.hbm %s5632_s17, 512 }
  0x70   :  { %p4424_p6 = scmp.ne.s32.totalorder %s5632_s17, %s4423_s2  ;;  %p4427_p7 = scmp.lt.u32.totalorder %s4423_s2, %s5632_s17 }
  0x72   :  { %p4429_p8 = pnand %p4427_p7, %p4424_p6 }
  0x74   :  { %4432 = shalt.err (!%p4429_p8)
}
  0x75   :  { %s4433_s13 = scalar_lea.vmem %s149_s11, 512  ;;  %p4438_p10 = scmp.lt.s32.totalorder %s149_s11, %s149_s11 }
  0x76   :  { %p4434_p9 = scmp.ne.s32.totalorder %s149_s11, %s4433_s13  ;;  %p4439_p11 = scmp.lt.s32.totalorder %s4433_s13, %s4433_s13 }
  0x78   :  { %p4440_p12 = por %p4439_p11, %p4438_p10 }
  0x7a   :  { %p4441_p13 = pnand %p4440_p12, %p4434_p9 }
  0x7c   :  { %4444 = shalt.err (!%p4441_p13)
}
  0x7d   :  { %s4692_s28 = smov 128   ;;  %s4693_s0 = smov 8  }
  0x7e   :  { %154 = dma.hbm_to_vmem [thread:$0]  %s5632_s17, 512, %s149_s11, [#allocation20], %s4692_s28, %s4692_s28, %s4693_s0  }
  0x7f   :  { %s5671_s6 = sld [smem:[#allocation44_spill]] }
  0x85   :  { %s4445_s3 = scalar_lea.hbm %s5671_s6, 16 }
  0x86   :  { %p4446_p0 = scmp.ne.s32.totalorder %s5671_s6, %s4445_s3  ;;  %p4449_p1 = scmp.lt.u32.totalorder %s4445_s3, %s5671_s6 }
  0x88   :  { %p4451_p2 = pnand %p4449_p1, %p4446_p0 }
  0x8a   :  { %4454 = shalt.err (!%p4451_p2)
}
  0x8b   :  { %s4455_s23 = scalar_lea.vmem %s68_s27, 16  ;;  %s4459_s2 = scalar_lea.vmem %s68_s27, 32 }
  0x8c   :  { %p4456_p3 = scmp.ne.s32.totalorder %s68_s27, %s4455_s23  ;;  %p4460_p4 = scmp.lt.s32.totalorder %s68_s27, %s68_s27 }
  0x8d   :  { %p4461_p5 = scmp.lt.s32.totalorder %s4459_s2, %s4455_s23 }
  0x8f   :  { %p4462_p6 = por %p4461_p5, %p4460_p4 }
  0x91   :  { %p4463_p7 = pnand %p4462_p6, %p4456_p3 }
  0x93   :  { %4466 = shalt.err (!%p4463_p7)
}
  0x94   :  { %70 = dma.hbm_to_vmem [thread:$0]  %s5671_s6, 16, %s68_s27, [#allocation8]  }
  0x95   :  { %s4694_s8 = smov [#allocation12]   ;;  %s4695_s5 = smov [#allocation15]  }
  0x96   :  { %s91_s9 = sshll.u32 %s4694_s8, 4  ;;  %s112_s29 = sshll.u32 %s4695_s5, 4  ;;  %s92_s9 = int_to_ptr.vmem [resolvable:$true] %s91_s9  ;;  %s113_s29 = int_to_ptr.vmem [resolvable:$true] %s112_s29 }
  0x97   :  { %s5672_s30 = sld [smem:[#allocation48_spill]] }
  0x9d   :  { %s4467_s1 = scalar_lea.hbm %s5672_s30, 16 }
  0x9e   :  { %p4468_p8 = scmp.ne.s32.totalorder %s5672_s30, %s4467_s1  ;;  %p4471_p9 = scmp.lt.u32.totalorder %s4467_s1, %s5672_s30 }
  0xa0   :  { %p4473_p10 = pnand %p4471_p9, %p4468_p8 }
  0xa2   :  { %4476 = shalt.err (!%p4473_p10)
}
  0xa3   :  { %s4477_s27 = scalar_lea.vmem %s92_s9, 16  ;;  %s4481_s6 = scalar_lea.vmem %s92_s9, 32 }
  0xa4   :  { %p4478_p11 = scmp.ne.s32.totalorder %s92_s9, %s4477_s27  ;;  %p4482_p12 = scmp.lt.s32.totalorder %s92_s9, %s92_s9 }
  0xa5   :  { %p4483_p13 = scmp.lt.s32.totalorder %s4481_s6, %s4477_s27 }
  0xa7   :  { %p4484_p0 = por %p4483_p13, %p4482_p12 }
  0xa9   :  { %p4485_p1 = pnand %p4484_p0, %p4478_p11 }
  0xab   :  { %4488 = shalt.err (!%p4485_p1)
}
  0xac   :  { %94 = dma.hbm_to_vmem [thread:$0]  %s5672_s30, 16, %s92_s9, [#allocation11]  }
  0xad   :  { %s4489_s17 = scalar_lea.hbm %s5627_s12, 512 }
  0xae   :  { %p4490_p2 = scmp.ne.s32.totalorder %s5627_s12, %s4489_s17  ;;  %p4493_p3 = scmp.lt.u32.totalorder %s4489_s17, %s5627_s12 }
  0xb0   :  { %p4495_p4 = pnand %p4493_p3, %p4490_p2 }
  0xb2   :  { %4498 = shalt.err (!%p4495_p4)
}
  0xb3   :  { %s4499_s10 = scalar_lea.vmem %s113_s29, 512  ;;  %p4504_p6 = scmp.lt.s32.totalorder %s113_s29, %s113_s29 }
  0xb4   :  { %p4500_p5 = scmp.ne.s32.totalorder %s113_s29, %s4499_s10  ;;  %p4505_p7 = scmp.lt.s32.totalorder %s4499_s10, %s4499_s10 }
  0xb6   :  { %p4506_p8 = por %p4505_p7, %p4504_p6 }
  0xb8   :  { %p4507_p9 = pnand %p4506_p8, %p4500_p5 }
  0xba   :  { %4510 = shalt.err (!%p4507_p9)
}
  0xbb   :  { %118 = dma.hbm_to_vmem [thread:$0]  %s5627_s12, 512, %s113_s29, [#allocation14], %s4692_s28, %s4692_s28, %s4693_s0  }
  0xbc   :  { %s4696_s1 = smov [#allocation18]   ;;  %s4697_s3 = smov [#allocation21]  }
  0xbd   :  { %s135_s20 = sshll.u32 %s4696_s1, 4  ;;  %s161_s22 = sshll.u32 %s4697_s3, 4  ;;  %s136_s20 = int_to_ptr.vmem [resolvable:$true] %s135_s20  ;;  %s162_s22 = int_to_ptr.vmem [resolvable:$true] %s161_s22 }
  0xbe   :  { %s4511_s6 = scalar_lea.hbm %s5629_s14, 16 }
  0xbf   :  { %p4512_p10 = scmp.ne.s32.totalorder %s5629_s14, %s4511_s6  ;;  %p4515_p11 = scmp.lt.u32.totalorder %s4511_s6, %s5629_s14 }
  0xc1   :  { %p4517_p12 = pnand %p4515_p11, %p4512_p10 }
  0xc3   :  { %4520 = shalt.err (!%p4517_p12)
}
  0xc4   :  { %s4521_s12 = scalar_lea.vmem %s136_s20, 16  ;;  %s4525_s28 = scalar_lea.vmem %s136_s20, 32 }
  0xc5   :  { %p4522_p13 = scmp.ne.s32.totalorder %s136_s20, %s4521_s12  ;;  %p4526_p0 = scmp.lt.s32.totalorder %s136_s20, %s136_s20 }
  0xc6   :  { %p4527_p1 = scmp.lt.s32.totalorder %s4525_s28, %s4521_s12 }
  0xc8   :  { %p4528_p2 = por %p4527_p1, %p4526_p0 }
  0xca   :  { %p4529_p3 = pnand %p4528_p2, %p4522_p13 }
  0xcc   :  { %4532 = shalt.err (!%p4529_p3)
}
  0xcd   :  { %138 = dma.hbm_to_vmem [thread:$0]  %s5629_s14, 16, %s136_s20, [#allocation17]  }
  0xce   :  { %s4533_s8 = scalar_lea.hbm %s5633_s18, 16 }
  0xcf   :  { %p4534_p4 = scmp.ne.s32.totalorder %s5633_s18, %s4533_s8  ;;  %p4537_p5 = scmp.lt.u32.totalorder %s4533_s8, %s5633_s18 }
  0xd1   :  { %p4539_p6 = pnand %p4537_p5, %p4534_p4 }
  0xd3   :  { %4542 = shalt.err (!%p4539_p6)
}
  0xd4   :  { %s4543_s30 = scalar_lea.vmem %s162_s22, 16  ;;  %s4547_s1 = scalar_lea.vmem %s162_s22, 32 }
  0xd5   :  { %p4544_p7 = scmp.ne.s32.totalorder %s162_s22, %s4543_s30  ;;  %p4548_p8 = scmp.lt.s32.totalorder %s162_s22, %s162_s22 }
  0xd6   :  { %p4549_p9 = scmp.lt.s32.totalorder %s4547_s1, %s4543_s30 }
  0xd8   :  { %p4550_p10 = por %p4549_p9, %p4548_p8 }
  0xda   :  { %p4551_p11 = pnand %p4550_p10, %p4544_p7 }
  0xdc   :  { %4554 = shalt.err (!%p4551_p11)
}
  0xdd   :  { %164 = dma.hbm_to_vmem [thread:$0]  %s5633_s18, 16, %s162_s22, [#allocation20]  }
  0xde   :  { %s4698_s3 = smov [#allocation22]   ;;  %s4555_s7 = scalar_lea.hbm %s5634_s19, 16 }
  0xdf   :  { %s171_s25 = sshll.u32 %s4698_s3, 4  ;;  %p4556_p12 = scmp.ne.s32.totalorder %s5634_s19, %s4555_s7  ;;  %s172_s25 = int_to_ptr.vmem [resolvable:$true] %s171_s25 }
  0xe0   :  { %p4559_p13 = scmp.lt.u32.totalorder %s4555_s7, %s5634_s19 }
  0xe2   :  { %p4561_p0 = pnand %p4559_p13, %p4556_p12 }
  0xe4   :  { %4564 = shalt.err (!%p4561_p0)
}
  0xe5   :  { %s4565_s28 = scalar_lea.vmem %s172_s25, 16  ;;  %s4569_s18 = scalar_lea.vmem %s172_s25, 32 }
  0xe6   :  { %p4566_p1 = scmp.ne.s32.totalorder %s172_s25, %s4565_s28  ;;  %p4570_p2 = scmp.lt.s32.totalorder %s172_s25, %s172_s25 }
  0xe7   :  { %p4571_p3 = scmp.lt.s32.totalorder %s4569_s18, %s4565_s28 }
  0xe9   :  { %p4572_p4 = por %p4571_p3, %p4570_p2 }
  0xeb   :  { %p4573_p5 = pnand %p4572_p4, %p4566_p1 }
  0xed   :  { %4576 = shalt.err (!%p4573_p5)
}
  0xee   :  { %174 = dma.hbm_to_vmem [thread:$0]  %s5634_s19, 16, %s172_s25, [#allocation23]  }
  0xef   :  { %4667 = dma.done.wait [#allocation8], 16  }
  0xf0   :  { %4668 = vsyncadd [#allocation8], 4294967280 }
  0xf1   :  { %4669 = dma.done.wait [#allocation11], 32  }
  0xf2   :  { %4670 = vsyncadd [#allocation11], 4294967264 }
  0xf3   :  { %4671 = dma.done.wait [#allocation14], 528  }
  0xf4   :  { %4672 = vsyncadd [#allocation14], 4294966768 }
  0xf5   :  { %4673 = dma.done.wait [#allocation17], 32  }
  0xf6   :  { %4674 = vsyncadd [#allocation17], 4294967264 }
  0xf7   :  { %4675 = dma.done.wait [#allocation20], 528  }
  0xf8   :  { %4676 = vsyncadd [#allocation20], 4294966768 }
  0xf9   :  { %4677 = dma.done.wait [#allocation23], 16  }
  0xfa   :  { %4678 = vsyncadd [#allocation23], 4294967280  ;;  %v4699_v2 = vmov 0.0|0.0   ;;  %vm4700_vm0 = vmmov 0   ;;  %v4701_v3 = vmov 0.0   ;;  %s221_s19 = sld [smem:[#allocation3]] }
  0xfb   :  { %4035 = vmatprep.subr.bf16.mxu0 %v4699_v2  ;;  %4041 = vmatprep.subr.bf16.mxu1 %v4699_v2  ;;  %s5673_s11 = sld [smem:[#allocation42_spill]]  ;;  %s5674_s9 = sld [smem:[#allocation43_spill]]  ;;  %v3431_v15 = vld [vmem:[#allocation10] ss:$0 sm:$0xff]  ;;  %vm224_vm1 = vcmask 261120   ;;  %vm1710_vm2 = vcmask 1040384  }
  0xfc   :  { %3702 = vmatprep.mubr.msk.f32.mxu0 %vm4700_vm0, %v4701_v3  ;;  %3713 = vmatprep.mubr.msk.f32.mxu1 %vm4700_vm0, %v4701_v3  ;;  %s5675_s12 = sld [smem:[#allocation41_spill]]  ;;  %s4702_s18 = smov 64   ;;  %v5051_v24 = vld [vmem:[#allocation7] sm:$0x1]  ;;  %vm1712_vm3 = vcmask 1041408   ;;  %vm1714_vm4 = vcmask 1042432  }
  0xfd   :  { %383 = vrot.lane.b32.xlu0 %v3431_v15, %s4702_s18  ;;  %s3432_s22 = sld [smem:[#allocation3 + $0x80]]  ;;  %s4703_s17 = smov 96   ;;  %vm1716_vm5 = vcmask 1043456   ;;  %vm1718_vm6 = vcmask 1044480   ;;  %vm3021_vm7 = vcmask 253952   ;;  %vm3252_vm8 = vcmask 0  }
  0xfe   :  { %s3440_s10 = sld [smem:[#allocation3 + $0x180]]  ;;  %s3462_s20 = sld [smem:[#allocation4 + $0x3]]  ;;  %vm3200_vm9 = vcmask 521216  }
  0xff   :  { %s3444_s14 = sld [smem:[#allocation3 + $0x200]]  ;;  %s3463_s3 = sld [smem:[#allocation4 + $0x4]] }
 0x100   :  { %s3448_s27 = sld [smem:[#allocation3 + $0x280]]  ;;  %s3477_s8 = sld [smem:[#allocation4 + $0x83]] }
 0x101   :  { %v211_v4 = vld [vmem:[%s5673_s11] sm:$0xff]  ;;  %v212_v5 = vld [vmem:[%s5673_s11 + $0x8] sm:$0xff]  ;;  %v213_v9 = vld [vmem:[%s5673_s11 + $0x10] sm:$0xff]  ;;  %s3452_s23 = sld [smem:[#allocation3 + $0x300]] }
 0x102   :  { %v215_v6 = vld [vmem:[%s5674_s9] sm:$0xff]  ;;  %v4998_v7 = vpack.c.bf16 %v212_v5, %v211_v4  ;;  %v216_v8 = vld [vmem:[%s5674_s9 + $0x8] sm:$0xff]  ;;  %v214_v10 = vld [vmem:[%s5673_s11 + $0x18] sm:$0xff]  ;;  %s222_s28 = scalar_lea.vmem %s5675_s12, %s221_s19  ;;  %s3436_s11 = sld [smem:[#allocation3 + $0x100]] }
 0x103   :  { %v5009_v11 = vpack.c.bf16 %v216_v8, %v215_v6  ;;  %v217_v12 = vld [vmem:[%s5674_s9 + $0x10] sm:$0xff]  ;;  %v218_v13 = vld [vmem:[%s5674_s9 + $0x18] sm:$0xff]  ;;  %v5018_v14 = vpack.c.bf16 %v214_v10, %v213_v9  ;;  %v223_v17 = vld [vmem:[%s222_s28] sm:$0x1]  ;;  %s407_s29 = scalar_lea.vmem %s5675_s12, %s3432_s22  ;;  %s3456_s0 = sld [smem:[#allocation3 + $0x380]] }
 0x104   :  { %4037 = vmatpush3.bf16.msra.mxu0 %v4998_v7  ;;  %v5022_v16 = vpack.c.bf16 %v218_v13, %v217_v12  ;;  %v408_v35 = vld [vmem:[%s407_s29] sm:$0x1]  ;;  %s763_s1 = scalar_lea.vmem %s5675_s12, %s3440_s10  ;;  %s1662_s30 = sld [smem:[#allocation4]] }
 0x105   :  { %4043 = vmatpush3.bf16.msra.mxu1 %v5009_v11  ;;  %4038 = vmatprep.subr.bf16.mxu0 %v4699_v2  ;;  %s941_s25 = scalar_lea.vmem %s5675_s12, %s3444_s14  ;;  %s3461_s14 = sld [smem:[#allocation4 + $0x2]] }
 0x106   :  { %4044 = vmatprep.subr.bf16.mxu1 %v4699_v2  ;;  %s1119_s4 = scalar_lea.vmem %s5675_s12, %s3448_s27  ;;  %s3475_s19 = sld [smem:[#allocation4 + $0x81]] }
 0x107   :  { %s1297_s22 = scalar_lea.vmem %s5675_s12, %s3452_s23  ;;  %s3476_s29 = sld [smem:[#allocation4 + $0x82]] }
 0x108   :  { %4040 = vmatpush3.bf16.msra.mxu0 %v5018_v14  ;;  %s585_s13 = scalar_lea.vmem %s5675_s12, %s3436_s11  ;;  %s5676_s11 = sld [smem:[#allocation46_spill]] }
 0x109   :  { %4046 = vmatpush3.bf16.msra.mxu1 %v5022_v16  ;;  %4047 = vmatprep.subr.bf16.mxu0 %v4699_v2  ;;  %v586_v58 = vld [vmem:[%s585_s13] sm:$0x1]  ;;  %s1475_s9 = scalar_lea.vmem %s5675_s12, %s3456_s0  ;;  %s3474_s0 = sld [smem:[#allocation4 + $0x80]] }
 0x10a   :  { %4053 = vmatprep.subr.bf16.mxu1 %v4699_v2  ;;  %s1668_s7 = scalar_lea.vmem %s5675_s12, %s1662_s30  ;;  %s3479_s13 = sld [smem:[#allocation4 + $0x85]] }
 0x10b   :  { %3703 = vmatmul.mubr.msk.f32.vlgmr.msra.gmra.mrb[0].mxu0 %vm224_vm1, %v223_v17  ;;  %s1672_s5 = scalar_lea.vmem %s5675_s12, %s3461_s14  ;;  %s3493_s10 = sld [smem:[#allocation4 + $0x105]] }
 0x10c   :  { %3714 = vmatmul.mubr.f32.vlgmr.msra.gmra.mrb[0].mxu1 %v4701_v3  ;;  %4049 = vmatpush3.bf16.msra.mxu0 %v4998_v7  ;;  %s1912_s14 = scalar_lea.vmem %s5675_s12, %s3475_s19  ;;  %s3488_s19 = sld [smem:[#allocation4 + $0x100]] }
 0x10d   :  { %4055 = vmatpush3.bf16.msra.mxu1 %v5009_v11  ;;  %4050 = vmatprep.subr.bf16.mxu0 %v4699_v2 }
 0x10e   :  { %4056 = vmatprep.subr.bf16.mxu1 %v4699_v2  ;;  %3724 = vmatprep.mubr.msk.f32.mxu0 %vm4700_vm0, %v4701_v3 }
 0x10f   :  { %3735 = vmatprep.mubr.msk.f32.mxu1 %vm4700_vm0, %v4701_v3  ;;  %s1910_s30 = scalar_lea.vmem %s5675_s12, %s3474_s0 }
 0x110   :  { %4052 = vmatpush3.bf16.msra.mxu0 %v5018_v14  ;;  %s1920_s0 = scalar_lea.vmem %s5675_s12, %s3479_s13  ;;  %s3492_s13 = sld [smem:[#allocation4 + $0x104]] }
 0x111   :  { %4058 = vmatpush3.bf16.msra.mxu1 %v5022_v16  ;;  %4059 = vmatprep.subr.bf16.mxu0 %v4699_v2 }
 0x112   :  { %4065 = vmatprep.subr.bf16.mxu1 %v4699_v2 }
 0x113   :  { %3725 = vmatmul.mubr.msk.f32.vlgmr.msra.gmra.mrb[2].mxu0 %vm224_vm1, %v408_v35 }
 0x114   :  { %4061 = vmatpush3.bf16.msra.mxu0 %v4998_v7  ;;  %3746 = vmatprep.mubr.msk.f32.mxu0 %vm4700_vm0, %v4701_v3 }
 0x115   :  { %4062 = vmatprep.subr.bf16.mxu0 %v4699_v2 }
 0x116   :  { %s2146_s28 = scalar_lea.vmem %s5675_s12, %s3492_s13  ;;  %s3505_s13 = sld [smem:[#allocation4 + $0x183]] }
 0x118   :  { %4064 = vmatpush3.bf16.msra.mxu0 %v5018_v14 }
 0x119   :  { %4071 = vmatprep.subr.bf16.mxu0 %v4699_v2 }
 0x11b   :  { %3747 = vmatmul.mubr.msk.f32.vlgmr.msra.gmra.mrb[4].mxu0 %vm224_vm1, %v586_v58 }
 0x11c   :  { %4073 = vmatpush3.bf16.msra.mxu0 %v4998_v7  ;;  %3768 = vmatprep.mubr.msk.f32.mxu0 %vm4700_vm0, %v4701_v3  ;;  %s2372_s23 = scalar_lea.vmem %s5675_s12, %s3505_s13  ;;  %s3518_s13 = sld [smem:[#allocation4 + $0x202]] }
 0x11d   :  { %4074 = vmatprep.subr.bf16.mxu0 %v4699_v2 }
 0x120   :  { %4076 = vmatpush3.bf16.msra.mxu0 %v5018_v14 }
 0x121   :  { %4083 = vmatprep.subr.bf16.mxu0 %v4699_v2 }
 0x16f   :  { %v5047_v18 = vpop.permute.xlu0 %383 }
 0x1de   :  { %v294_v19 = vpop.f32.mrb[0].mxu0 }
 0x1df   :  { %v367_v20 = vpop.f32.mrb[0].mxu1  ;;  %v3704_v21 = vpop.f32.mrb[1].mxu0  ;;  %v295_v25 = vadd.f32 %v294_v19, %v5051_v24 }
 0x1e0   :  { %v386_v22 = vadd.f32 %v5047_v18, %v367_v20  ;;  %v3715_v23 = vpop.f32.mrb[1].mxu1 }
 0x1e1   :  { %v371_v26 = vadd.f32 %v367_v20, %v295_v25 }
 0x1e2   :  { %388 = vrot.lane.b32.xlu0 %v386_v22, %s4702_s18 }
 0x1e3   :  { %v3430_v27 = vmul.f32 -1.442695, %v371_v26 }
 0x1e5   :  { %4248 = vpow2.f32 %v3430_v27 }
 0x1e6   :  { %v478_v42 = vpop.f32.mrb[2].mxu0 }
 0x1e7   :  { %v3726_v43 = vpop.f32.mrb[3].mxu0  ;;  %v479_v48 = vadd.f32 %v478_v42, %v5051_v24 }
 0x1ee   :  { %v656_v1 = vpop.f32.mrb[4].mxu0 }
 0x1ef   :  { %v4249_v28 = vpop.eup %4248  ;;  %v3748_v4 = vpop.f32.mrb[5].mxu0  ;;  %v657_v10 = vadd.f32 %v656_v1, %v5051_v24 }
 0x1f0   :  { %v375_v29 = vadd.f32 1.0, %v4249_v28 }
 0x1f2   :  { %4250 = vrcp.f32 %v375_v29 }
 0x1fc   :  { %v4251_v30 = vpop.eup %4250 }
 0x1fd   :  { %v398_v37 = vsub.f32 1.0, %v4251_v30  ;;  %v404_v39 = vmul.f32 0.0, %v4251_v30 }
 0x254   :  { %v389_v31 = vpop.permute.xlu0 %388 }
 0x255   :  { %v391_v32 = vmul.f32 %v4251_v30, %v389_v31 }
 0x257   :  { %393 = vrot.lane.b32.xlu1 %v391_v32, %s4702_s18 }
 0x2c9   :  { %v394_v33 = vpop.permute.xlu1 %393 }
 0x2ca   :  { %v396_v34 = vadd.f32 %v394_v33, %v295_v25  ;;  %v764_v25 = vld [vmem:[%s763_s1] sm:$0x1]  ;;  %s3460_s1 = sld [smem:[#allocation4 + $0x1]] }
 0x2cb   :  { %3769 = vmatmul.mubr.msk.f32.vlgmr.msra.gmra.mrb[6].mxu0 %vm224_vm1, %v764_v25 }
 0x2cc   :  { %4252 = vtanh.f32 %v396_v34  ;;  %4085 = vmatpush3.bf16.msra.mxu0 %v4998_v7  ;;  %3790 = vmatprep.mubr.msk.f32.mxu0 %vm4700_vm0, %v4701_v3 }
 0x2cd   :  { %4086 = vmatprep.subr.bf16.mxu0 %v4699_v2 }
 0x2d0   :  { %4088 = vmatpush3.bf16.msra.mxu0 %v5018_v14  ;;  %s1670_s2 = scalar_lea.vmem %s5675_s12, %s3460_s1  ;;  %s2138_s1 = scalar_lea.vmem %s5675_s12, %s3488_s19 }
 0x2d1   :  { %4095 = vmatprep.subr.bf16.mxu0 %v4699_v2  ;;  %s2148_s19 = scalar_lea.vmem %s5675_s12, %s3493_s10  ;;  %s3506_s10 = sld [smem:[#allocation4 + $0x184]] }
 0x2d6   :  { %v4253_v36 = vpop.eup %4252 }
 0x2d7   :  { %400 = vrot.lane.b32.xlu1 %v4253_v36, %s4703_s17 }
 0x349   :  { %v401_v38 = vpop.permute.xlu1 %400 }
 0x34a   :  { %v403_v40 = vmul.f32 %v401_v38, %v398_v37 }
 0x34c   :  { %v405_v41 = vadd.f32 %v404_v39, %v403_v40 }
 0x34e   :  { %483 = vrot.lane.b32.xlu0 %v405_v41, %s4703_s17 }
 0x39e   :  { %v834_v32 = vpop.f32.mrb[6].mxu0 }
 0x39f   :  { %v3770_v33 = vpop.f32.mrb[7].mxu0  ;;  %v835_v38 = vadd.f32 %v834_v32, %v5051_v24 }
 0x3c0   :  { %v484_v44 = vpop.permute.xlu0 %483 }
 0x3c1   :  { %3736 = vmatmul.mubr.msk.f32.vlgmr.msra.gmra.mrb[2].mxu1 %vm224_vm1, %v484_v44 }
 0x3c2   :  { %4067 = vmatpush3.bf16.msra.mxu1 %v5009_v11  ;;  %3757 = vmatprep.mubr.msk.f32.mxu1 %vm4700_vm0, %v4701_v3 }
 0x3c3   :  { %4068 = vmatprep.subr.bf16.mxu1 %v4699_v2 }
 0x3c6   :  { %4070 = vmatpush3.bf16.msra.mxu1 %v5022_v16 }
 0x3c7   :  { %4077 = vmatprep.subr.bf16.mxu1 %v4699_v2 }
 0x494   :  { %v553_v45 = vpop.f32.mrb[2].mxu1 }
 0x495   :  { %v564_v46 = vadd.f32 %v553_v45, %v5047_v18  ;;  %v3737_v47 = vpop.f32.mrb[3].mxu1  ;;  %v557_v49 = vadd.f32 %v553_v45, %v479_v48 }
 0x497   :  { %566 = vrot.lane.b32.xlu1 %v564_v46, %s4702_s18  ;;  %v3435_v50 = vmul.f32 -1.442695, %v557_v49 }
 0x499   :  { %4254 = vpow2.f32 %v3435_v50 }
 0x4a3   :  { %v4255_v51 = vpop.eup %4254 }
 0x4a4   :  { %v561_v52 = vadd.f32 1.0, %v4255_v51 }
 0x4a6   :  { %4256 = vrcp.f32 %v561_v52 }
 0x4b0   :  { %v4257_v53 = vpop.eup %4256 }
 0x4b1   :  { %v576_v60 = vsub.f32 1.0, %v4257_v53  ;;  %v582_v62 = vmul.f32 %v4257_v53, %v405_v41 }
 0x509   :  { %v567_v54 = vpop.permute.xlu1 %566 }
 0x50a   :  { %v569_v55 = vmul.f32 %v4257_v53, %v567_v54 }
 0x50c   :  { %571 = vrot.lane.b32.xlu0 %v569_v55, %s4702_s18 }
 0x57e   :  { %v572_v56 = vpop.permute.xlu0 %571 }
 0x57f   :  { %v574_v57 = vadd.f32 %v572_v56, %v479_v48  ;;  %v942_v48 = vld [vmem:[%s941_s25] sm:$0x1]  ;;  %s3464_s25 = sld [smem:[#allocation4 + $0x5]] }
 0x580   :  { %3791 = vmatmul.mubr.msk.f32.vlgmr.msra.gmra.mrb[8].mxu0 %vm224_vm1, %v942_v48 }
 0x581   :  { %4258 = vtanh.f32 %v574_v57  ;;  %4097 = vmatpush3.bf16.msra.mxu0 %v4998_v7  ;;  %3812 = vmatprep.mubr.msk.f32.mxu0 %vm4700_vm0, %v4701_v3 }
 0x582   :  { %4098 = vmatprep.subr.bf16.mxu0 %v4699_v2 }
 0x585   :  { %4100 = vmatpush3.bf16.msra.mxu0 %v5018_v14  ;;  %s1678_s6 = scalar_lea.vmem %s5675_s12, %s3464_s25  ;;  %s5677_s25 = sld [smem:[#allocation47_spill]] }
 0x586   :  { %4107 = vmatprep.subr.bf16.mxu0 %v4699_v2 }
 0x58b   :  { %v4259_v59 = vpop.eup %4258 }
 0x58c   :  { %578 = vrot.lane.b32.xlu1 %v4259_v59, %s4703_s17 }
 0x5fe   :  { %v579_v61 = vpop.permute.xlu1 %578 }
 0x5ff   :  { %v581_v63 = vmul.f32 %v579_v61, %v576_v60 }
 0x601   :  { %v583_v0 = vadd.f32 %v582_v62, %v581_v63 }
 0x603   :  { %661 = vrot.lane.b32.xlu0 %v583_v0, %s4703_s17 }
 0x653   :  { %v1012_v55 = vpop.f32.mrb[8].mxu0 }
 0x654   :  { %v3792_v56 = vpop.f32.mrb[9].mxu0  ;;  %v1013_v61 = vadd.f32 %v1012_v55, %v5051_v24 }
 0x675   :  { %v662_v5 = vpop.permute.xlu0 %661 }
 0x676   :  { %3758 = vmatmul.mubr.msk.f32.vlgmr.msra.gmra.mrb[4].mxu1 %vm224_vm1, %v662_v5 }
 0x677   :  { %4079 = vmatpush3.bf16.msra.mxu1 %v5009_v11  ;;  %3779 = vmatprep.mubr.msk.f32.mxu1 %vm4700_vm0, %v4701_v3 }
 0x678   :  { %4080 = vmatprep.subr.bf16.mxu1 %v4699_v2 }
 0x67b   :  { %4082 = vmatpush3.bf16.msra.mxu1 %v5022_v16 }
 0x67c   :  { %4089 = vmatprep.subr.bf16.mxu1 %v4699_v2 }
 0x749   :  { %v731_v6 = vpop.f32.mrb[4].mxu1 }
 0x74a   :  { %v742_v8 = vadd.f32 %v731_v6, %v5047_v18  ;;  %v3759_v9 = vpop.f32.mrb[5].mxu1  ;;  %v735_v12 = vadd.f32 %v731_v6, %v657_v10 }
 0x74c   :  { %744 = vrot.lane.b32.xlu1 %v742_v8, %s4702_s18  ;;  %v3439_v13 = vmul.f32 -1.442695, %v735_v12 }
 0x74e   :  { %4260 = vpow2.f32 %v3439_v13 }
 0x758   :  { %v4261_v15 = vpop.eup %4260 }
 0x759   :  { %v739_v17 = vadd.f32 1.0, %v4261_v15 }
 0x75b   :  { %4262 = vrcp.f32 %v739_v17 }
 0x765   :  { %v4263_v19 = vpop.eup %4262 }
 0x766   :  { %v754_v27 = vsub.f32 1.0, %v4263_v19  ;;  %v760_v29 = vmul.f32 %v4263_v19, %v583_v0 }
 0x7be   :  { %v745_v20 = vpop.permute.xlu1 %744 }
 0x7bf   :  { %v747_v21 = vmul.f32 %v4263_v19, %v745_v20 }
 0x7c1   :  { %749 = vrot.lane.b32.xlu0 %v747_v21, %s4702_s18 }
 0x833   :  { %v750_v22 = vpop.permute.xlu0 %749 }
 0x834   :  { %v752_v23 = vadd.f32 %v750_v22, %v657_v10  ;;  %v1120_v10 = vld [vmem:[%s1119_s4] sm:$0x1] }
 0x835   :  { %3813 = vmatmul.mubr.msk.f32.vlgmr.msra.gmra.mrb[10].mxu0 %vm224_vm1, %v1120_v10  ;;  %v3469_v10 = vld [vmem:[%s1678_s6] ss:$0 sm:$0xff] }
 0x836   :  { %4264 = vtanh.f32 %v752_v23  ;;  %4109 = vmatpush3.bf16.msra.mxu0 %v4998_v7  ;;  %3834 = vmatprep.mubr.msk.f32.mxu0 %vm4700_vm0, %v4701_v3 }
 0x837   :  { %4110 = vmatprep.subr.bf16.mxu0 %v4699_v2 }
 0x83a   :  { %4112 = vmatpush3.bf16.msra.mxu0 %v5018_v14 }
 0x83b   :  { %4119 = vmatprep.subr.bf16.mxu0 %v4699_v2 }
 0x840   :  { %v4265_v26 = vpop.eup %4264 }
 0x841   :  { %756 = vrot.lane.b32.xlu1 %v4265_v26, %s4703_s17 }
 0x8b3   :  { %v757_v28 = vpop.permute.xlu1 %756 }
 0x8b4   :  { %v759_v30 = vmul.f32 %v757_v28, %v754_v27 }
 0x8b6   :  { %v761_v31 = vadd.f32 %v760_v29, %v759_v30 }
 0x8b8   :  { %839 = vrot.lane.b32.xlu0 %v761_v31, %s4703_s17 }
 0x908   :  { %v1190_v21 = vpop.f32.mrb[10].mxu0 }
 0x909   :  { %v3814_v22 = vpop.f32.mrb[11].mxu0  ;;  %v1191_v28 = vadd.f32 %v1190_v21, %v5051_v24 }
 0x92a   :  { %v840_v34 = vpop.permute.xlu0 %839 }
 0x92b   :  { %3780 = vmatmul.mubr.msk.f32.vlgmr.msra.gmra.mrb[6].mxu1 %vm224_vm1, %v840_v34 }
 0x92c   :  { %4091 = vmatpush3.bf16.msra.mxu1 %v5009_v11  ;;  %3801 = vmatprep.mubr.msk.f32.mxu1 %vm4700_vm0, %v4701_v3 }
 0x92d   :  { %4092 = vmatprep.subr.bf16.mxu1 %v4699_v2 }
 0x930   :  { %4094 = vmatpush3.bf16.msra.mxu1 %v5022_v16 }
 0x931   :  { %4101 = vmatprep.subr.bf16.mxu1 %v4699_v2 }
 0x9fe   :  { %v909_v35 = vpop.f32.mrb[6].mxu1 }
 0x9ff   :  { %v920_v36 = vadd.f32 %v909_v35, %v5047_v18  ;;  %v3781_v37 = vpop.f32.mrb[7].mxu1  ;;  %v913_v39 = vadd.f32 %v909_v35, %v835_v38 }
 0xa01   :  { %922 = vrot.lane.b32.xlu1 %v920_v36, %s4702_s18  ;;  %v3443_v40 = vmul.f32 -1.442695, %v913_v39 }
 0xa03   :  { %4266 = vpow2.f32 %v3443_v40 }
 0xa0d   :  { %v4267_v41 = vpop.eup %4266 }
 0xa0e   :  { %v917_v42 = vadd.f32 1.0, %v4267_v41 }
 0xa10   :  { %4268 = vrcp.f32 %v917_v42 }
 0xa1a   :  { %v4269_v43 = vpop.eup %4268 }
 0xa1b   :  { %v932_v50 = vsub.f32 1.0, %v4269_v43  ;;  %v938_v52 = vmul.f32 %v4269_v43, %v761_v31 }
 0xa73   :  { %v923_v44 = vpop.permute.xlu1 %922 }
 0xa74   :  { %v925_v45 = vmul.f32 %v4269_v43, %v923_v44 }
 0xa76   :  { %927 = vrot.lane.b32.xlu0 %v925_v45, %s4702_s18 }
 0xae8   :  { %v928_v46 = vpop.permute.xlu0 %927 }
 0xae9   :  { %v930_v47 = vadd.f32 %v928_v46, %v835_v38  ;;  %v1298_v38 = vld [vmem:[%s1297_s22] sm:$0x1]  ;;  %s2374_s22 = scalar_lea.vmem %s5675_s12, %s3506_s10  ;;  %s3519_s10 = sld [smem:[#allocation4 + $0x203]] }
 0xaea   :  { %3835 = vmatmul.mubr.msk.f32.vlgmr.msra.gmra.mrb[12].mxu0 %vm224_vm1, %v1298_v38 }
 0xaeb   :  { %4270 = vtanh.f32 %v930_v47  ;;  %4121 = vmatpush3.bf16.msra.mxu0 %v4998_v7  ;;  %3856 = vmatprep.mubr.msk.f32.mxu0 %vm4700_vm0, %v4701_v3 }
 0xaec   :  { %4122 = vmatprep.subr.bf16.mxu0 %v4699_v2 }
 0xaef   :  { %4124 = vmatpush3.bf16.msra.mxu0 %v5018_v14 }
 0xaf0   :  { %4131 = vmatprep.subr.bf16.mxu0 %v4699_v2 }
 0xaf5   :  { %v4271_v49 = vpop.eup %4270 }
 0xaf6   :  { %934 = vrot.lane.b32.xlu1 %v4271_v49, %s4703_s17 }
 0xb68   :  { %v935_v51 = vpop.permute.xlu1 %934 }
 0xb69   :  { %v937_v53 = vmul.f32 %v935_v51, %v932_v50 }
 0xb6b   :  { %v939_v54 = vadd.f32 %v938_v52, %v937_v53 }
 0xb6d   :  { %1017 = vrot.lane.b32.xlu0 %v939_v54, %s4703_s17 }
 0xbbd   :  { %v1368_v45 = vpop.f32.mrb[12].mxu0 }
 0xbbe   :  { %v3836_v7 = vpop.f32.mrb[13].mxu0  ;;  %v1369_v49 = vadd.f32 %v1368_v45, %v5051_v24  ;;  %v1653_v24 = vld [vmem:[%s5676_s11 + $0x8] sm:$0xff] }
 0xbdf   :  { %v1018_v57 = vpop.permute.xlu0 %1017 }
 0xbe0   :  { %3802 = vmatmul.mubr.msk.f32.vlgmr.msra.gmra.mrb[8].mxu1 %vm224_vm1, %v1018_v57  ;;  %v1652_v57 = vld [vmem:[%s5676_s11] sm:$0xff] }
 0xbe1   :  { %4103 = vmatpush3.bf16.msra.mxu1 %v5009_v11  ;;  %3823 = vmatprep.mubr.msk.f32.mxu1 %vm4700_vm0, %v4701_v3 }
 0xbe2   :  { %4104 = vmatprep.subr.bf16.mxu1 %v4699_v2 }
 0xbe5   :  { %4106 = vmatpush3.bf16.msra.mxu1 %v5022_v16 }
 0xbe6   :  { %4113 = vmatprep.subr.bf16.mxu1 %v4699_v2 }
 0xcb3   :  { %v1087_v58 = vpop.f32.mrb[8].mxu1 }
 0xcb4   :  { %v1098_v59 = vadd.f32 %v1087_v58, %v5047_v18  ;;  %v3803_v60 = vpop.f32.mrb[9].mxu1  ;;  %v1091_v62 = vadd.f32 %v1087_v58, %v1013_v61  ;;  %v5202_v58 = vpack.c.bf16 %v1653_v24, %v1652_v57 }
 0xcb6   :  { %1100 = vrot.lane.b32.xlu1 %v1098_v59, %s4702_s18  ;;  %v3447_v63 = vmul.f32 -1.442695, %v1091_v62  ;;  %v1476_v59 = vld [vmem:[%s1475_s9] sm:$0x1]  ;;  %v1655_v62 = vld [vmem:[%s5676_s11 + $0x18] sm:$0xff]  ;;  %s1674_s9 = scalar_lea.vmem %s5675_s12, %s3462_s20  ;;  %s1914_s20 = scalar_lea.vmem %s5675_s12, %s3476_s29 }
 0xcb7   :  { %3857 = vmatmul.mubr.msk.f32.vlgmr.msra.gmra.mrb[14].mxu0 %vm224_vm1, %v1476_v59  ;;  %s3489_s29 = sld [smem:[#allocation4 + $0x101]] }
 0xcb8   :  { %4272 = vpow2.f32 %v3447_v63  ;;  %4133 = vmatpush3.bf16.msra.mxu0 %v5202_v58  ;;  %3878 = vmatprep.mubr.msk.f32.mxu0 %vm4700_vm0, %v4701_v3  ;;  %v1669_v63 = vld [vmem:[%s1668_s7] sm:$0x1]  ;;  %s1916_s7 = scalar_lea.vmem %s5675_s12, %s3477_s8  ;;  %s3490_s8 = sld [smem:[#allocation4 + $0x102]] }
 0xcb9   :  { %4134 = vmatprep.subr.bf16.mxu0 %v4699_v2 }
 0xcbd   :  { %s2140_s27 = scalar_lea.vmem %s5675_s12, %s3489_s29  ;;  %s3502_s29 = sld [smem:[#allocation4 + $0x180]] }
 0xcc2   :  { %v4273_v0 = vpop.eup %4272 }
 0xcc3   :  { %v1095_v1 = vadd.f32 1.0, %v4273_v0 }
 0xcc5   :  { %4274 = vrcp.f32 %v1095_v1  ;;  %v3465_v1 = vld [vmem:[%s1670_s2] ss:$0 sm:$0xff] }
 0xccf   :  { %v4275_v4 = vpop.eup %4274 }
 0xcd0   :  { %v1110_v13 = vsub.f32 1.0, %v4275_v4  ;;  %v1116_v17 = vmul.f32 %v4275_v4, %v939_v54 }
 0xd28   :  { %v1101_v5 = vpop.permute.xlu1 %1100 }
 0xd29   :  { %v1103_v6 = vmul.f32 %v4275_v4, %v1101_v5  ;;  %v3466_v4 = vld [vmem:[%s1672_s5] ss:$0 sm:$0xff]  ;;  %s3478_s5 = sld [smem:[#allocation4 + $0x84]] }
 0xd2a   :  { %v3467_v5 = vld [vmem:[%s1674_s9] ss:$0 sm:$0xff]  ;;  %s3507_s9 = sld [smem:[#allocation4 + $0x185]] }
 0xd2b   :  { %1105 = vrot.lane.b32.xlu0 %v1103_v6, %s4702_s18  ;;  %v1711_v6 = vsel %vm1710_vm2, %v1669_v63, %v3465_v1 }
 0xd2f   :  { %s1918_s2 = scalar_lea.vmem %s5675_s12, %s3478_s5  ;;  %s3491_s5 = sld [smem:[#allocation4 + $0x103]] }
 0xd35   :  { %s2144_s4 = scalar_lea.vmem %s5675_s12, %s3491_s5  ;;  %s3504_s5 = sld [smem:[#allocation4 + $0x182]] }
 0xd9d   :  { %v1106_v8 = vpop.permute.xlu0 %1105 }
 0xd9e   :  { %v1108_v9 = vadd.f32 %v1106_v8, %v1013_v61  ;;  %v1654_v61 = vld [vmem:[%s5676_s11 + $0x10] sm:$0xff]  ;;  %s1676_s11 = scalar_lea.vmem %s5675_s12, %s3463_s3  ;;  %s2142_s3 = scalar_lea.vmem %s5675_s12, %s3490_s8 }
 0xd9f   :  { %v5228_v0 = vpack.c.bf16 %v1655_v62, %v1654_v61  ;;  %v3468_v8 = vld [vmem:[%s1676_s11] ss:$0 sm:$0xff]  ;;  %s3503_s8 = sld [smem:[#allocation4 + $0x181]]  ;;  %s2366_s11 = scalar_lea.vmem %s5675_s12, %s3502_s29 }
 0xda0   :  { %4276 = vtanh.f32 %v1108_v9  ;;  %v1713_v9 = vsel %vm1712_vm3, %v1711_v6, %v3466_v4  ;;  %s2376_s29 = scalar_lea.vmem %s5675_s12, %s3507_s9  ;;  %s3520_s9 = sld [smem:[#allocation4 + $0x204]] }
 0xda1   :  { %4136 = vmatpush3.bf16.msra.mxu0 %v5228_v0 }
 0xda2   :  { %4143 = vmatprep.subr.bf16.mxu0 %v4699_v2 }
 0xda5   :  { %s2368_s6 = scalar_lea.vmem %s5675_s12, %s3503_s8  ;;  %s3516_s8 = sld [smem:[#allocation4 + $0x200]] }
 0xdaa   :  { %v4277_v12 = vpop.eup %4276 }
 0xdab   :  { %1112 = vrot.lane.b32.xlu1 %v4277_v12, %s4703_s17  ;;  %v1715_v12 = vsel %vm1714_vm4, %v1713_v9, %v3467_v5 }
 0xe1d   :  { %v1113_v15 = vpop.permute.xlu1 %1112 }
 0xe1e   :  { %v1115_v19 = vmul.f32 %v1113_v15, %v1110_v13  ;;  %v1717_v13 = vsel %vm1716_vm5, %v1715_v12, %v3468_v8 }
 0xe1f   :  { %v1719_v15 = vsel %vm1718_vm6, %v1717_v13, %v3469_v10 }
 0xe20   :  { %v1117_v20 = vadd.f32 %v1116_v17, %v1115_v19  ;;  %3879 = vmatmul.mubr.msk.f32.vlgmr.msra.gmra.mrb[16].mxu0 %vm224_vm1, %v1719_v15 }
 0xe21   :  { %4145 = vmatpush3.bf16.msra.mxu0 %v5202_v58  ;;  %3900 = vmatprep.mubr.msk.f32.mxu0 %vm4700_vm0, %v4701_v3 }
 0xe22   :  { %1195 = vrot.lane.b32.xlu0 %v1117_v20, %s4703_s17  ;;  %4146 = vmatprep.subr.bf16.mxu0 %v4699_v2 }
 0xe25   :  { %4148 = vmatpush3.bf16.msra.mxu0 %v5228_v0 }
 0xe26   :  { %4155 = vmatprep.subr.bf16.mxu0 %v4699_v2 }
 0xe94   :  { %v1196_v23 = vpop.permute.xlu0 %1195 }
 0xe95   :  { %3824 = vmatmul.mubr.msk.f32.vlgmr.msra.gmra.mrb[10].mxu1 %vm224_vm1, %v1196_v23 }
 0xe96   :  { %4115 = vmatpush3.bf16.msra.mxu1 %v5009_v11  ;;  %3845 = vmatprep.mubr.msk.f32.mxu1 %vm4700_vm0, %v4701_v3 }
 0xe97   :  { %4116 = vmatprep.subr.bf16.mxu1 %v4699_v2 }
 0xe9a   :  { %4118 = vmatpush3.bf16.msra.mxu1 %v5022_v16 }
 0xe9b   :  { %4125 = vmatprep.subr.bf16.mxu1 %v4699_v2 }
 0xf68   :  { %v1265_v25 = vpop.f32.mrb[10].mxu1 }
 0xf69   :  { %v1276_v26 = vadd.f32 %v1265_v25, %v5047_v18  ;;  %v3825_v27 = vpop.f32.mrb[11].mxu1  ;;  %v1269_v29 = vadd.f32 %v1265_v25, %v1191_v28  ;;  %v5259_v25 = vpop.f32.mrb[14].mxu0 }
 0xf6a   :  { %v1656_v27 = vld [vmem:[%s5677_s25] sm:$0xff] }
 0xf6b   :  { %1278 = vrot.lane.b32.xlu1 %v1276_v26, %s4702_s18  ;;  %v3451_v30 = vmul.f32 -1.442695, %v1269_v29  ;;  %v3858_v26 = vpop.f32.mrb[15].mxu0 }
 0xf6d   :  { %4278 = vpow2.f32 %v3451_v30  ;;  %v1658_v30 = vld [vmem:[%s5677_s25 + $0x10] sm:$0xff] }
 0xf77   :  { %v4279_v31 = vpop.eup %4278 }
 0xf78   :  { %v1273_v32 = vadd.f32 1.0, %v4279_v31  ;;  %v1659_v31 = vld [vmem:[%s5677_s25 + $0x18] sm:$0xff] }
 0xf7a   :  { %4280 = vrcp.f32 %v1273_v32 }
 0xf84   :  { %v4281_v33 = vpop.eup %4280 }
 0xf85   :  { %v1288_v40 = vsub.f32 1.0, %v4281_v33  ;;  %v1294_v42 = vmul.f32 %v4281_v33, %v1117_v20  ;;  %v3473_v20 = vld [vmem:[#allocation13] ss:$0 sm:$0xff] }
 0xfdd   :  { %v1279_v34 = vpop.permute.xlu1 %1278 }
 0xfde   :  { %v1281_v35 = vmul.f32 %v4281_v33, %v1279_v34  ;;  %v5277_v33 = vpack.c.bf16 %v1659_v31, %v1658_v30  ;;  %v1795_v34 = vpop.f32.mrb[16].mxu0  ;;  %v2139_v30 = vld [vmem:[%s2138_s1] sm:$0x1]  ;;  %s2602_s1 = scalar_lea.vmem %s5675_s12, %s3520_s9 }
 0xfdf   :  { %v3494_v31 = vld [vmem:[%s2140_s27] ss:$0 sm:$0xff] }
 0xfe0   :  { %1283 = vrot.lane.b32.xlu0 %v1281_v35, %s4702_s18  ;;  %v3880_v35 = vpop.f32.mrb[17].mxu0 }
 0xfe1   :  { %v3496_v35 = vld [vmem:[%s2144_s4] ss:$0 sm:$0xff] }
0x1052   :  { %v1284_v36 = vpop.permute.xlu0 %1283 }
0x1053   :  { %v1286_v37 = vadd.f32 %v1284_v36, %v1191_v28  ;;  %v1657_v28 = vld [vmem:[%s5677_s25 + $0x8] sm:$0xff]  ;;  %s2370_s25 = scalar_lea.vmem %s5675_s12, %s3504_s5  ;;  %s3517_s5 = sld [smem:[#allocation4 + $0x201]] }
0x1054   :  { %v5267_v29 = vpack.c.bf16 %v1657_v28, %v1656_v27 }
0x1055   :  { %4282 = vtanh.f32 %v1286_v37 }
0x105f   :  { %v4283_v39 = vpop.eup %4282 }
0x1060   :  { %1290 = vrot.lane.b32.xlu1 %v4283_v39, %s4703_s17 }
0x10d2   :  { %v1291_v41 = vpop.permute.xlu1 %1290 }
0x10d3   :  { %v1293_v43 = vmul.f32 %v1291_v41, %v1288_v40 }
0x10d5   :  { %v5181_v44 = vadd.f32 %v1294_v42, %v1293_v43  ;;  %v5297_v42 = vld [vmem:[#allocation12] ss:$0 sm:$0xff] }
0x10d6   :  { %v1796_v43 = vadd.f32 %v5297_v42, %v1795_v34  ;;  %v3495_v34 = vld [vmem:[%s2142_s3] ss:$0 sm:$0xff] }
0x10d7   :  { %1373 = vrot.lane.b32.xlu0 %v5181_v44, %s4703_s17 }
0x1149   :  { %v1374_v46 = vpop.permute.xlu0 %1373 }
0x114a   :  { %3846 = vmatmul.mubr.msk.f32.vlgmr.msra.gmra.mrb[12].mxu1 %vm224_vm1, %v1374_v46 }
0x114b   :  { %4127 = vmatpush3.bf16.msra.mxu1 %v5009_v11  ;;  %3867 = vmatprep.mubr.msk.f32.mxu1 %vm4700_vm0, %v4701_v3 }
0x114c   :  { %4128 = vmatprep.subr.bf16.mxu1 %v4699_v2 }
0x114f   :  { %4130 = vmatpush3.bf16.msra.mxu1 %v5022_v16 }
0x1150   :  { %4137 = vmatprep.subr.bf16.mxu1 %v4699_v2 }
0x121d   :  { %v1443_v14 = vpop.f32.mrb[12].mxu1 }
0x121e   :  { %v1454_v47 = vadd.f32 %v1443_v14, %v5047_v18  ;;  %v3847_v48 = vpop.f32.mrb[13].mxu1  ;;  %v1447_v50 = vadd.f32 %v1443_v14, %v1369_v49 }
0x1220   :  { %1456 = vrot.lane.b32.xlu1 %v1454_v47, %s4702_s18  ;;  %v3455_v51 = vmul.f32 -1.442695, %v1447_v50 }
0x1222   :  { %4284 = vpow2.f32 %v3455_v51  ;;  %v1911_v51 = vld [vmem:[%s1910_s30] sm:$0x1]  ;;  %s3521_s30 = sld [smem:[#allocation4 + $0x205]] }
0x1228   :  { %s2604_s27 = scalar_lea.vmem %s5675_s12, %s3521_s30 }
0x122c   :  { %v4285_v11 = vpop.eup %4284 }
0x122d   :  { %v1451_v52 = vadd.f32 1.0, %v4285_v11  ;;  %v3480_v11 = vld [vmem:[%s1912_s14] ss:$0 sm:$0xff]  ;;  %s2594_s14 = scalar_lea.vmem %s5675_s12, %s3516_s8 }
0x122f   :  { %4286 = vrcp.f32 %v1451_v52 }
0x1239   :  { %v4287_v53 = vpop.eup %4286 }
0x123a   :  { %v1466_v17 = vsub.f32 1.0, %v4287_v53  ;;  %v1472_v21 = vmul.f32 %v4287_v53, %v5181_v44 }
0x1292   :  { %v1457_v54 = vpop.permute.xlu1 %1456 }
0x1293   :  { %v1459_v55 = vmul.f32 %v4287_v53, %v1457_v54  ;;  %v3481_v53 = vld [vmem:[%s1914_s20] ss:$0 sm:$0xff]  ;;  %s2596_s20 = scalar_lea.vmem %s5675_s12, %s3517_s5 }
0x1294   :  { %v3482_v54 = vld [vmem:[%s1916_s7] ss:$0 sm:$0xff]  ;;  %s5678_s7 = sld [smem:[#allocation50_spill]] }
0x1295   :  { %1461 = vrot.lane.b32.xlu0 %v1459_v55, %s4702_s18  ;;  %v1952_v55 = vsel %vm1710_vm2, %v1911_v51, %v3480_v11 }
0x1296   :  { %v1953_v57 = vsel %vm1712_vm3, %v1952_v55, %v3481_v53 }
0x1297   :  { %v1954_v24 = vsel %vm1714_vm4, %v1953_v57, %v3482_v54 }
0x1307   :  { %v1462_v16 = vpop.permute.xlu0 %1461 }
0x1308   :  { %v1464_v56 = vadd.f32 %v1462_v16, %v1369_v49  ;;  %v3483_v16 = vld [vmem:[%s1918_s2] ss:$0 sm:$0xff]  ;;  %s2598_s2 = scalar_lea.vmem %s5675_s12, %s3518_s13 }
0x1309   :  { %v1955_v59 = vsel %vm1716_vm5, %v1954_v24, %v3483_v16 }
0x130a   :  { %4288 = vtanh.f32 %v1464_v56  ;;  %v3484_v56 = vld [vmem:[%s1920_s0] ss:$0 sm:$0xff]  ;;  %s2600_s0 = scalar_lea.vmem %s5675_s12, %s3519_s10 }
0x1314   :  { %v4289_v60 = vpop.eup %4288 }
0x1315   :  { %1468 = vrot.lane.b32.xlu1 %v4289_v60, %s4703_s17  ;;  %v1956_v60 = vsel %vm1718_vm6, %v1955_v59, %v3484_v56 }
0x1316   :  { %3901 = vmatmul.mubr.msk.f32.vlgmr.msra.gmra.mrb[18].mxu0 %vm224_vm1, %v1956_v60 }
0x1317   :  { %4157 = vmatpush3.bf16.msra.mxu0 %v5202_v58  ;;  %3922 = vmatprep.mubr.msk.f32.mxu0 %vm4700_vm0, %v4701_v3 }
0x1318   :  { %4158 = vmatprep.subr.bf16.mxu0 %v4699_v2 }
0x1319   :  { %1881 = vrot.lane.b32.xlu1 %v3473_v20, %s4702_s18 }
0x131b   :  { %4160 = vmatpush3.bf16.msra.mxu0 %v5228_v0 }
0x131c   :  { %4167 = vmatprep.subr.bf16.mxu0 %v4699_v2 }
0x1387   :  { %v1469_v19 = vpop.permute.xlu1 %1468 }
0x1388   :  { %v1471_v22 = vmul.f32 %v1469_v19, %v1466_v17 }
0x138a   :  { %v5253_v23 = vadd.f32 %v1472_v21, %v1471_v22 }
0x138b   :  { %v5293_v38 = vpop.permute.xlu1 %1881 }
0x138c   :  { %1551 = vrot.lane.b32.xlu0 %v5253_v23, %s4703_s17 }
0x13e9   :  { %v2026_v5 = vpop.f32.mrb[18].mxu0 }
0x13ea   :  { %v3902_v6 = vpop.f32.mrb[19].mxu0  ;;  %v2027_v13 = vadd.f32 %v5297_v42, %v2026_v5  ;;  %v3509_v5 = vld [vmem:[%s2370_s25] ss:$0 sm:$0xff] }
0x13eb   :  { %v3510_v6 = vld [vmem:[%s2372_s23] ss:$0 sm:$0xff] }
0x13fe   :  { %v1552_v32 = vpop.permute.xlu0 %1551 }
0x13ff   :  { %3868 = vmatmul.mubr.msk.f32.vlgmr.msra.gmra.mrb[14].mxu1 %vm224_vm1, %v1552_v32 }
0x1400   :  { %4139 = vmatpush3.bf16.msra.mxu1 %v5267_v29  ;;  %3889 = vmatprep.mubr.msk.f32.mxu1 %vm4700_vm0, %v4701_v3 }
0x1401   :  { %4140 = vmatprep.subr.bf16.mxu1 %v4699_v2 }
0x1404   :  { %4142 = vmatpush3.bf16.msra.mxu1 %v5277_v33 }
0x1405   :  { %4149 = vmatprep.subr.bf16.mxu1 %v4699_v2 }
0x1407   :  { %3890 = vmatmul.mubr.f32.vlgmr.msra.gmra.mrb[16].mxu1 %v4701_v3 }
0x1408   :  { %4151 = vmatpush3.bf16.msra.mxu1 %v5267_v29  ;;  %3911 = vmatprep.mubr.msk.f32.mxu1 %vm4700_vm0, %v4701_v3 }
0x1409   :  { %4152 = vmatprep.subr.bf16.mxu1 %v4699_v2 }
0x140c   :  { %4154 = vmatpush3.bf16.msra.mxu1 %v5277_v33 }
0x140d   :  { %4161 = vmatprep.subr.bf16.mxu1 %v4699_v2 }
0x14d2   :  { %v5291_v36 = vpop.f32.mrb[14].mxu1 }
0x14d3   :  { %v3869_v37 = vpop.f32.mrb[15].mxu1 }
0x14d4   :  { %v2180_v37 = vsel %vm1710_vm2, %v2139_v30, %v3494_v31 }
0x14da   :  { %v1865_v39 = vpop.f32.mrb[16].mxu1 }
0x14db   :  { %v3891_v40 = vpop.f32.mrb[17].mxu1  ;;  %v1884_v41 = vadd.f32 %v5293_v38, %v1865_v39  ;;  %v1869_v44 = vadd.f32 %v1865_v39, %v1796_v43  ;;  %v3497_v39 = vld [vmem:[%s2146_s28] ss:$0 sm:$0xff] }
0x14dc   :  { %v3498_v40 = vld [vmem:[%s2148_s19] ss:$0 sm:$0xff] }
0x14dd   :  { %1886 = vrot.lane.b32.xlu0 %v1884_v41, %s4702_s18  ;;  %v3472_v45 = vmul.f32 -1.442695, %v1869_v44  ;;  %v2181_v41 = vsel %vm1712_vm3, %v2180_v37, %v3495_v34 }
0x14df   :  { %4290 = vpow2.f32 %v3472_v45 }
0x14e9   :  { %v4291_v7 = vpop.eup %4290 }
0x14ea   :  { %v1873_v46 = vadd.f32 1.0, %v4291_v7 }
0x14ec   :  { %4292 = vrcp.f32 %v1873_v46 }
0x14f6   :  { %v4293_v14 = vpop.eup %4292 }
0x14f7   :  { %v1896_v61 = vsub.f32 1.0, %v4293_v14  ;;  %v1902_v63 = vmul.f32 0.0, %v4293_v14 }
0x154f   :  { %v1887_v47 = vpop.permute.xlu0 %1886 }
0x1550   :  { %v1889_v48 = vmul.f32 %v4293_v14, %v1887_v47 }
0x1552   :  { %1891 = vrot.lane.b32.xlu1 %v1889_v48, %s4702_s18 }
0x15c4   :  { %v1892_v49 = vpop.permute.xlu1 %1891 }
0x15c5   :  { %v1894_v50 = vadd.f32 %v1892_v49, %v1796_v43  ;;  %v2182_v43 = vsel %vm1714_vm4, %v2181_v41, %v3496_v35  ;;  %v2595_v41 = vld [vmem:[%s2594_s14] sm:$0x1] }
0x15c6   :  { %v2183_v44 = vsel %vm1716_vm5, %v2182_v43, %v3497_v39  ;;  %v3522_v43 = vld [vmem:[%s2596_s20] ss:$0 sm:$0xff] }
0x15c7   :  { %4294 = vtanh.f32 %v1894_v50  ;;  %v2184_v45 = vsel %vm1718_vm6, %v2183_v44, %v3498_v40  ;;  %v2818_v44 = vld [vmem:[%s5678_s7 + $0x8] sm:$0xff] }
0x15c8   :  { %3923 = vmatmul.mubr.msk.f32.vlgmr.msra.gmra.mrb[20].mxu0 %vm224_vm1, %v2184_v45 }
0x15c9   :  { %4169 = vmatpush3.bf16.msra.mxu0 %v5202_v58  ;;  %3944 = vmatprep.mubr.msk.f32.mxu0 %vm4700_vm0, %v4701_v3 }
0x15ca   :  { %4170 = vmatprep.subr.bf16.mxu0 %v4699_v2 }
0x15cd   :  { %4172 = vmatpush3.bf16.msra.mxu0 %v5228_v0 }
0x15ce   :  { %4179 = vmatprep.subr.bf16.mxu0 %v4699_v2 }
0x15d1   :  { %v4295_v52 = vpop.eup %4294 }
0x15d2   :  { %1898 = vrot.lane.b32.xlu0 %v4295_v52, %s4703_s17 }
0x1644   :  { %v1899_v62 = vpop.permute.xlu0 %1898 }
0x1645   :  { %v1901_v1 = vmul.f32 %v1899_v62, %v1896_v61 }
0x1647   :  { %v1903_v4 = vadd.f32 %v1902_v63, %v1901_v1  ;;  %v2367_v1 = vld [vmem:[%s2366_s11] sm:$0x1] }
0x1649   :  { %2031 = vrot.lane.b32.xlu1 %v1903_v4, %s4703_s17 }
0x169b   :  { %v2254_v49 = vpop.f32.mrb[20].mxu0 }
0x169c   :  { %v3924_v50 = vpop.f32.mrb[21].mxu0  ;;  %v2255_v54 = vadd.f32 %v5297_v42, %v2254_v49  ;;  %v3525_v49 = vld [vmem:[%s2602_s1] ss:$0 sm:$0xff] }
0x169d   :  { %v3526_v50 = vld [vmem:[%s2604_s27] ss:$0 sm:$0xff] }
0x16bb   :  { %v2032_v8 = vpop.permute.xlu1 %2031 }
0x16bc   :  { %3912 = vmatmul.mubr.msk.f32.vlgmr.msra.gmra.mrb[18].mxu1 %vm224_vm1, %v2032_v8 }
0x16bd   :  { %4163 = vmatpush3.bf16.msra.mxu1 %v5267_v29  ;;  %3933 = vmatprep.mubr.msk.f32.mxu1 %vm4700_vm0, %v4701_v3 }
0x16be   :  { %4164 = vmatprep.subr.bf16.mxu1 %v4699_v2 }
0x16c1   :  { %4166 = vmatpush3.bf16.msra.mxu1 %v5277_v33 }
0x16c2   :  { %4173 = vmatprep.subr.bf16.mxu1 %v4699_v2 }
0x178f   :  { %v2101_v9 = vpop.f32.mrb[18].mxu1 }
0x1790   :  { %v2112_v10 = vadd.f32 %v2101_v9, %v5293_v38  ;;  %v3913_v12 = vpop.f32.mrb[19].mxu1  ;;  %v2105_v15 = vadd.f32 %v2101_v9, %v2027_v13  ;;  %v3511_v9 = vld [vmem:[%s2374_s22] ss:$0 sm:$0xff] }
0x1792   :  { %2114 = vrot.lane.b32.xlu0 %v2112_v10, %s4702_s18  ;;  %v3487_v17 = vmul.f32 -1.442695, %v2105_v15  ;;  %v3512_v10 = vld [vmem:[%s2376_s29] ss:$0 sm:$0xff] }
0x1794   :  { %4296 = vpow2.f32 %v3487_v17 }
0x179e   :  { %v4297_v19 = vpop.eup %4296 }
0x179f   :  { %v2109_v20 = vadd.f32 1.0, %v4297_v19 }
0x17a1   :  { %4298 = vrcp.f32 %v2109_v20 }
0x17ab   :  { %v4299_v21 = vpop.eup %4298 }
0x17ac   :  { %v2124_v7 = vsub.f32 1.0, %v4299_v21  ;;  %v2130_v14 = vmul.f32 %v4299_v21, %v1903_v4  ;;  %v3508_v4 = vld [vmem:[%s2368_s6] ss:$0 sm:$0xff] }
0x17ad   :  { %v2408_v8 = vsel %vm1710_vm2, %v2367_v1, %v3508_v4 }
0x17ae   :  { %v2409_v12 = vsel %vm1712_vm3, %v2408_v8, %v3509_v5 }
0x1804   :  { %v2115_v22 = vpop.permute.xlu0 %2114 }
0x1805   :  { %v2117_v26 = vmul.f32 %v4299_v21, %v2115_v22 }
0x1807   :  { %2119 = vrot.lane.b32.xlu1 %v2117_v26, %s4702_s18 }
0x1879   :  { %v2120_v27 = vpop.permute.xlu1 %2119 }
0x187a   :  { %v2122_v28 = vadd.f32 %v2120_v27, %v2027_v13  ;;  %v2410_v13 = vsel %vm1714_vm4, %v2409_v12, %v3510_v6  ;;  %v4332_v27 = vld [vmem:[#allocation7] sm:$0x1] }
0x187b   :  { %v2411_v15 = vsel %vm1716_vm5, %v2410_v13, %v3511_v9 }
0x187c   :  { %4300 = vtanh.f32 %v2122_v28  ;;  %v2412_v17 = vsel %vm1718_vm6, %v2411_v15, %v3512_v10  ;;  %v1547_v28 = vadd.f32 %v4332_v27, %v5259_v25 }
0x187d   :  { %3945 = vmatmul.mubr.msk.f32.vlgmr.msra.gmra.mrb[22].mxu0 %vm224_vm1, %v2412_v17 }
0x187e   :  { %4181 = vmatpush3.bf16.msra.mxu0 %v5202_v58  ;;  %3966 = vmatprep.mubr.msk.f32.mxu0 %vm4700_vm0, %v4701_v3  ;;  %v1632_v58 = vadd.f32 %v5291_v36, %v5047_v18 }
0x187f   :  { %4182 = vmatprep.subr.bf16.mxu0 %v4699_v2 }
0x1882   :  { %4184 = vmatpush3.bf16.msra.mxu0 %v5228_v0  ;;  %v1625_v0 = vadd.f32 %v5291_v36, %v1547_v28 }
0x1883   :  { %4191 = vmatprep.subr.bf16.mxu0 %v4699_v2 }
0x1884   :  { %v3459_v30 = vmul.f32 -1.442695, %v1625_v0 }
0x1886   :  { %v4301_v32 = vpop.eup %4300 }
0x1887   :  { %2126 = vrot.lane.b32.xlu0 %v4301_v32, %s4703_s17 }
0x18f9   :  { %v2127_v46 = vpop.permute.xlu0 %2126 }
0x18fa   :  { %v2129_v47 = vmul.f32 %v2127_v46, %v2124_v7  ;;  %v3523_v7 = vld [vmem:[%s2598_s2] ss:$0 sm:$0xff] }
0x18fb   :  { %v3524_v46 = vld [vmem:[%s2600_s0] ss:$0 sm:$0xff] }
0x18fc   :  { %v2131_v48 = vadd.f32 %v2130_v14, %v2129_v47  ;;  %v2636_v14 = vsel %vm1710_vm2, %v2595_v41, %v3522_v43 }
0x18fe   :  { %2259 = vrot.lane.b32.xlu1 %v2131_v48, %s4703_s17 }
0x1950   :  { %v2482_v36 = vpop.f32.mrb[22].mxu0 }
0x1951   :  { %v3946_v37 = vpop.f32.mrb[23].mxu0 }
0x1970   :  { %v2260_v51 = vpop.permute.xlu1 %2259 }
0x1971   :  { %3934 = vmatmul.mubr.msk.f32.vlgmr.msra.gmra.mrb[20].mxu1 %vm224_vm1, %v2260_v51  ;;  %v2637_v51 = vsel %vm1712_vm3, %v2636_v14, %v3523_v7 }
0x1972   :  { %4175 = vmatpush3.bf16.msra.mxu1 %v5267_v29  ;;  %3955 = vmatprep.mubr.msk.f32.mxu1 %vm4700_vm0, %v4701_v3 }
0x1973   :  { %4176 = vmatprep.subr.bf16.mxu1 %v4699_v2 }
0x1976   :  { %4178 = vmatpush3.bf16.msra.mxu1 %v5277_v33 }
0x1977   :  { %4185 = vmatprep.subr.bf16.mxu1 %v4699_v2 }
0x1a44   :  { %v2329_v11 = vpop.f32.mrb[20].mxu1 }
0x1a45   :  { %v2340_v52 = vadd.f32 %v2329_v11, %v5293_v38  ;;  %v3935_v53 = vpop.f32.mrb[21].mxu1  ;;  %v2333_v55 = vadd.f32 %v2329_v11, %v2255_v54  ;;  %v2638_v11 = vsel %vm1714_vm4, %v2637_v51, %v3524_v46 }
0x1a46   :  { %v2639_v53 = vsel %vm1716_vm5, %v2638_v11, %v3525_v49 }
0x1a47   :  { %2342 = vrot.lane.b32.xlu0 %v2340_v52, %s4702_s18  ;;  %v3501_v16 = vmul.f32 -1.442695, %v2333_v55  ;;  %v2820_v55 = vld [vmem:[%s5678_s7 + $0x18] sm:$0xff] }
0x1a49   :  { %4302 = vpow2.f32 %v3501_v16  ;;  %v2640_v16 = vsel %vm1718_vm6, %v2639_v53, %v3526_v50  ;;  %v3008_v50 = vlaneseq }
0x1a4a   :  { %3967 = vmatmul.mubr.msk.f32.vlgmr.msra.gmra.mrb[24].mxu0 %vm224_vm1, %v2640_v16 }
0x1a4b   :  { %3988 = vmatprep.mubr.msk.f32.mxu0 %vm4700_vm0, %v4701_v3  ;;  %v5508_v11 = vshrl.u32 %v3008_v50, 7 }
0x1a53   :  { %v4303_v56 = vpop.eup %4302 }
0x1a54   :  { %v2337_v57 = vadd.f32 1.0, %v4303_v56 }
0x1a56   :  { %4304 = vrcp.f32 %v2337_v57 }
0x1a60   :  { %v4305_v24 = vpop.eup %4304 }
0x1a61   :  { %v2352_v19 = vsub.f32 1.0, %v4305_v24  ;;  %v2358_v21 = vmul.f32 %v4305_v24, %v2131_v48 }
0x1ab9   :  { %v2343_v59 = vpop.permute.xlu0 %2342 }
0x1aba   :  { %v2345_v60 = vmul.f32 %v4305_v24, %v2343_v59 }
0x1abc   :  { %2347 = vrot.lane.b32.xlu1 %v2345_v60, %s4702_s18 }
0x1b1d   :  { %v2710_v13 = vpop.f32.mrb[24].mxu0 }
0x1b1e   :  { %v3968_v15 = vpop.f32.mrb[25].mxu0  ;;  %v2711_v43 = vadd.f32 %v5297_v42, %v2710_v13  ;;  %v3101_v13 = vld [vmem:[#allocation19 + $0x10] sm:$0xff] }
0x1b1f   :  { %v3102_v15 = vld [vmem:[#allocation19 + $0x18] sm:$0xff] }
0x1b2e   :  { %v2348_v61 = vpop.permute.xlu1 %2347 }
0x1b2f   :  { %v2350_v62 = vadd.f32 %v2348_v61, %v2255_v54  ;;  %v2819_v54 = vld [vmem:[%s5678_s7 + $0x10] sm:$0xff] }
0x1b30   :  { %v4195_v56 = vpack.c.bf16 %v2820_v55, %v2819_v54 }
0x1b31   :  { %4306 = vtanh.f32 %v2350_v62  ;;  %v2483_v62 = vadd.f32 %v5297_v42, %v2482_v36  ;;  %v5511_v42 = vsub.s32 0, %v5508_v11 }
0x1b32   :  { %4308 = vpow2.f32 %v3459_v30  ;;  %v2821_v30 = vld [vmem:[#allocation15] sm:$0xff] }
0x1b3b   :  { %v4307_v63 = vpop.eup %4306 }
0x1b3c   :  { %2354 = vrot.lane.b32.xlu0 %v4307_v63, %s4703_s17  ;;  %v4309_v31 = vpop.eup %4308 }
0x1b3d   :  { %v1629_v32 = vadd.f32 1.0, %v4309_v31  ;;  %v2822_v31 = vld [vmem:[#allocation15 + $0x8] sm:$0xff] }
0x1b3f   :  { %4310 = vrcp.f32 %v1629_v32  ;;  %v4198_v32 = vpack.c.bf16 %v2822_v31, %v2821_v30 }
0x1b49   :  { %v4311_v18 = vpop.eup %4310 }
0x1b4a   :  { %v1644_v57 = vsub.f32 1.0, %v4311_v18  ;;  %v1650_v59 = vmul.f32 %v4311_v18, %v5253_v23 }
0x1bae   :  { %v2355_v20 = vpop.permute.xlu0 %2354 }
0x1baf   :  { %v2357_v22 = vmul.f32 %v2355_v20, %v2352_v19 }
0x1bb1   :  { %v5418_v26 = vadd.f32 %v2358_v21, %v2357_v22 }
0x1bb3   :  { %2487 = vrot.lane.b32.xlu1 %v5418_v26, %s4703_s17 }
0x1bb7   :  { %1634 = vrot.lane.b32.xlu1 %v1632_v58, %s4702_s18 }
0x1c25   :  { %v2488_v34 = vpop.permute.xlu1 %2487 }
0x1c26   :  { %3956 = vmatmul.mubr.msk.f32.vlgmr.msra.gmra.mrb[22].mxu1 %vm224_vm1, %v2488_v34  ;;  %v2823_v34 = vld [vmem:[#allocation15 + $0x10] sm:$0xff] }
0x1c27   :  { %4187 = vmatpush3.bf16.msra.mxu1 %v5267_v29  ;;  %3977 = vmatprep.mubr.msk.f32.mxu1 %vm4700_vm0, %v4701_v3 }
0x1c28   :  { %4188 = vmatprep.subr.bf16.mxu1 %v4699_v2 }
0x1c29   :  { %v1635_v35 = vpop.permute.xlu1 %1634 }
0x1c2a   :  { %v1637_v25 = vmul.f32 %v4311_v18, %v1635_v35  ;;  %v2824_v18 = vld [vmem:[#allocation15 + $0x18] sm:$0xff] }
0x1c2b   :  { %4190 = vmatpush3.bf16.msra.mxu1 %v5277_v33  ;;  %v2817_v33 = vld [vmem:[%s5678_s7] sm:$0xff] }
0x1c2c   :  { %1639 = vrot.lane.b32.xlu1 %v1637_v25, %s4702_s18  ;;  %4197 = vmatprep.subr.bf16.mxu1 %v4699_v2  ;;  %v4192_v52 = vpack.c.bf16 %v2818_v44, %v2817_v33  ;;  %v2816_v25 = vld [vmem:[%s5630_s15] sm:$0x1]  ;;  %s4704_s15 = smov 32  }
0x1c2d   :  { %v3011_v55 = vrot.slane %v2816_v25, %v5511_v42 }
0x1c2e   :  { %4193 = vmatpush3.bf16.msra.mxu0 %v4192_v52 }
0x1c2f   :  { %4194 = vmatprep.subr.bf16.mxu0 %v4699_v2 }
0x1c32   :  { %4196 = vmatpush3.bf16.msra.mxu0 %v4195_v56 }
0x1c33   :  { %4203 = vmatprep.subr.bf16.mxu0 %v4699_v2 }
0x1c9e   :  { %v1640_v39 = vpop.permute.xlu1 %1639 }
0x1c9f   :  { %v1642_v40 = vadd.f32 %v1640_v39, %v1547_v28  ;;  %v3533_v28 = vld [vmem:[#allocation18] ss:$0 sm:$0xff] }
0x1ca1   :  { %4312 = vtanh.f32 %v1642_v40 }
0x1cab   :  { %v4313_v29 = vpop.eup %4312 }
0x1cac   :  { %1646 = vrot.lane.b32.xlu1 %v4313_v29, %s4703_s17 }
0x1cf9   :  { %v2557_v45 = vpop.f32.mrb[22].mxu1 }
0x1cfa   :  { %v2568_v47 = vadd.f32 %v2557_v45, %v5293_v38  ;;  %v3957_v48 = vpop.f32.mrb[23].mxu1  ;;  %v2561_v63 = vadd.f32 %v2557_v45, %v2483_v62  ;;  %v2825_v45 = vld [vmem:[#allocation16] sm:$0x1] }
0x1cfc   :  { %2570 = vrot.lane.b32.xlu0 %v2568_v47, %s4702_s18  ;;  %v3515_v1 = vmul.f32 -1.442695, %v2561_v63  ;;  %v3024_v63 = vld [vmem:[%s5631_s16 + $0x8] sm:$0xff] }
0x1cfe   :  { %4314 = vpow2.f32 %v3515_v1  ;;  %v3025_v1 = vld [vmem:[%s5631_s16 + $0x10] sm:$0xff] }
0x1d08   :  { %v4315_v4 = vpop.eup %4314 }
0x1d09   :  { %v2565_v5 = vadd.f32 1.0, %v4315_v4 }
0x1d0b   :  { %4316 = vrcp.f32 %v2565_v5  ;;  %v3026_v5 = vld [vmem:[%s5631_s16 + $0x18] sm:$0xff] }
0x1d15   :  { %v4317_v6 = vpop.eup %4316 }
0x1d16   :  { %v2580_v19 = vsub.f32 1.0, %v4317_v6  ;;  %v2586_v21 = vmul.f32 %v4317_v6, %v5418_v26  ;;  %v4201_v26 = vpack.c.bf16 %v2824_v18, %v2823_v34  ;;  %v3254_v18 = vld [vmem:[%s5635_s21] sm:$0xff] }
0x1d1e   :  { %v1647_v24 = vpop.permute.xlu1 %1646 }
0x1d1f   :  { %v1649_v60 = vmul.f32 %v1647_v24, %v1644_v57 }
0x1d21   :  { %v1651_v61 = vadd.f32 %v1650_v59, %v1649_v60 }
0x1d23   :  { %2828 = vrot.lane.b32.xlu1 %v1651_v61, %s4703_s17 }
0x1d6e   :  { %v2571_v8 = vpop.permute.xlu0 %2570 }
0x1d6f   :  { %v2573_v9 = vmul.f32 %v4317_v6, %v2571_v8  ;;  %v3099_v6 = vld [vmem:[#allocation19] sm:$0xff]  ;;  %v3100_v8 = vld [vmem:[#allocation19 + $0x8] sm:$0xff] }
0x1d71   :  { %2575 = vrot.lane.b32.xlu0 %v2573_v9, %s4702_s18  ;;  %v4210_v9 = vpack.c.bf16 %v3100_v8, %v3099_v6 }
0x1d95   :  { %v2829_v10 = vpop.permute.xlu1 %2828 }
0x1d96   :  { %3989 = vmatmul.mubr.msk.f32.vlgmr.msra.gmra.mrb[26].mxu0 %vm224_vm1, %v2829_v10  ;;  %v4207_v10 = vpack.c.bf16 %v3026_v5, %v3025_v1 }
0x1d97   :  { %4010 = vmatprep.mubr.msk.f32.mxu0 %vm4700_vm0, %v4701_v3 }
0x1de3   :  { %v2576_v23 = vpop.permute.xlu0 %2575 }
0x1de4   :  { %v2578_v12 = vadd.f32 %v2576_v23, %v2483_v62  ;;  %v3023_v62 = vld [vmem:[%s5631_s16] sm:$0xff] }
0x1de5   :  { %v4204_v4 = vpack.c.bf16 %v3024_v63, %v3023_v62 }
0x1de6   :  { %4318 = vtanh.f32 %v2578_v12 }
0x1de7   :  { %4205 = vmatpush3.bf16.msra.mxu0 %v4204_v4 }
0x1de8   :  { %4206 = vmatprep.subr.bf16.mxu0 %v4699_v2 }
0x1deb   :  { %4208 = vmatpush3.bf16.msra.mxu0 %v4207_v10 }
0x1dec   :  { %4215 = vmatprep.subr.bf16.mxu0 %v4699_v2 }
0x1df0   :  { %v4319_v17 = vpop.eup %4318 }
0x1df1   :  { %2582 = vrot.lane.b32.xlu0 %v4319_v17, %s4703_s17  ;;  %v4213_v17 = vpack.c.bf16 %v3102_v15, %v3101_v13 }
0x1e63   :  { %v2583_v20 = vpop.permute.xlu0 %2582 }
0x1e64   :  { %v2585_v22 = vmul.f32 %v2583_v20, %v2580_v19 }
0x1e66   :  { %v5487_v58 = vadd.f32 %v2586_v21, %v2585_v22 }
0x1e68   :  { %2715 = vrot.lane.b32.xlu0 %v5487_v58, %s4703_s17 }
0x1e69   :  { %v2898_v27 = vpop.f32.mrb[26].mxu0 }
0x1e6a   :  { %v3990_v0 = vpop.f32.mrb[27].mxu0  ;;  %v2899_v46 = vadd.f32 %v2898_v27, %v2825_v45 }
0x1e6c   :  { %2987 = vrot.lane.b32.xlu0 %v3533_v28, %s4702_s18 }
0x1eda   :  { %v2716_v35 = vpop.permute.xlu0 %2715 }
0x1edb   :  { %3978 = vmatmul.mubr.msk.f32.vlgmr.msra.gmra.mrb[24].mxu1 %vm224_vm1, %v2716_v35  ;;  %v3255_v35 = vld [vmem:[%s5635_s21 + $0x8] sm:$0xff] }
0x1edc   :  { %4199 = vmatpush3.bf16.msra.mxu1 %v4198_v32  ;;  %3999 = vmatprep.mubr.msk.f32.mxu1 %vm4700_vm0, %v4701_v3 }
0x1edd   :  { %4200 = vmatprep.subr.bf16.mxu1 %v4699_v2 }
0x1ede   :  { %v2988_v40 = vpop.permute.xlu0 %2987 }
0x1ee0   :  { %4202 = vmatpush3.bf16.msra.mxu1 %v4201_v26  ;;  %v4216_v26 = vpack.c.bf16 %v3255_v35, %v3254_v18 }
0x1ee1   :  { %4209 = vmatprep.subr.bf16.mxu1 %v4699_v2 }
0x1ee3   :  { %4000 = vmatmul.mubr.msk.f32.vlgmr.msra.gmra.mrb[26].mxu1 %vm224_vm1, %v2816_v25  ;;  %v3257_v25 = vld [vmem:[%s5635_s21 + $0x18] sm:$0xff] }
0x1ee4   :  { %4021 = vmatprep.mubr.msk.f32.mxu1 %vm4700_vm0, %v4701_v3  ;;  %4211 = vmatpush3.bf16.msra.mxu1 %v4210_v9 }
0x1ee5   :  { %4212 = vmatprep.subr.bf16.mxu1 %v4699_v2 }
0x1ee8   :  { %4214 = vmatpush3.bf16.msra.mxu1 %v4213_v17 }
0x1fae   :  { %v2785_v36 = vpop.f32.mrb[24].mxu1 }
0x1faf   :  { %v2796_v37 = vadd.f32 %v2785_v36, %v5293_v38  ;;  %v3979_v39 = vpop.f32.mrb[25].mxu1  ;;  %v2789_v44 = vadd.f32 %v2785_v36, %v2711_v43 }
0x1fb1   :  { %2798 = vrot.lane.b32.xlu0 %v2796_v37, %s4702_s18  ;;  %v3529_v7 = vmul.f32 -1.442695, %v2789_v44 }
0x1fb3   :  { %4320 = vpow2.f32 %v3529_v7 }
0x1fb6   :  { %v2971_v29 = vpop.f32.mrb[26].mxu1 }
0x1fb7   :  { %v2990_v33 = vadd.f32 %v2988_v40, %v2971_v29  ;;  %v4001_v41 = vpop.f32.mrb[27].mxu1  ;;  %v2975_v14 = vadd.f32 %v2971_v29, %v2899_v46  ;;  %v3204_v40 = vld [vmem:[#allocation5] sm:$0x1]  ;;  %v4705_v29 = vmov 0  }
0x1fb8   :  { %4246 = vset.pattern.permute.xlu1 %v4705_v29  ;;  %4247 = vset.pattern.permute.xlu0 %v4705_v29 }
0x1fb9   :  { %2992 = vrot.lane.b32.xlu1 %v2990_v33, %s4702_s18  ;;  %v3532_v47 = vmul.f32 -1.442695, %v2975_v14  ;;  %v3218_v33 = vand.u32 127, %v3008_v50 }
0x1fbb   :  { %4322 = vpow2.f32 %v3532_v47 }
0x1fbd   :  { %v4321_v38 = vpop.eup %4320 }
0x1fbe   :  { %v2793_v48 = vadd.f32 1.0, %v4321_v38  ;;  %v3537_v38 = vld [vmem:[#allocation22] ss:$0 sm:$0xff] }
0x1fc0   :  { %4324 = vrcp.f32 %v2793_v48 }
0x1fc5   :  { %v4323_v49 = vpop.eup %4322 }
0x1fc6   :  { %v2979_v51 = vadd.f32 1.0, %v4323_v49 }
0x1fc8   :  { %4326 = vrcp.f32 %v2979_v51 }
0x1fca   :  { %v4325_v52 = vpop.eup %4324 }
0x1fcb   :  { %v2808_v0 = vsub.f32 1.0, %v4325_v52  ;;  %v2814_v31 = vmul.f32 %v4325_v52, %v5487_v58  ;;  %v3256_v58 = vld [vmem:[%s5635_s21 + $0x10] sm:$0xff]  ;;  %s4706_s21 = smov [#allocation28]  }
0x1fcc   :  { %v4219_v37 = vpack.c.bf16 %v3257_v25, %v3256_v58 }
0x1fd2   :  { %v4327_v16 = vpop.eup %4326 }
0x1fd3   :  { %v3002_v20 = vsub.f32 1.0, %v4327_v16 }
0x2023   :  { %v2799_v53 = vpop.permute.xlu0 %2798 }
0x2024   :  { %v2801_v54 = vmul.f32 %v4325_v52, %v2799_v53 }
0x2026   :  { %2803 = vrot.lane.b32.xlu0 %v2801_v54, %s4702_s18 }
0x202a   :  { %3012 = vrot.lane.b32.xlu0 %v3011_v55, %s4704_s15 }
0x202b   :  { %v2993_v56 = vpop.permute.xlu1 %2992 }
0x202c   :  { %v2995_v57 = vmul.f32 %v4327_v16, %v2993_v56 }
0x202e   :  { %2997 = vrot.lane.b32.xlu1 %v2995_v57, %s4702_s18 }
0x2098   :  { %v2804_v24 = vpop.permute.xlu0 %2803 }
0x2099   :  { %v2806_v61 = vadd.f32 %v2804_v24, %v2711_v43 }
0x209c   :  { %v3013_v19 = vpop.permute.xlu0 %3012 }
0x209d   :  { %v3015_v22 = vmul.f32 %v4327_v16, %v3013_v19 }
0x20a0   :  { %v2998_v59 = vpop.permute.xlu1 %2997 }
0x20a1   :  { %v3000_v60 = vadd.f32 %v2998_v59, %v2899_v46  ;;  %v3258_v46 = vld [vmem:[#allocation6] sm:$0x1] }
0x20a3   :  { %4328 = vtanh.f32 %v3000_v60 }
0x20a4   :  { %4330 = vtanh.f32 %v2806_v61 }
0x20ad   :  { %v4329_v23 = vpop.eup %4328 }
0x20ae   :  { %3004 = vrot.lane.b32.xlu1 %v4329_v23, %s4703_s17  ;;  %v4331_v12 = vpop.eup %4330 }
0x20b2   :  { %2810 = vrot.lane.b32.xlu1 %v4331_v12, %s4703_s17 }
0x2120   :  { %v3005_v21 = vpop.permute.xlu1 %3004 }
0x2121   :  { %v3007_v27 = vmul.f32 %v3005_v21, %v3002_v20 }
0x2123   :  { %v3016_v28 = vadd.f32 %v3015_v22, %v3007_v27 }
0x2124   :  { %v2811_v30 = vpop.permute.xlu1 %2810 }
0x2125   :  { %v2813_v32 = vmul.f32 %v2811_v30, %v2808_v0  ;;  %3018 = vrot.lane.b32.xlu0 %v3016_v28, %s4703_s17 }
0x2127   :  { %v2815_v34 = vadd.f32 %v2814_v31, %v2813_v32 }
0x2129   :  { %3104 = vrot.lane.b32.xlu1 %v2815_v34, %s4703_s17  ;;  %s3366_s17 = sshll.u32 %s4706_s21, 4  ;;  %s3367_s17 = int_to_ptr.vmem [resolvable:$true] %s3366_s17 }
0x212a   :  { %s4577_s1 = scalar_lea.vmem %s3367_s17, 16  ;;  %s4581_s11 = scalar_lea.vmem %s3367_s17, 32 }
0x212b   :  { %p4578_p6 = scmp.ne.s32.totalorder %s3367_s17, %s4577_s1  ;;  %p4582_p7 = scmp.lt.s32.totalorder %s3367_s17, %s3367_s17 }
0x212c   :  { %p4583_p8 = scmp.lt.s32.totalorder %s4581_s11, %s4577_s1 }
0x212d   :  { %3207 = vperm.xlu1 %4246, %v3204_v40  }
0x212e   :  { %p4584_p9 = por %p4583_p8, %p4582_p7 }
0x2130   :  { %p4585_p10 = pnand %p4584_p9, %p4578_p6 }
0x2131   :  { %3236 = vbcast.lane.b32.xlu1 %v3218_v33, 256 }
0x2197   :  { %v3019_v36 = vpop.permute.xlu0 %3018 }
0x2198   :  { %4011 = vmatmul.mubr.msk.f32.vlgmr.msra.gmra.mrb[28].mxu0 %vm224_vm1, %v3019_v36  ;;  %3022 = vst.msk [vmem:[#allocation28] sm:$0x1] %vm3021_vm7, %v3019_v36 }
0x2199   :  { %4217 = vmatpush3.bf16.msra.mxu0 %v4216_v26  ;;  %4032 = vmatprep.mubr.msk.f32.mxu0 %vm4700_vm0, %v4701_v3 }
0x219a   :  { %4218 = vmatprep.subr.bf16.mxu0 %v4699_v2  ;;  %v3536_v2 = vld [vmem:[#allocation21] ss:$0 sm:$0xff] }
0x219b   :  { %v3105_v39 = vpop.permute.xlu1 %3104 }
0x219c   :  { %4022 = vmatmul.mubr.msk.f32.vlgmr.msra.gmra.mrb[28].mxu1 %vm224_vm1, %v3105_v39 }
0x219d   :  { %4220 = vmatpush3.bf16.msra.mxu0 %v4219_v37 }
0x21a0   :  { %4033 = vmatmul.mubr.msk.f32.vlgmr.msra.gmra.mrb[30].mxu0 %vm224_vm1, %v3019_v36 }
0x226b   :  { %v3095_v41 = vpop.f32.mrb[28].mxu0 }
0x226c   :  { %v4012_v43 = vpop.f32.mrb[29].mxu0  ;;  %v3181_v3 = vrot.slane %v3095_v41, %v5511_v42 }
0x226f   :  { %v3174_v44 = vpop.f32.mrb[28].mxu1 }
0x2270   :  { %v3182_v45 = vadd.f32 %v3181_v3, %v3174_v44  ;;  %v4023_v7 = vpop.f32.mrb[29].mxu1 }
0x2272   :  { %v3190_v14 = vadd.f32 %v3536_v2, %v3182_v45 }
0x2273   :  { %v3325_v47 = vpop.f32.mrb[30].mxu0 }
0x2274   :  { %v3191_v48 = vmax.f32 %v3190_v14, 0.0  ;;  %v3326_v49 = vadd.f32 %v3325_v47, %v3258_v46  ;;  %v4034_v51 = vpop.f32.mrb[31].mxu0 }
0x2276   :  { %v3199_v52 = vmul.f32 %v3537_v38, %v3191_v48  ;;  %3329 = vst.msk [vmem:[#allocation27] sm:$0x1] %vm3252_vm8, %v3326_v49 }
0x2278   :  { %v3201_v50 = vsel %vm3200_vm9, %v3199_v52, 0.0 }
0x2279   :  { %3202 = vadd.xlane.f32.xlu0 %v3201_v50 }
0x227a   :  { %4588 = shalt.err (!%p4585_p10)
}
0x227b   :  { %s4589_s13 = scalar_lea.hbm %s5639_s26, 16 }
0x227c   :  { %p4590_p11 = scmp.ne.s32.totalorder %s5639_s26, %s4589_s13  ;;  %p4593_p12 = scmp.lt.u32.totalorder %s4589_s13, %s5639_s26 }
0x227e   :  { %p4595_p13 = pnand %p4593_p12, %p4590_p11 }
0x2280   :  { %4598 = shalt.err (!%p4595_p13)
}
0x2281   :  { %3369 = dma.vmem_to_hbm [thread:$0]  %s3367_s17, 16, %s5639_s26, [#allocation29]   ;;  %v3208_v53 = vpop.permute.xlu1 %3207  ;;  %v3221_v16 = vsub.s32 %v3218_v33, %v5508_v11  ;;  %vm3226_vm10 = vcmask 1045504   ;;  %vm3224_vm11 = vcmask 40960  }
0x2282   :  { %v3213_v54 = vrot.slane %v3208_v53, %v5511_v42  ;;  %s4707_s20 = smov [#allocation24]  }
0x2283   :  { %s3336_s3 = sshll.u32 %s4707_s20, 4  ;;  %s3337_s3 = int_to_ptr.vmem [resolvable:$true] %s3336_s3 }
0x2284   :  { %s4599_s25 = scalar_lea.vmem %s3337_s3, 16  ;;  %s4603_s26 = scalar_lea.vmem %s3337_s3, 32 }
0x2285   :  { %p4600_p0 = scmp.ne.s32.totalorder %s3337_s3, %s4599_s25  ;;  %p4604_p1 = scmp.lt.s32.totalorder %s3337_s3, %s3337_s3 }
0x2286   :  { %p4605_p2 = scmp.lt.s32.totalorder %s4603_s26, %s4599_s25 }
0x2288   :  { %p4606_p3 = por %p4605_p2, %p4604_p1 }
0x228a   :  { %p4607_p4 = pnand %p4606_p3, %p4600_p0 }
0x2306   :  { %v3203_v55 = vpop.xlane.xlu0 %3202 }
0x2307   :  { %v3214_v56 = vadd.f32 %v3213_v54, %v3203_v55 }
0x2309   :  { %v3215_v57 = vmax.f32 %v3214_v56, 0.0 }
0x230b   :  { %v3222_v24 = vrot.slane %v3215_v57, %v3221_v16  ;;  %v3227_v59 = vsel %vm3226_vm10, %v3215_v57, -inf }
0x230c   :  { %v3228_v60 = vrot.slane %v3227_v59, 4 }
0x230d   :  { %3225 = vst.msk [vmem:[#allocation24] sm:$0x1] %vm3224_vm11, %v3222_v24 }
0x230e   :  { %v3229_v61 = vmax.f32 %v3227_v59, %v3228_v60 }
0x230f   :  { %4610 = shalt.err (!%p4607_p4)
}
0x2310   :  { %s5679_s23 = sld [smem:[#allocation51_spill]] }
0x2316   :  { %s4611_s18 = scalar_lea.hbm %s5679_s23, 16 }
0x2317   :  { %p4612_p5 = scmp.ne.s32.totalorder %s5679_s23, %s4611_s18  ;;  %p4615_p6 = scmp.lt.u32.totalorder %s4611_s18, %s5679_s23 }
0x2319   :  { %p4617_p7 = pnand %p4615_p6, %p4612_p5 }
0x231b   :  { %4620 = shalt.err (!%p4617_p7)
}
0x231c   :  { %3339 = dma.vmem_to_hbm [thread:$0]  %s3337_s3, 16, %s5679_s23, [#allocation9]   ;;  %v3230_v11 = vrot.slane %v3229_v61, 2  ;;  %v3237_v63 = vpop.permute.xlu1 %3236  ;;  %vm3239_vm12 = vcmask 5120  }
0x231d   :  { %s4708_s29 = smov [#allocation25]   ;;  %s4709_s5 = smov [#allocation27]  }
0x231e   :  { %v3231_v42 = vmax.f32 %v3229_v61, %v3230_v11  ;;  %s3346_s8 = sshll.u32 %s4708_s29, 4  ;;  %s3356_s21 = sshll.u32 %s4709_s5, 4  ;;  %s3347_s8 = int_to_ptr.vmem [resolvable:$true] %s3346_s8  ;;  %s5583_s21 = int_to_ptr.vmem [resolvable:$true] %s3356_s21 }
0x231f   :  { %s4621_s17 = scalar_lea.vmem %s3347_s8, 16  ;;  %s4625_s1 = scalar_lea.vmem %s3347_s8, 32 }
0x2320   :  { %v3232_v62 = vrot.slane %v3231_v42, 1  ;;  %p4622_p8 = scmp.ne.s32.totalorder %s3347_s8, %s4621_s17  ;;  %p4626_p9 = scmp.lt.s32.totalorder %s3347_s8, %s3347_s8 }
0x2321   :  { %p4627_p10 = scmp.lt.s32.totalorder %s4625_s1, %s4621_s17 }
0x2322   :  { %v3233_v1 = vmax.f32 %v3231_v42, %v3232_v62 }
0x2323   :  { %p4628_p11 = por %p4627_p10, %p4626_p9 }
0x2324   :  { %vm3234_vm13 = vcmp.ge.f32.partialorder %v3215_v57, %v3233_v1 }
0x2325   :  { %v3238_v4 = vsel %vm3234_vm13, %v3237_v63, 6  ;;  %p4629_p12 = pnand %p4628_p11, %p4622_p8 }
0x2326   :  { %v3240_v5 = vsel %vm3239_vm12, %v3238_v4, 2147483647 }
0x2327   :  { %v3241_v6 = vrot.slane %v3240_v5, 4 }
0x2329   :  { %vm3242_vm14 = vcmp.lt.s32.totalorder %v3240_v5, %v3241_v6 }
0x232a   :  { %v3243_v8 = vsel %vm3242_vm14, %v3240_v5, %v3241_v6 }
0x232b   :  { %v3244_v9 = vrot.slane %v3243_v8, 2 }
0x232d   :  { %vm3245_vm15 = vcmp.lt.s32.totalorder %v3243_v8, %v3244_v9 }
0x232e   :  { %v3246_v10 = vsel %vm3245_vm15, %v3243_v8, %v3244_v9 }
0x232f   :  { %v3247_v23 = vrot.slane %v3246_v10, 1 }
0x2331   :  { %vm3248_vm0 = vcmp.lt.s32.totalorder %v3246_v10, %v3247_v23 }
0x2332   :  { %v3249_v12 = vsel %vm3248_vm0, %v3246_v10, %v3247_v23 }
0x2333   :  { %vm3250_vm1 = vcmp.lt.s32.totalorder %v3249_v12, 5 }
0x2334   :  { %v3251_v13 = vsel %vm3250_vm1, %v3249_v12, 5 }
0x2335   :  { %3253 = vst.msk [vmem:[#allocation25] sm:$0x1] %vm3252_vm8, %v3251_v13 }
0x2336   :  { %4632 = shalt.err (!%p4629_p12)
}
0x2337   :  { %s4633_s27 = scalar_lea.hbm %s5637_s24, 16 }
0x2338   :  { %p4634_p13 = scmp.ne.s32.totalorder %s5637_s24, %s4633_s27  ;;  %p4637_p0 = scmp.lt.u32.totalorder %s4633_s27, %s5637_s24 }
0x233a   :  { %p4639_p1 = pnand %p4637_p0, %p4634_p13 }
0x233c   :  { %4642 = shalt.err (!%p4639_p1)
}
0x233d   :  { %3349 = dma.vmem_to_hbm [thread:$0]  %s3347_s8, 16, %s5637_s24, [#allocation26]  }
0x233e   :  { %s4643_s15 = scalar_lea.vmem %s5583_s21, 16  ;;  %s4647_s20 = scalar_lea.vmem %s5583_s21, 32 }
0x233f   :  { %p4644_p2 = scmp.ne.s32.totalorder %s5583_s21, %s4643_s15  ;;  %p4648_p3 = scmp.lt.s32.totalorder %s5583_s21, %s5583_s21 }
0x2340   :  { %p4649_p4 = scmp.lt.s32.totalorder %s4647_s20, %s4643_s15 }
0x2342   :  { %p4650_p5 = por %p4649_p4, %p4648_p3 }
0x2344   :  { %p4651_p6 = pnand %p4650_p5, %p4644_p2 }
0x2346   :  { %4654 = shalt.err (!%p4651_p6)
}
0x2347   :  { %s5680_s26 = sld [smem:[#allocation52_spill]] }
0x234d   :  { %s4655_s7 = scalar_lea.hbm %s5680_s26, 16 }
0x234e   :  { %p4656_p7 = scmp.ne.s32.totalorder %s5680_s26, %s4655_s7  ;;  %p4659_p8 = scmp.lt.u32.totalorder %s4655_s7, %s5680_s26 }
0x2350   :  { %p4661_p9 = pnand %p4659_p8, %p4656_p7 }
0x2352   :  { %4664 = shalt.err (!%p4661_p9)
}
0x2353   :  { %3359 = dma.vmem_to_hbm [thread:$0]  %s5583_s21, 16, %s5680_s26, [#allocation26]  }
0x2354   :  { %4679 = dma.done.wait [#allocation9], 16  }
0x2355   :  { %4680 = vsyncadd [#allocation9], 4294967280 }
0x2356   :  { %4681 = dma.done.wait [#allocation26], 32  }
0x2357   :  { %4682 = vsyncadd [#allocation26], 4294967264 }
0x2358   :  { %4683 = dma.done.wait [#allocation29], 16  }
0x2359   :  { %4684 = vsyncadd [#allocation29], 4294967280 }
0x235a   :  { %3382 = vsyncpa [#allocation8], 1 }
0x235b   :  { %3383 = vsyncpa [#allocation11], 1 }
0x235c   :  { %3384 = vsyncpa [#allocation14], 1 }
0x235d   :  { %3385 = vsyncpa [#allocation17], 1 }
0x235e   :  { %3386 = vsyncpa [#allocation20], 1 }
0x235f   :  { %3387 = vsyncpa [#allocation23], 1 }
0x2360   :  { %3388 = vsyncpa [#allocation9], 1 }
0x2361   :  { %3389 = vsyncpa [#allocation26], 1 }
0x2362   :  { %3390 = vsyncpa [#allocation29], 1 }

</bundles_post_ra>
